<compile_context>
chip_gen: v7x
topology: tpu7x:2x2x1
jax: 0.10.0
libtpu: 0.0.40
codegen_flags: <defaults>
</compile_context>

<pallas_src>
from functools import partial

import jax
import jax.numpy as jnp
from jax.experimental import pallas as pl
from jax.experimental.pallas import tpu as pltpu


# Network hyper-parameters fixed by the PyTorch module.
_K1, _S1 = 8, 4
_K2, _S2 = 4, 2
_K3, _S3 = 3, 1
_HIDDEN = 512

_VMEM_LIMIT = 32 * 1024 * 1024  # safe on v5e/v6e and within v7x's 64 MiB


def _conv_out(n, k, s):
    return (n - k) // s + 1


# ----------------------------------------------------------------------------
# Fused forward kernel (one image per grid step).
# ----------------------------------------------------------------------------
def _dqn_fused_kernel(x1e_ref, x1o_ref,
                      e1_ref, c1b_ref, e2_ref, c2b_ref, e3_ref, c3b_ref,
                      wf1_ref, bf1_ref, wf2_ref, bf2_ref, o_ref,
                      *, ho2, ho3):
    f32 = jnp.float32
    bf16 = jnp.bfloat16
    k1 = e1_ref.shape[0]
    k2 = e2_ref.shape[0]
    k3 = e3_ref.shape[0]

    # ---- conv1 (+bias, ReLU): even / odd output-row parity phases ----------
    def conv1_phase(x_ref):
        acc = None
        for kh in range(k1):
            t = jnp.dot(x_ref[0, kh], e1_ref[kh], preferred_element_type=f32)
            acc = t if acc is None else acc + t
        return jnp.maximum(acc + c1b_ref[...], 0.0)       # f32 (rows, Wo1*C1)

    out1e = conv1_phase(x1e_ref)                           # even conv1 rows
    out1o = conv1_phase(x1o_ref)                           # odd  conv1 rows

    # ---- conv2 (+bias, ReLU): stride-2 rows via parity phase selection -----
    acc2 = None
    for kh in range(k2):
        src = out1e if kh % 2 == 0 else out1o
        xs = src[kh // 2: kh // 2 + ho2, :].astype(bf16)   # stride-1 slice
        t = jnp.dot(xs, e2_ref[kh], preferred_element_type=f32)
        acc2 = t if acc2 is None else acc2 + t
    out2 = jnp.maximum(acc2 + c2b_ref[...], 0.0)           # f32 (ho2, Wo2*C2)

    # ---- conv3 (+bias, ReLU): stride 1 --------------------------------------
    acc3 = None
    for kh in range(k3):
        xs = out2[kh: kh + ho3, :].astype(bf16)
        t = jnp.dot(xs, e3_ref[kh], preferred_element_type=f32)
        acc3 = t if acc3 is None else acc3 + t
    out3 = jnp.maximum(acc3 + c3b_ref[...], 0.0)           # f32 (ho3, Wo3*C3)

    # ---- fc1 (+ReLU) and fc2: hidden stays in vregs --------------------------
    acc_h = None
    for h in range(ho3):
        t = jnp.dot(out3[h: h + 1, :].astype(bf16), wf1_ref[h],
                    preferred_element_type=f32)
        acc_h = t if acc_h is None else acc_h + t
    hidden = jnp.maximum(acc_h + bf1_ref[...], 0.0).astype(bf16)   # (1, 512)

    q = jnp.dot(hidden, wf2_ref[...], preferred_element_type=f32) + bf2_ref[...]
    o_ref[0] = q.astype(o_ref.dtype)                       # (1, n_actions)


# ----------------------------------------------------------------------------
# Parameter prep (one-time, outside jit).
# ----------------------------------------------------------------------------
def _expand_conv_weight(w, w_in, stride):
    """w: (Cout, Cin, k, k) torch layout -> E: (k, w_in*Cin, Wo*Cout).

    Folds the kw loop and the W-direction stride into a sparse weight matrix:
    E[kh, w*Cin+ci, wo*Cout+co] = w[co, ci, kh, w - stride*wo] (0 if outside).
    """
    cout, cin, k, _ = w.shape
    wo = _conv_out(w_in, k, stride)
    w_t = jnp.transpose(w, (2, 3, 1, 0))                   # (kh, kw, Cin, Cout)
    e = jnp.zeros((k, w_in, cin, wo, cout), jnp.float32)
    for o in range(wo):
        e = e.at[:, stride * o: stride * o + k, :, o, :].set(w_t)
    return e.reshape(k, w_in * cin, wo * cout)


def init_params(key, in_c, feat_size, n_actions):
    """PyTorch layouts: conv (Cout, Cin, kh, kw); fc stored as (K, N)."""
    ks = jax.random.split(key, 10)
    scale = 0.05
    return {
        "w1": scale * jax.random.normal(ks[0], (32, in_c, _K1, _K1), jnp.float32),
        "b1": scale * jax.random.normal(ks[1], (32,), jnp.float32),
        "w2": scale * jax.random.normal(ks[2], (64, 32, _K2, _K2), jnp.float32),
        "b2": scale * jax.random.normal(ks[3], (64,), jnp.float32),
        "w3": scale * jax.random.normal(ks[4], (64, 64, _K3, _K3), jnp.float32),
        "b3": scale * jax.random.normal(ks[5], (64,), jnp.float32),
        "wf1": scale * jax.random.normal(ks[6], (feat_size, _HIDDEN), jnp.float32),
        "bf1": scale * jax.random.normal(ks[7], (_HIDDEN,), jnp.float32),
        "wf2": scale * jax.random.normal(ks[8], (_HIDDEN, n_actions), jnp.float32),
        "bf2": scale * jax.random.normal(ks[9], (n_actions,), jnp.float32),
    }


def prepare_params(p, input_hw):
    """One-time layout prep: expanded conv weights, tiled biases, fc1 rows
    permuted so the kernel consumes the (h, w, c) layout directly."""
    H, W = input_hw
    c1, c2, c3 = p["w1"].shape[0], p["w2"].shape[0], p["w3"].shape[0]
    wo1 = _conv_out(W, _K1, _S1)
    wo2 = _conv_out(wo1, _K2, _S2)
    wo3 = _conv_out(wo2, _K3, _S3)
    ho1 = _conv_out(H, _K1, _S1)
    ho2 = _conv_out(ho1, _K2, _S2)
    ho3 = _conv_out(ho2, _K3, _S3)
    assert p["wf1"].shape[0] == c3 * ho3 * wo3, "fc1 in_features mismatch"
    bf16 = jnp.bfloat16
    f32 = jnp.float32

    e1 = _expand_conv_weight(p["w1"], W, _S1).astype(bf16)     # (K1, W*Cin,   wo1*32)
    e2 = _expand_conv_weight(p["w2"], wo1, _S2).astype(bf16)   # (K2, wo1*32,  wo2*64)
    e3 = _expand_conv_weight(p["w3"], wo2, _S3).astype(bf16)   # (K3, wo2*64,  wo3*64)

    c1b = jnp.tile(p["b1"], wo1).reshape(1, wo1 * c1).astype(f32)
    c2b = jnp.tile(p["b2"], wo2).reshape(1, wo2 * c2).astype(f32)
    c3b = jnp.tile(p["b3"], wo3).reshape(1, wo3 * c3).astype(f32)

    # torch's view(N, -1) flattens NCHW (f = c*H3*W3 + h*W3 + w); our conv3
    # output is [h rows, (w, c) lanes] -> permute fc1's rows once, split per h.
    wf1 = p["wf1"].reshape(c3, ho3, wo3, _HIDDEN)
    wf1 = jnp.transpose(wf1, (1, 2, 0, 3)).reshape(ho3, wo3 * c3, _HIDDEN)

    return {
        "e1": e1, "c1b": c1b, "e2": e2, "c2b": c2b, "e3": e3, "c3b": c3b,
        "wf1": wf1.astype(bf16),
        "bf1": p["bf1"].reshape(1, _HIDDEN).astype(f32),
        "wf2": p["wf2"].astype(bf16),
        "bf2": p["bf2"].reshape(1, -1).astype(f32),
    }


# ----------------------------------------------------------------------------
# Forward wrapper.
# ----------------------------------------------------------------------------
def dqn_forward(x_nchw, params):
    """x_nchw: (N, C, H, W) float -> Q-values (N, n_actions) float32."""
    N, C, H, W = x_nchw.shape
    ho1 = _conv_out(H, _K1, _S1)
    ho2 = _conv_out(ho1, _K2, _S2)
    ho3 = _conv_out(ho2, _K3, _S3)
    ho1e, ho1o = (ho1 + 1) // 2, ho1 // 2
    for kh in range(_K2):          # parity phases must cover conv2's windows
        assert kh // 2 + ho2 <= (ho1e if kh % 2 == 0 else ho1o)

    # NCHW -> NHWC -> (N, H, W*C) lane-dense rows, bf16 activations.
    xf = jnp.transpose(x_nchw, (0, 2, 3, 1)).astype(jnp.bfloat16)
    xf = xf.reshape(N, H, W * C)
    wc = W * C

    # Gather conv1's input rows per kernel row kh, split by output-row parity,
    # so the kernel only ever does integer / stride-1 indexing (~2x row
    # duplication on a tiny tensor vs. 4x for a full im2col patch matrix).
    x1e = jnp.stack(
        [xf[:, kh: kh + 2 * _S1 * (ho1e - 1) + 1: 2 * _S1, :] for kh in range(_K1)],
        axis=1)                                            # (N, K1, ho1e, W*C)
    x1o = jnp.stack(
        [xf[:, _S1 + kh: _S1 + kh + 2 * _S1 * (ho1o - 1) + 1: 2 * _S1, :]
         for kh in range(_K1)],
        axis=1)                                            # (N, K1, ho1o, W*C)

    n_actions = params["wf2"].shape[1]

    def resident(a):               # whole array VMEM-resident across the grid
        nd = a.ndim
        return pl.BlockSpec(a.shape, lambda i, nd=nd: (0,) * nd)

    out = pl.pallas_call(
        partial(_dqn_fused_kernel, ho2=ho2, ho3=ho3),
        out_shape=jax.ShapeDtypeStruct((N, 1, n_actions), jnp.float32),
        grid=(N,),
        in_specs=[
            pl.BlockSpec((1, _K1, ho1e, wc), lambda i: (i, 0, 0, 0)),
            pl.BlockSpec((1, _K1, ho1o, wc), lambda i: (i, 0, 0, 0)),
            resident(params["e1"]), resident(params["c1b"]),
            resident(params["e2"]), resident(params["c2b"]),
            resident(params["e3"]), resident(params["c3b"]),
            resident(params["wf1"]), resident(params["bf1"]),
            resident(params["wf2"]), resident(params["bf2"]),
        ],
        out_specs=pl.BlockSpec((1, 1, n_actions), lambda i: (i, 0, 0)),
        compiler_params=pltpu.CompilerParams(
            dimension_semantics=("parallel",),
            vmem_limit_bytes=_VMEM_LIMIT),
    )(x1e, x1o, params["e1"], params["c1b"], params["e2"], params["c2b"],
      params["e3"], params["c3b"], params["wf1"], params["bf1"],
      params["wf2"], params["bf2"])
    return out.reshape(N, n_actions)


# ----------------------------------------------------------------------------
# Pure-JAX reference (f32) for a correctness check.
# ----------------------------------------------------------------------------
def dqn_reference(x_nchw, p):
    x = jnp.transpose(x_nchw, (0, 2, 3, 1)).astype(jnp.float32)

    def conv(x, w, b, s):
        y = jax.lax.conv_general_dilated(
            x, jnp.transpose(w, (2, 3, 1, 0)), (s, s), "VALID",
            dimension_numbers=("NHWC", "HWIO", "NHWC"))
        return jax.nn.relu(y + b)

    x = conv(x, p["w1"], p["b1"], _S1)
    x = conv(x, p["w2"], p["b2"], _S2)
    x = conv(x, p["w3"], p["b3"], _S3)
    x = jnp.transpose(x, (0, 3, 1, 2)).reshape(x.shape[0], -1)  # torch flatten
    h = jax.nn.relu(x @ p["wf1"] + p["bf1"])
    return h @ p["wf2"] + p["bf2"]


if __name__ == "__main__":
    # Small shapes consistent with the module: 48x48x4 input survives the
    # conv stack (48 -> 11 -> 4 -> 2), feature size 64*2*2 = 256.
    batch, C, H, W = 2, 4, 48, 48
    n_actions = 6
    ho1 = _conv_out(H, _K1, _S1)
    ho2 = _conv_out(ho1, _K2, _S2)
    ho3 = _conv_out(ho2, _K3, _S3)
    wo3 = _conv_out(_conv_out(_conv_out(W, _K1, _S1), _K2, _S2), _K3, _S3)
    feat_size = 64 * ho3 * wo3

    key = jax.random.PRNGKey(0)
    kx, kp = jax.random.split(key)
    x = jax.random.normal(kx, (batch, C, H, W), jnp.float32)   # NCHW like torch
    raw_params = init_params(kp, C, feat_size, n_actions)
    params = prepare_params(raw_params, (H, W))                # one-time, eager

    fwd = jax.jit(dqn_forward)
    out = jax.block_until_ready(fwd(x, params))
    assert out.shape == (batch, n_actions), out.shape
    assert bool(jnp.all(jnp.isfinite(out)))

    ref = dqn_reference(x, raw_params)
    err = float(jnp.max(jnp.abs(out - ref)))
    assert err < 5e-2, f"max abs error vs f32 reference: {err}"
    print("KERNEL_OK")
</pallas_src>

<mosaic_0001>
module attributes {stable_mosaic.version = 11 : i64} {
  func.func @_dqn_fused_kernel(%arg0: i32, %arg1: memref<1x8x6x192xbf16, #tpu.memory_space<vmem>>, %arg2: memref<1x8x5x192xbf16, #tpu.memory_space<vmem>>, %arg3: memref<8x192x352xbf16, #tpu.memory_space<vmem>>, %arg4: memref<1x352xf32, #tpu.memory_space<vmem>>, %arg5: memref<4x352x256xbf16, #tpu.memory_space<vmem>>, %arg6: memref<1x256xf32, #tpu.memory_space<vmem>>, %arg7: memref<3x256x128xbf16, #tpu.memory_space<vmem>>, %arg8: memref<1x128xf32, #tpu.memory_space<vmem>>, %arg9: memref<2x128x512xbf16, #tpu.memory_space<vmem>>, %arg10: memref<1x512xf32, #tpu.memory_space<vmem>>, %arg11: memref<512x6xbf16, #tpu.memory_space<vmem>>, %arg12: memref<1x6xf32, #tpu.memory_space<vmem>>, %arg13: memref<1x1x6xf32, #tpu.memory_space<vmem>>) attributes {dimension_semantics = [#tpu.dimension_semantics<parallel>], iteration_bounds = array<i64: 2>, scalar_prefetch = 0 : i64, scratch_operands = 0 : i64, tpu.core_type = #tpu.core_type<tc>, window_params = [{transform_indices = @transform_0, window_bounds = array<i64: 1, 8, 6, 192>}, {transform_indices = @transform_1, window_bounds = array<i64: 1, 8, 5, 192>}, {pipeline_mode = #tpu.pipeline_mode<synchronous>, transform_indices = @transform_2, window_bounds = array<i64: 8, 192, 352>}, {pipeline_mode = #tpu.pipeline_mode<synchronous>, transform_indices = @transform_3, window_bounds = array<i64: 1, 352>}, {pipeline_mode = #tpu.pipeline_mode<synchronous>, transform_indices = @transform_4, window_bounds = array<i64: 4, 352, 256>}, {pipeline_mode = #tpu.pipeline_mode<synchronous>, transform_indices = @transform_5, window_bounds = array<i64: 1, 256>}, {pipeline_mode = #tpu.pipeline_mode<synchronous>, transform_indices = @transform_6, window_bounds = array<i64: 3, 256, 128>}, {pipeline_mode = #tpu.pipeline_mode<synchronous>, transform_indices = @transform_7, window_bounds = array<i64: 1, 128>}, {pipeline_mode = #tpu.pipeline_mode<synchronous>, transform_indices = @transform_8, window_bounds = array<i64: 2, 128, 512>}, {pipeline_mode = #tpu.pipeline_mode<synchronous>, transform_indices = @transform_9, window_bounds = array<i64: 1, 512>}, {pipeline_mode = #tpu.pipeline_mode<synchronous>, transform_indices = @transform_10, window_bounds = array<i64: 512, 6>}, {pipeline_mode = #tpu.pipeline_mode<synchronous>, transform_indices = @transform_11, window_bounds = array<i64: 1, 6>}, {transform_indices = @transform_12, window_bounds = array<i64: 1, 1, 6>}]} {
    %c0 = arith.constant 0 : index
    %c0_0 = arith.constant 0 : index
    %c0_1 = arith.constant 0 : index
    %c0_2 = arith.constant 0 : index
    %0 = vector.load %arg1[%c0, %c0_0, %c0_1, %c0_2] : memref<1x8x6x192xbf16, #tpu.memory_space<vmem>>, vector<1x1x6x192xbf16>
    %1 = vector.shape_cast %0 : vector<1x1x6x192xbf16> to vector<6x192xbf16>
    %c0_3 = arith.constant 0 : index
    %c0_4 = arith.constant 0 : index
    %c0_5 = arith.constant 0 : index
    %2 = vector.load %arg3[%c0_3, %c0_4, %c0_5] : memref<8x192x352xbf16, #tpu.memory_space<vmem>>, vector<1x192x352xbf16>
    %3 = vector.shape_cast %2 : vector<1x192x352xbf16> to vector<192x352xbf16>
    %cst = arith.constant dense<0.000000e+00> : vector<6x352xf32>
    %4 = tpu.matmul %1, %3, %cst {dimension_numbers = #tpu.dot_dimension_numbers<[1], [0], [0], [1], [0, 0, 1, 1], [], []>} : vector<6x192xbf16>, vector<192x352xbf16>, vector<6x352xf32> -> vector<6x352xf32>
    %c0_6 = arith.constant 0 : index
    %c1 = arith.constant 1 : index
    %c0_7 = arith.constant 0 : index
    %c0_8 = arith.constant 0 : index
    %5 = vector.load %arg1[%c0_6, %c1, %c0_7, %c0_8] : memref<1x8x6x192xbf16, #tpu.memory_space<vmem>>, vector<1x1x6x192xbf16>
    %6 = vector.shape_cast %5 : vector<1x1x6x192xbf16> to vector<6x192xbf16>
    %c1_9 = arith.constant 1 : index
    %c0_10 = arith.constant 0 : index
    %c0_11 = arith.constant 0 : index
    %7 = vector.load %arg3[%c1_9, %c0_10, %c0_11] : memref<8x192x352xbf16, #tpu.memory_space<vmem>>, vector<1x192x352xbf16>
    %8 = vector.shape_cast %7 : vector<1x192x352xbf16> to vector<192x352xbf16>
    %cst_12 = arith.constant dense<0.000000e+00> : vector<6x352xf32>
    %9 = tpu.matmul %6, %8, %cst_12 {dimension_numbers = #tpu.dot_dimension_numbers<[1], [0], [0], [1], [0, 0, 1, 1], [], []>} : vector<6x192xbf16>, vector<192x352xbf16>, vector<6x352xf32> -> vector<6x352xf32>
    %10 = arith.addf %4, %9 : vector<6x352xf32>
    %c0_13 = arith.constant 0 : index
    %c2 = arith.constant 2 : index
    %c0_14 = arith.constant 0 : index
    %c0_15 = arith.constant 0 : index
    %11 = vector.load %arg1[%c0_13, %c2, %c0_14, %c0_15] : memref<1x8x6x192xbf16, #tpu.memory_space<vmem>>, vector<1x1x6x192xbf16>
    %12 = vector.shape_cast %11 : vector<1x1x6x192xbf16> to vector<6x192xbf16>
    %c2_16 = arith.constant 2 : index
    %c0_17 = arith.constant 0 : index
    %c0_18 = arith.constant 0 : index
    %13 = vector.load %arg3[%c2_16, %c0_17, %c0_18] : memref<8x192x352xbf16, #tpu.memory_space<vmem>>, vector<1x192x352xbf16>
    %14 = vector.shape_cast %13 : vector<1x192x352xbf16> to vector<192x352xbf16>
    %cst_19 = arith.constant dense<0.000000e+00> : vector<6x352xf32>
    %15 = tpu.matmul %12, %14, %cst_19 {dimension_numbers = #tpu.dot_dimension_numbers<[1], [0], [0], [1], [0, 0, 1, 1], [], []>} : vector<6x192xbf16>, vector<192x352xbf16>, vector<6x352xf32> -> vector<6x352xf32>
    %16 = arith.addf %10, %15 : vector<6x352xf32>
    %c0_20 = arith.constant 0 : index
    %c3 = arith.constant 3 : index
    %c0_21 = arith.constant 0 : index
    %c0_22 = arith.constant 0 : index
    %17 = vector.load %arg1[%c0_20, %c3, %c0_21, %c0_22] : memref<1x8x6x192xbf16, #tpu.memory_space<vmem>>, vector<1x1x6x192xbf16>
    %18 = vector.shape_cast %17 : vector<1x1x6x192xbf16> to vector<6x192xbf16>
    %c3_23 = arith.constant 3 : index
    %c0_24 = arith.constant 0 : index
    %c0_25 = arith.constant 0 : index
    %19 = vector.load %arg3[%c3_23, %c0_24, %c0_25] : memref<8x192x352xbf16, #tpu.memory_space<vmem>>, vector<1x192x352xbf16>
    %20 = vector.shape_cast %19 : vector<1x192x352xbf16> to vector<192x352xbf16>
    %cst_26 = arith.constant dense<0.000000e+00> : vector<6x352xf32>
    %21 = tpu.matmul %18, %20, %cst_26 {dimension_numbers = #tpu.dot_dimension_numbers<[1], [0], [0], [1], [0, 0, 1, 1], [], []>} : vector<6x192xbf16>, vector<192x352xbf16>, vector<6x352xf32> -> vector<6x352xf32>
    %22 = arith.addf %16, %21 : vector<6x352xf32>
    %c0_27 = arith.constant 0 : index
    %c4 = arith.constant 4 : index
    %c0_28 = arith.constant 0 : index
    %c0_29 = arith.constant 0 : index
    %23 = vector.load %arg1[%c0_27, %c4, %c0_28, %c0_29] : memref<1x8x6x192xbf16, #tpu.memory_space<vmem>>, vector<1x1x6x192xbf16>
    %24 = vector.shape_cast %23 : vector<1x1x6x192xbf16> to vector<6x192xbf16>
    %c4_30 = arith.constant 4 : index
    %c0_31 = arith.constant 0 : index
    %c0_32 = arith.constant 0 : index
    %25 = vector.load %arg3[%c4_30, %c0_31, %c0_32] : memref<8x192x352xbf16, #tpu.memory_space<vmem>>, vector<1x192x352xbf16>
    %26 = vector.shape_cast %25 : vector<1x192x352xbf16> to vector<192x352xbf16>
    %cst_33 = arith.constant dense<0.000000e+00> : vector<6x352xf32>
    %27 = tpu.matmul %24, %26, %cst_33 {dimension_numbers = #tpu.dot_dimension_numbers<[1], [0], [0], [1], [0, 0, 1, 1], [], []>} : vector<6x192xbf16>, vector<192x352xbf16>, vector<6x352xf32> -> vector<6x352xf32>
    %28 = arith.addf %22, %27 : vector<6x352xf32>
    %c0_34 = arith.constant 0 : index
    %c5 = arith.constant 5 : index
    %c0_35 = arith.constant 0 : index
    %c0_36 = arith.constant 0 : index
    %29 = vector.load %arg1[%c0_34, %c5, %c0_35, %c0_36] : memref<1x8x6x192xbf16, #tpu.memory_space<vmem>>, vector<1x1x6x192xbf16>
    %30 = vector.shape_cast %29 : vector<1x1x6x192xbf16> to vector<6x192xbf16>
    %c5_37 = arith.constant 5 : index
    %c0_38 = arith.constant 0 : index
    %c0_39 = arith.constant 0 : index
    %31 = vector.load %arg3[%c5_37, %c0_38, %c0_39] : memref<8x192x352xbf16, #tpu.memory_space<vmem>>, vector<1x192x352xbf16>
    %32 = vector.shape_cast %31 : vector<1x192x352xbf16> to vector<192x352xbf16>
    %cst_40 = arith.constant dense<0.000000e+00> : vector<6x352xf32>
    %33 = tpu.matmul %30, %32, %cst_40 {dimension_numbers = #tpu.dot_dimension_numbers<[1], [0], [0], [1], [0, 0, 1, 1], [], []>} : vector<6x192xbf16>, vector<192x352xbf16>, vector<6x352xf32> -> vector<6x352xf32>
    %34 = arith.addf %28, %33 : vector<6x352xf32>
    %c0_41 = arith.constant 0 : index
    %c6 = arith.constant 6 : index
    %c0_42 = arith.constant 0 : index
    %c0_43 = arith.constant 0 : index
    %35 = vector.load %arg1[%c0_41, %c6, %c0_42, %c0_43] : memref<1x8x6x192xbf16, #tpu.memory_space<vmem>>, vector<1x1x6x192xbf16>
    %36 = vector.shape_cast %35 : vector<1x1x6x192xbf16> to vector<6x192xbf16>
    %c6_44 = arith.constant 6 : index
    %c0_45 = arith.constant 0 : index
    %c0_46 = arith.constant 0 : index
    %37 = vector.load %arg3[%c6_44, %c0_45, %c0_46] : memref<8x192x352xbf16, #tpu.memory_space<vmem>>, vector<1x192x352xbf16>
    %38 = vector.shape_cast %37 : vector<1x192x352xbf16> to vector<192x352xbf16>
    %cst_47 = arith.constant dense<0.000000e+00> : vector<6x352xf32>
    %39 = tpu.matmul %36, %38, %cst_47 {dimension_numbers = #tpu.dot_dimension_numbers<[1], [0], [0], [1], [0, 0, 1, 1], [], []>} : vector<6x192xbf16>, vector<192x352xbf16>, vector<6x352xf32> -> vector<6x352xf32>
    %40 = arith.addf %34, %39 : vector<6x352xf32>
    %c0_48 = arith.constant 0 : index
    %c7 = arith.constant 7 : index
    %c0_49 = arith.constant 0 : index
    %c0_50 = arith.constant 0 : index
    %41 = vector.load %arg1[%c0_48, %c7, %c0_49, %c0_50] : memref<1x8x6x192xbf16, #tpu.memory_space<vmem>>, vector<1x1x6x192xbf16>
    %42 = vector.shape_cast %41 : vector<1x1x6x192xbf16> to vector<6x192xbf16>
    %c7_51 = arith.constant 7 : index
    %c0_52 = arith.constant 0 : index
    %c0_53 = arith.constant 0 : index
    %43 = vector.load %arg3[%c7_51, %c0_52, %c0_53] : memref<8x192x352xbf16, #tpu.memory_space<vmem>>, vector<1x192x352xbf16>
    %44 = vector.shape_cast %43 : vector<1x192x352xbf16> to vector<192x352xbf16>
    %cst_54 = arith.constant dense<0.000000e+00> : vector<6x352xf32>
    %45 = tpu.matmul %42, %44, %cst_54 {dimension_numbers = #tpu.dot_dimension_numbers<[1], [0], [0], [1], [0, 0, 1, 1], [], []>} : vector<6x192xbf16>, vector<192x352xbf16>, vector<6x352xf32> -> vector<6x352xf32>
    %46 = arith.addf %40, %45 : vector<6x352xf32>
    %c0_55 = arith.constant 0 : index
    %c0_56 = arith.constant 0 : index
    %47 = vector.load %arg4[%c0_55, %c0_56] : memref<1x352xf32, #tpu.memory_space<vmem>>, vector<1x352xf32>
    %48 = vector.broadcast %47 : vector<1x352xf32> to vector<6x352xf32>
    %49 = arith.addf %46, %48 : vector<6x352xf32>
    %cst_57 = arith.constant 0.000000e+00 : f32
    %50 = vector.broadcast %cst_57 : f32 to vector<6x352xf32>
    %51 = arith.maximumf %49, %50 : vector<6x352xf32>
    %c0_58 = arith.constant 0 : index
    %c0_59 = arith.constant 0 : index
    %c0_60 = arith.constant 0 : index
    %c0_61 = arith.constant 0 : index
    %52 = vector.load %arg2[%c0_58, %c0_59, %c0_60, %c0_61] : memref<1x8x5x192xbf16, #tpu.memory_space<vmem>>, vector<1x1x5x192xbf16>
    %53 = vector.shape_cast %52 : vector<1x1x5x192xbf16> to vector<5x192xbf16>
    %c0_62 = arith.constant 0 : index
    %c0_63 = arith.constant 0 : index
    %c0_64 = arith.constant 0 : index
    %54 = vector.load %arg3[%c0_62, %c0_63, %c0_64] : memref<8x192x352xbf16, #tpu.memory_space<vmem>>, vector<1x192x352xbf16>
    %55 = vector.shape_cast %54 : vector<1x192x352xbf16> to vector<192x352xbf16>
    %cst_65 = arith.constant dense<0.000000e+00> : vector<5x352xf32>
    %56 = tpu.matmul %53, %55, %cst_65 {dimension_numbers = #tpu.dot_dimension_numbers<[1], [0], [0], [1], [0, 0, 1, 1], [], []>} : vector<5x192xbf16>, vector<192x352xbf16>, vector<5x352xf32> -> vector<5x352xf32>
    %c0_66 = arith.constant 0 : index
    %c1_67 = arith.constant 1 : index
    %c0_68 = arith.constant 0 : index
    %c0_69 = arith.constant 0 : index
    %57 = vector.load %arg2[%c0_66, %c1_67, %c0_68, %c0_69] : memref<1x8x5x192xbf16, #tpu.memory_space<vmem>>, vector<1x1x5x192xbf16>
    %58 = vector.shape_cast %57 : vector<1x1x5x192xbf16> to vector<5x192xbf16>
    %c1_70 = arith.constant 1 : index
    %c0_71 = arith.constant 0 : index
    %c0_72 = arith.constant 0 : index
    %59 = vector.load %arg3[%c1_70, %c0_71, %c0_72] : memref<8x192x352xbf16, #tpu.memory_space<vmem>>, vector<1x192x352xbf16>
    %60 = vector.shape_cast %59 : vector<1x192x352xbf16> to vector<192x352xbf16>
    %cst_73 = arith.constant dense<0.000000e+00> : vector<5x352xf32>
    %61 = tpu.matmul %58, %60, %cst_73 {dimension_numbers = #tpu.dot_dimension_numbers<[1], [0], [0], [1], [0, 0, 1, 1], [], []>} : vector<5x192xbf16>, vector<192x352xbf16>, vector<5x352xf32> -> vector<5x352xf32>
    %62 = arith.addf %56, %61 : vector<5x352xf32>
    %c0_74 = arith.constant 0 : index
    %c2_75 = arith.constant 2 : index
    %c0_76 = arith.constant 0 : index
    %c0_77 = arith.constant 0 : index
    %63 = vector.load %arg2[%c0_74, %c2_75, %c0_76, %c0_77] : memref<1x8x5x192xbf16, #tpu.memory_space<vmem>>, vector<1x1x5x192xbf16>
    %64 = vector.shape_cast %63 : vector<1x1x5x192xbf16> to vector<5x192xbf16>
    %c2_78 = arith.constant 2 : index
    %c0_79 = arith.constant 0 : index
    %c0_80 = arith.constant 0 : index
    %65 = vector.load %arg3[%c2_78, %c0_79, %c0_80] : memref<8x192x352xbf16, #tpu.memory_space<vmem>>, vector<1x192x352xbf16>
    %66 = vector.shape_cast %65 : vector<1x192x352xbf16> to vector<192x352xbf16>
    %cst_81 = arith.constant dense<0.000000e+00> : vector<5x352xf32>
    %67 = tpu.matmul %64, %66, %cst_81 {dimension_numbers = #tpu.dot_dimension_numbers<[1], [0], [0], [1], [0, 0, 1, 1], [], []>} : vector<5x192xbf16>, vector<192x352xbf16>, vector<5x352xf32> -> vector<5x352xf32>
    %68 = arith.addf %62, %67 : vector<5x352xf32>
    %c0_82 = arith.constant 0 : index
    %c3_83 = arith.constant 3 : index
    %c0_84 = arith.constant 0 : index
    %c0_85 = arith.constant 0 : index
    %69 = vector.load %arg2[%c0_82, %c3_83, %c0_84, %c0_85] : memref<1x8x5x192xbf16, #tpu.memory_space<vmem>>, vector<1x1x5x192xbf16>
    %70 = vector.shape_cast %69 : vector<1x1x5x192xbf16> to vector<5x192xbf16>
    %c3_86 = arith.constant 3 : index
    %c0_87 = arith.constant 0 : index
    %c0_88 = arith.constant 0 : index
    %71 = vector.load %arg3[%c3_86, %c0_87, %c0_88] : memref<8x192x352xbf16, #tpu.memory_space<vmem>>, vector<1x192x352xbf16>
    %72 = vector.shape_cast %71 : vector<1x192x352xbf16> to vector<192x352xbf16>
    %cst_89 = arith.constant dense<0.000000e+00> : vector<5x352xf32>
    %73 = tpu.matmul %70, %72, %cst_89 {dimension_numbers = #tpu.dot_dimension_numbers<[1], [0], [0], [1], [0, 0, 1, 1], [], []>} : vector<5x192xbf16>, vector<192x352xbf16>, vector<5x352xf32> -> vector<5x352xf32>
    %74 = arith.addf %68, %73 : vector<5x352xf32>
    %c0_90 = arith.constant 0 : index
    %c4_91 = arith.constant 4 : index
    %c0_92 = arith.constant 0 : index
    %c0_93 = arith.constant 0 : index
    %75 = vector.load %arg2[%c0_90, %c4_91, %c0_92, %c0_93] : memref<1x8x5x192xbf16, #tpu.memory_space<vmem>>, vector<1x1x5x192xbf16>
    %76 = vector.shape_cast %75 : vector<1x1x5x192xbf16> to vector<5x192xbf16>
    %c4_94 = arith.constant 4 : index
    %c0_95 = arith.constant 0 : index
    %c0_96 = arith.constant 0 : index
    %77 = vector.load %arg3[%c4_94, %c0_95, %c0_96] : memref<8x192x352xbf16, #tpu.memory_space<vmem>>, vector<1x192x352xbf16>
    %78 = vector.shape_cast %77 : vector<1x192x352xbf16> to vector<192x352xbf16>
    %cst_97 = arith.constant dense<0.000000e+00> : vector<5x352xf32>
    %79 = tpu.matmul %76, %78, %cst_97 {dimension_numbers = #tpu.dot_dimension_numbers<[1], [0], [0], [1], [0, 0, 1, 1], [], []>} : vector<5x192xbf16>, vector<192x352xbf16>, vector<5x352xf32> -> vector<5x352xf32>
    %80 = arith.addf %74, %79 : vector<5x352xf32>
    %c0_98 = arith.constant 0 : index
    %c5_99 = arith.constant 5 : index
    %c0_100 = arith.constant 0 : index
    %c0_101 = arith.constant 0 : index
    %81 = vector.load %arg2[%c0_98, %c5_99, %c0_100, %c0_101] : memref<1x8x5x192xbf16, #tpu.memory_space<vmem>>, vector<1x1x5x192xbf16>
    %82 = vector.shape_cast %81 : vector<1x1x5x192xbf16> to vector<5x192xbf16>
    %c5_102 = arith.constant 5 : index
    %c0_103 = arith.constant 0 : index
    %c0_104 = arith.constant 0 : index
    %83 = vector.load %arg3[%c5_102, %c0_103, %c0_104] : memref<8x192x352xbf16, #tpu.memory_space<vmem>>, vector<1x192x352xbf16>
    %84 = vector.shape_cast %83 : vector<1x192x352xbf16> to vector<192x352xbf16>
    %cst_105 = arith.constant dense<0.000000e+00> : vector<5x352xf32>
    %85 = tpu.matmul %82, %84, %cst_105 {dimension_numbers = #tpu.dot_dimension_numbers<[1], [0], [0], [1], [0, 0, 1, 1], [], []>} : vector<5x192xbf16>, vector<192x352xbf16>, vector<5x352xf32> -> vector<5x352xf32>
    %86 = arith.addf %80, %85 : vector<5x352xf32>
    %c0_106 = arith.constant 0 : index
    %c6_107 = arith.constant 6 : index
    %c0_108 = arith.constant 0 : index
    %c0_109 = arith.constant 0 : index
    %87 = vector.load %arg2[%c0_106, %c6_107, %c0_108, %c0_109] : memref<1x8x5x192xbf16, #tpu.memory_space<vmem>>, vector<1x1x5x192xbf16>
    %88 = vector.shape_cast %87 : vector<1x1x5x192xbf16> to vector<5x192xbf16>
    %c6_110 = arith.constant 6 : index
    %c0_111 = arith.constant 0 : index
    %c0_112 = arith.constant 0 : index
    %89 = vector.load %arg3[%c6_110, %c0_111, %c0_112] : memref<8x192x352xbf16, #tpu.memory_space<vmem>>, vector<1x192x352xbf16>
    %90 = vector.shape_cast %89 : vector<1x192x352xbf16> to vector<192x352xbf16>
    %cst_113 = arith.constant dense<0.000000e+00> : vector<5x352xf32>
    %91 = tpu.matmul %88, %90, %cst_113 {dimension_numbers = #tpu.dot_dimension_numbers<[1], [0], [0], [1], [0, 0, 1, 1], [], []>} : vector<5x192xbf16>, vector<192x352xbf16>, vector<5x352xf32> -> vector<5x352xf32>
    %92 = arith.addf %86, %91 : vector<5x352xf32>
    %c0_114 = arith.constant 0 : index
    %c7_115 = arith.constant 7 : index
    %c0_116 = arith.constant 0 : index
    %c0_117 = arith.constant 0 : index
    %93 = vector.load %arg2[%c0_114, %c7_115, %c0_116, %c0_117] : memref<1x8x5x192xbf16, #tpu.memory_space<vmem>>, vector<1x1x5x192xbf16>
    %94 = vector.shape_cast %93 : vector<1x1x5x192xbf16> to vector<5x192xbf16>
    %c7_118 = arith.constant 7 : index
    %c0_119 = arith.constant 0 : index
    %c0_120 = arith.constant 0 : index
    %95 = vector.load %arg3[%c7_118, %c0_119, %c0_120] : memref<8x192x352xbf16, #tpu.memory_space<vmem>>, vector<1x192x352xbf16>
    %96 = vector.shape_cast %95 : vector<1x192x352xbf16> to vector<192x352xbf16>
    %cst_121 = arith.constant dense<0.000000e+00> : vector<5x352xf32>
    %97 = tpu.matmul %94, %96, %cst_121 {dimension_numbers = #tpu.dot_dimension_numbers<[1], [0], [0], [1], [0, 0, 1, 1], [], []>} : vector<5x192xbf16>, vector<192x352xbf16>, vector<5x352xf32> -> vector<5x352xf32>
    %98 = arith.addf %92, %97 : vector<5x352xf32>
    %c0_122 = arith.constant 0 : index
    %c0_123 = arith.constant 0 : index
    %99 = vector.load %arg4[%c0_122, %c0_123] : memref<1x352xf32, #tpu.memory_space<vmem>>, vector<1x352xf32>
    %100 = vector.broadcast %99 : vector<1x352xf32> to vector<5x352xf32>
    %101 = arith.addf %98, %100 : vector<5x352xf32>
    %cst_124 = arith.constant 0.000000e+00 : f32
    %102 = vector.broadcast %cst_124 : f32 to vector<5x352xf32>
    %103 = arith.maximumf %101, %102 : vector<5x352xf32>
    %104 = vector.extract_strided_slice %51 {offsets = [0, 0], sizes = [4, 352], strides = [1, 1]} : vector<6x352xf32> to vector<4x352xf32>
    %105 = arith.truncf %104 : vector<4x352xf32> to vector<4x352xbf16>
    %c0_125 = arith.constant 0 : index
    %c0_126 = arith.constant 0 : index
    %c0_127 = arith.constant 0 : index
    %106 = vector.load %arg5[%c0_125, %c0_126, %c0_127] : memref<4x352x256xbf16, #tpu.memory_space<vmem>>, vector<1x352x256xbf16>
    %107 = vector.shape_cast %106 : vector<1x352x256xbf16> to vector<352x256xbf16>
    %cst_128 = arith.constant dense<0.000000e+00> : vector<4x256xf32>
    %108 = tpu.matmul %105, %107, %cst_128 {dimension_numbers = #tpu.dot_dimension_numbers<[1], [0], [0], [1], [0, 0, 1, 1], [], []>} : vector<4x352xbf16>, vector<352x256xbf16>, vector<4x256xf32> -> vector<4x256xf32>
    %109 = vector.extract_strided_slice %103 {offsets = [0, 0], sizes = [4, 352], strides = [1, 1]} : vector<5x352xf32> to vector<4x352xf32>
    %110 = arith.truncf %109 : vector<4x352xf32> to vector<4x352xbf16>
    %c1_129 = arith.constant 1 : index
    %c0_130 = arith.constant 0 : index
    %c0_131 = arith.constant 0 : index
    %111 = vector.load %arg5[%c1_129, %c0_130, %c0_131] : memref<4x352x256xbf16, #tpu.memory_space<vmem>>, vector<1x352x256xbf16>
    %112 = vector.shape_cast %111 : vector<1x352x256xbf16> to vector<352x256xbf16>
    %cst_132 = arith.constant dense<0.000000e+00> : vector<4x256xf32>
    %113 = tpu.matmul %110, %112, %cst_132 {dimension_numbers = #tpu.dot_dimension_numbers<[1], [0], [0], [1], [0, 0, 1, 1], [], []>} : vector<4x352xbf16>, vector<352x256xbf16>, vector<4x256xf32> -> vector<4x256xf32>
    %114 = arith.addf %108, %113 : vector<4x256xf32>
    %115 = vector.extract_strided_slice %51 {offsets = [1, 0], sizes = [4, 352], strides = [1, 1]} : vector<6x352xf32> to vector<4x352xf32>
    %116 = arith.truncf %115 : vector<4x352xf32> to vector<4x352xbf16>
    %c2_133 = arith.constant 2 : index
    %c0_134 = arith.constant 0 : index
    %c0_135 = arith.constant 0 : index
    %117 = vector.load %arg5[%c2_133, %c0_134, %c0_135] : memref<4x352x256xbf16, #tpu.memory_space<vmem>>, vector<1x352x256xbf16>
    %118 = vector.shape_cast %117 : vector<1x352x256xbf16> to vector<352x256xbf16>
    %cst_136 = arith.constant dense<0.000000e+00> : vector<4x256xf32>
    %119 = tpu.matmul %116, %118, %cst_136 {dimension_numbers = #tpu.dot_dimension_numbers<[1], [0], [0], [1], [0, 0, 1, 1], [], []>} : vector<4x352xbf16>, vector<352x256xbf16>, vector<4x256xf32> -> vector<4x256xf32>
    %120 = arith.addf %114, %119 : vector<4x256xf32>
    %121 = vector.extract_strided_slice %103 {offsets = [1, 0], sizes = [4, 352], strides = [1, 1]} : vector<5x352xf32> to vector<4x352xf32>
    %122 = arith.truncf %121 : vector<4x352xf32> to vector<4x352xbf16>
    %c3_137 = arith.constant 3 : index
    %c0_138 = arith.constant 0 : index
    %c0_139 = arith.constant 0 : index
    %123 = vector.load %arg5[%c3_137, %c0_138, %c0_139] : memref<4x352x256xbf16, #tpu.memory_space<vmem>>, vector<1x352x256xbf16>
    %124 = vector.shape_cast %123 : vector<1x352x256xbf16> to vector<352x256xbf16>
    %cst_140 = arith.constant dense<0.000000e+00> : vector<4x256xf32>
    %125 = tpu.matmul %122, %124, %cst_140 {dimension_numbers = #tpu.dot_dimension_numbers<[1], [0], [0], [1], [0, 0, 1, 1], [], []>} : vector<4x352xbf16>, vector<352x256xbf16>, vector<4x256xf32> -> vector<4x256xf32>
    %126 = arith.addf %120, %125 : vector<4x256xf32>
    %c0_141 = arith.constant 0 : index
    %c0_142 = arith.constant 0 : index
    %127 = vector.load %arg6[%c0_141, %c0_142] : memref<1x256xf32, #tpu.memory_space<vmem>>, vector<1x256xf32>
    %128 = vector.broadcast %127 : vector<1x256xf32> to vector<4x256xf32>
    %129 = arith.addf %126, %128 : vector<4x256xf32>
    %cst_143 = arith.constant 0.000000e+00 : f32
    %130 = vector.broadcast %cst_143 : f32 to vector<4x256xf32>
    %131 = arith.maximumf %129, %130 : vector<4x256xf32>
    %132 = vector.extract_strided_slice %131 {offsets = [0, 0], sizes = [2, 256], strides = [1, 1]} : vector<4x256xf32> to vector<2x256xf32>
    %133 = arith.truncf %132 : vector<2x256xf32> to vector<2x256xbf16>
    %c0_144 = arith.constant 0 : index
    %c0_145 = arith.constant 0 : index
    %c0_146 = arith.constant 0 : index
    %134 = vector.load %arg7[%c0_144, %c0_145, %c0_146] : memref<3x256x128xbf16, #tpu.memory_space<vmem>>, vector<1x256x128xbf16>
    %135 = vector.shape_cast %134 : vector<1x256x128xbf16> to vector<256x128xbf16>
    %cst_147 = arith.constant dense<0.000000e+00> : vector<2x128xf32>
    %136 = tpu.matmul %133, %135, %cst_147 {dimension_numbers = #tpu.dot_dimension_numbers<[1], [0], [0], [1], [0, 0, 1, 1], [], []>} : vector<2x256xbf16>, vector<256x128xbf16>, vector<2x128xf32> -> vector<2x128xf32>
    %137 = vector.extract_strided_slice %131 {offsets = [1, 0], sizes = [2, 256], strides = [1, 1]} : vector<4x256xf32> to vector<2x256xf32>
    %138 = arith.truncf %137 : vector<2x256xf32> to vector<2x256xbf16>
    %c1_148 = arith.constant 1 : index
    %c0_149 = arith.constant 0 : index
    %c0_150 = arith.constant 0 : index
    %139 = vector.load %arg7[%c1_148, %c0_149, %c0_150] : memref<3x256x128xbf16, #tpu.memory_space<vmem>>, vector<1x256x128xbf16>
    %140 = vector.shape_cast %139 : vector<1x256x128xbf16> to vector<256x128xbf16>
    %cst_151 = arith.constant dense<0.000000e+00> : vector<2x128xf32>
    %141 = tpu.matmul %138, %140, %cst_151 {dimension_numbers = #tpu.dot_dimension_numbers<[1], [0], [0], [1], [0, 0, 1, 1], [], []>} : vector<2x256xbf16>, vector<256x128xbf16>, vector<2x128xf32> -> vector<2x128xf32>
    %142 = arith.addf %136, %141 : vector<2x128xf32>
    %143 = vector.extract_strided_slice %131 {offsets = [2, 0], sizes = [2, 256], strides = [1, 1]} : vector<4x256xf32> to vector<2x256xf32>
    %144 = arith.truncf %143 : vector<2x256xf32> to vector<2x256xbf16>
    %c2_152 = arith.constant 2 : index
    %c0_153 = arith.constant 0 : index
    %c0_154 = arith.constant 0 : index
    %145 = vector.load %arg7[%c2_152, %c0_153, %c0_154] : memref<3x256x128xbf16, #tpu.memory_space<vmem>>, vector<1x256x128xbf16>
    %146 = vector.shape_cast %145 : vector<1x256x128xbf16> to vector<256x128xbf16>
    %cst_155 = arith.constant dense<0.000000e+00> : vector<2x128xf32>
    %147 = tpu.matmul %144, %146, %cst_155 {dimension_numbers = #tpu.dot_dimension_numbers<[1], [0], [0], [1], [0, 0, 1, 1], [], []>} : vector<2x256xbf16>, vector<256x128xbf16>, vector<2x128xf32> -> vector<2x128xf32>
    %148 = arith.addf %142, %147 : vector<2x128xf32>
    %c0_156 = arith.constant 0 : index
    %c0_157 = arith.constant 0 : index
    %149 = vector.load %arg8[%c0_156, %c0_157] : memref<1x128xf32, #tpu.memory_space<vmem>>, vector<1x128xf32>
    %150 = vector.broadcast %149 : vector<1x128xf32> to vector<2x128xf32>
    %151 = arith.addf %148, %150 : vector<2x128xf32>
    %cst_158 = arith.constant 0.000000e+00 : f32
    %152 = vector.broadcast %cst_158 : f32 to vector<2x128xf32>
    %153 = arith.maximumf %151, %152 : vector<2x128xf32>
    %154 = vector.extract_strided_slice %153 {offsets = [0, 0], sizes = [1, 128], strides = [1, 1]} : vector<2x128xf32> to vector<1x128xf32>
    %155 = arith.truncf %154 : vector<1x128xf32> to vector<1x128xbf16>
    %c0_159 = arith.constant 0 : index
    %c0_160 = arith.constant 0 : index
    %c0_161 = arith.constant 0 : index
    %156 = vector.load %arg9[%c0_159, %c0_160, %c0_161] : memref<2x128x512xbf16, #tpu.memory_space<vmem>>, vector<1x128x512xbf16>
    %157 = vector.shape_cast %156 : vector<1x128x512xbf16> to vector<128x512xbf16>
    %cst_162 = arith.constant dense<0.000000e+00> : vector<1x512xf32>
    %158 = tpu.matmul %155, %157, %cst_162 {dimension_numbers = #tpu.dot_dimension_numbers<[1], [0], [0], [1], [0, 0, 1, 1], [], []>} : vector<1x128xbf16>, vector<128x512xbf16>, vector<1x512xf32> -> vector<1x512xf32>
    %159 = vector.extract_strided_slice %153 {offsets = [1, 0], sizes = [1, 128], strides = [1, 1]} : vector<2x128xf32> to vector<1x128xf32>
    %160 = arith.truncf %159 : vector<1x128xf32> to vector<1x128xbf16>
    %c1_163 = arith.constant 1 : index
    %c0_164 = arith.constant 0 : index
    %c0_165 = arith.constant 0 : index
    %161 = vector.load %arg9[%c1_163, %c0_164, %c0_165] : memref<2x128x512xbf16, #tpu.memory_space<vmem>>, vector<1x128x512xbf16>
    %162 = vector.shape_cast %161 : vector<1x128x512xbf16> to vector<128x512xbf16>
    %cst_166 = arith.constant dense<0.000000e+00> : vector<1x512xf32>
    %163 = tpu.matmul %160, %162, %cst_166 {dimension_numbers = #tpu.dot_dimension_numbers<[1], [0], [0], [1], [0, 0, 1, 1], [], []>} : vector<1x128xbf16>, vector<128x512xbf16>, vector<1x512xf32> -> vector<1x512xf32>
    %164 = arith.addf %158, %163 : vector<1x512xf32>
    %c0_167 = arith.constant 0 : index
    %c0_168 = arith.constant 0 : index
    %165 = vector.load %arg10[%c0_167, %c0_168] : memref<1x512xf32, #tpu.memory_space<vmem>>, vector<1x512xf32>
    %166 = arith.addf %164, %165 : vector<1x512xf32>
    %cst_169 = arith.constant 0.000000e+00 : f32
    %167 = vector.broadcast %cst_169 : f32 to vector<1x512xf32>
    %168 = arith.maximumf %166, %167 : vector<1x512xf32>
    %169 = arith.truncf %168 : vector<1x512xf32> to vector<1x512xbf16>
    %c0_170 = arith.constant 0 : index
    %c0_171 = arith.constant 0 : index
    %170 = vector.load %arg11[%c0_170, %c0_171] : memref<512x6xbf16, #tpu.memory_space<vmem>>, vector<512x6xbf16>
    %cst_172 = arith.constant dense<0.000000e+00> : vector<1x6xf32>
    %171 = tpu.matmul %169, %170, %cst_172 {dimension_numbers = #tpu.dot_dimension_numbers<[1], [0], [0], [1], [0, 0, 1, 1], [], []>} : vector<1x512xbf16>, vector<512x6xbf16>, vector<1x6xf32> -> vector<1x6xf32>
    %c0_173 = arith.constant 0 : index
    %c0_174 = arith.constant 0 : index
    %172 = vector.load %arg12[%c0_173, %c0_174] : memref<1x6xf32, #tpu.memory_space<vmem>>, vector<1x6xf32>
    %173 = arith.addf %171, %172 : vector<1x6xf32>
    %c0_175 = arith.constant 0 : index
    %c0_176 = arith.constant 0 : index
    %c0_177 = arith.constant 0 : index
    %174 = vector.load %arg13[%c0_175, %c0_176, %c0_177] : memref<1x1x6xf32, #tpu.memory_space<vmem>>, vector<1x1x6xf32>
    %175 = vector.shape_cast %174 : vector<1x1x6xf32> to vector<1x6xf32>
    %176 = vector.shape_cast %173 : vector<1x6xf32> to vector<1x1x6xf32>
    tpu.vector_store %arg13[%c0_175, %c0_176, %c0_177], %176 {strides = array<i32>} : memref<1x1x6xf32, #tpu.memory_space<vmem>>, vector<1x1x6xf32>,
    return
  }
  func.func @transform_0(%arg0: i32) -> (i32, i32, i32, i32) {
    %c0_i32 = arith.constant 0 : i32
    %c0_i32_0 = arith.constant 0 : i32
    %c0_i32_1 = arith.constant 0 : i32
    %c0_i32_2 = arith.constant 0 : i32
    return %arg0, %c0_i32, %c0_i32_0, %c0_i32_1 : i32, i32, i32, i32
  }
  func.func @transform_1(%arg0: i32) -> (i32, i32, i32, i32) {
    %c0_i32 = arith.constant 0 : i32
    %c0_i32_0 = arith.constant 0 : i32
    %c0_i32_1 = arith.constant 0 : i32
    %c0_i32_2 = arith.constant 0 : i32
    return %arg0, %c0_i32, %c0_i32_0, %c0_i32_1 : i32, i32, i32, i32
  }
  func.func @transform_2(%arg0: i32) -> (i32, i32, i32) {
    %c0_i32 = arith.constant 0 : i32
    %c0_i32_0 = arith.constant 0 : i32
    %c0_i32_1 = arith.constant 0 : i32
    %c0_i32_2 = arith.constant 0 : i32
    return %c0_i32, %c0_i32_0, %c0_i32_1 : i32, i32, i32
  }
  func.func @transform_3(%arg0: i32) -> (i32, i32) {
    %c0_i32 = arith.constant 0 : i32
    %c0_i32_0 = arith.constant 0 : i32
    %c0_i32_1 = arith.constant 0 : i32
    return %c0_i32, %c0_i32_0 : i32, i32
  }
  func.func @transform_4(%arg0: i32) -> (i32, i32, i32) {
    %c0_i32 = arith.constant 0 : i32
    %c0_i32_0 = arith.constant 0 : i32
    %c0_i32_1 = arith.constant 0 : i32
    %c0_i32_2 = arith.constant 0 : i32
    return %c0_i32, %c0_i32_0, %c0_i32_1 : i32, i32, i32
  }
  func.func @transform_5(%arg0: i32) -> (i32, i32) {
    %c0_i32 = arith.constant 0 : i32
    %c0_i32_0 = arith.constant 0 : i32
    %c0_i32_1 = arith.constant 0 : i32
    return %c0_i32, %c0_i32_0 : i32, i32
  }
  func.func @transform_6(%arg0: i32) -> (i32, i32, i32) {
    %c0_i32 = arith.constant 0 : i32
    %c0_i32_0 = arith.constant 0 : i32
    %c0_i32_1 = arith.constant 0 : i32
    %c0_i32_2 = arith.constant 0 : i32
    return %c0_i32, %c0_i32_0, %c0_i32_1 : i32, i32, i32
  }
  func.func @transform_7(%arg0: i32) -> (i32, i32) {
    %c0_i32 = arith.constant 0 : i32
    %c0_i32_0 = arith.constant 0 : i32
    %c0_i32_1 = arith.constant 0 : i32
    return %c0_i32, %c0_i32_0 : i32, i32
  }
  func.func @transform_8(%arg0: i32) -> (i32, i32, i32) {
    %c0_i32 = arith.constant 0 : i32
    %c0_i32_0 = arith.constant 0 : i32
    %c0_i32_1 = arith.constant 0 : i32
    %c0_i32_2 = arith.constant 0 : i32
    return %c0_i32, %c0_i32_0, %c0_i32_1 : i32, i32, i32
  }
  func.func @transform_9(%arg0: i32) -> (i32, i32) {
    %c0_i32 = arith.constant 0 : i32
    %c0_i32_0 = arith.constant 0 : i32
    %c0_i32_1 = arith.constant 0 : i32
    return %c0_i32, %c0_i32_0 : i32, i32
  }
  func.func @transform_10(%arg0: i32) -> (i32, i32) {
    %c0_i32 = arith.constant 0 : i32
    %c0_i32_0 = arith.constant 0 : i32
    %c0_i32_1 = arith.constant 0 : i32
    return %c0_i32, %c0_i32_0 : i32, i32
  }
  func.func @transform_11(%arg0: i32) -> (i32, i32) {
    %c0_i32 = arith.constant 0 : i32
    %c0_i32_0 = arith.constant 0 : i32
    %c0_i32_1 = arith.constant 0 : i32
    return %c0_i32, %c0_i32_0 : i32, i32
  }
  func.func @transform_12(%arg0: i32) -> (i32, i32, i32) {
    %c0_i32 = arith.constant 0 : i32
    %c0_i32_0 = arith.constant 0 : i32
    %c0_i32_1 = arith.constant 0 : i32
    return %arg0, %c0_i32, %c0_i32_0 : i32, i32, i32
  }
}

</mosaic_0001>

<bundles_post_ra>
// kernel: dqn_forward.1
= control target key start
LH: loop header
LB: loop body
LE: loop exit
PB: predicated region body
PF: predicated region fallthrough
CT: control target
= control target key end

     0   :  { %17 = vsyncpa [#allocation3], 0  ;;  %s12917_s0 = inlined_call_operand.vmem [shape: bf16[2,8,6,192], index: 0, kind: input, shape index: {}]   ;;  %s12918_s1 = inlined_call_operand.vmem [shape: bf16[2,8,5,192], index: 1, kind: input, shape index: {}]   ;;  %s12919_s2 = inlined_call_operand.vmem [shape: bf16[8,192,352], index: 2, kind: input, shape index: {}]   ;;  %s12920_s3 = inlined_call_operand.vmem [shape: f32[1,352], index: 3, kind: input, shape index: {}]   ;;  %s12921_s4 = inlined_call_operand.vmem [shape: bf16[4,352,256], index: 4, kind: input, shape index: {}]   ;;  %s12922_s5 = inlined_call_operand.vmem [shape: f32[1,256], index: 5, kind: input, shape index: {}]   ;;  %s12923_s6 = inlined_call_operand.vmem [shape: bf16[3,256,128], index: 6, kind: input, shape index: {}]   ;;  %s12924_s7 = inlined_call_operand.vmem [shape: f32[1,128], index: 7, kind: input, shape index: {}]   ;;  %s12925_s8 = inlined_call_operand.vmem [shape: bf16[2,128,512], index: 8, kind: input, shape index: {}]   ;;  %s12926_s9 = inlined_call_operand.vmem [shape: f32[1,512], index: 9, kind: input, shape index: {}]   ;;  %s12927_s10 = inlined_call_operand.vmem [shape: bf16[512,6], index: 10, kind: input, shape index: {}]   ;;  %s12928_s11 = inlined_call_operand.vmem [shape: f32[1,6], index: 11, kind: input, shape index: {}]   ;;  %s12929_s12 = inlined_call_operand.hbm [shape: f32[2,1,6], index: 12, kind: output, shape index: {}]  }
   0x1   :  { %19 = vsyncpa [#allocation3 + $0x1], 0  ;;  %s9605_s21 = smov 0   ;;  %s9607_s22 = smov 0  }
   0x2   :  { %s9609_s23 = smov 0   ;;  %s9611_s24 = smov 0  }
   0x3 LB: > { %12934 = sst [smem:[#allocation5_spill]] %s9532_s23  ;;  %s9626_s25 = sadd.s32 4294967295, %s9536_s24   ;;  %s9536_s24 = sphi %s9611_s24, %s12940_s24   ;;  %s9532_s23 = sphi %s9609_s23, %s12942_s23   ;;  %s9528_s22 = sphi %s9607_s22, %s12944_s22   ;;  %s9524_s21 = sphi %s9605_s21, %s12943_s21  }
   0x4   : > { %s6912_s26 = sadd.s32 4294967294, %s9536_s24   ;;  %s9630_s27 = sadd.s32 1, %s9536_s24  }
   0x5   : > { %12935 = sst [smem:[#allocation6_spill]] %s9630_s27  ;;  %s294_s28 = sadd.s32 1, %s9532_s23 }
   0x6   : > { %s291_s29 = ssub.s32 %s9536_s24, %s9630_s27  ;;  %p304_p0 = scmp.ne.s32.totalorder %s9532_s23, %s9528_s22 }
   0x7   : > { %p292_p1 = scmp.eq.s32.totalorder %s291_s29, 0  ;;  %p305_p2 = scmp.eq.s32.totalorder %s9626_s25, 1 }
   0x8   : > { %p310_p3 = scmp.ne.s32.totalorder %s9528_s22, %s9524_s21  ;;  %p311_p4 = scmp.eq.s32.totalorder %s6912_s26, 1 }
   0x9   : > { %s9641_s30 = scalar_select %p292_p1, %s9532_s23, %s294_s28  }
   0xa   : > { %p9643_p5 = por %p305_p2, %p304_p0  ;;  %p9647_p6 = por %p311_p4, %p310_p3 }
   0xb   : > { %12936 = sst [smem:[#allocation7_spill]] %s9641_s30  ;;  %p6915_p7 = scmp.ge.s32.totalorder %s9536_s24, 1 }
   0xc   : > { %p375_p8 = scmp.lt.s32.totalorder %s9536_s24, 3 }
   0xe   : > { %p376_p9 = pnand %p6915_p7, %p375_p8 }
   0xf   : > { %v8330_v0 = vld [vmem:[%s12919_s2 + $0x124] ss:$12 sps:$4 sm:$0xff] (!%p376_p9)   ;;  %v9538_v1 = vmov (!%p376_p9), 0   ;;  %v8332_v2 = vld [vmem:[%s12919_s2 + $0x128] ss:$12 sps:$4 sm:$0xff] (!%p376_p9)   ;;  %p421_p10 = scmp.lt.s32.totalorder (!%p376_p9), %s9626_s25, 1 }
  0x10   : > { %379 = sbr.rel (%p376_p9) target bundleno = 2154 (0x86a), region = 68  ;;  %775 = vmatprep.subr.bf16.mxu1 (!%p376_p9), %v9538_v1  ;;  %734 = vmatprep.subr.bf16.mxu0 (!%p376_p9), %v8330_v0  ;;  %v8333_v3 = vld [vmem:[%s12919_s2 + $0x120] ss:$12 sps:$4 sm:$0xff] (!%p376_p9)   ;;  %v8334_v4 = vld [vmem:[%s12919_s2 + $0x13c] ss:$12 sps:$4 sm:$0xff] (!%p376_p9)   ;;  %vm730_vm0 = vcmask (!%p376_p9), 523264  }
  0x11   : > { %776 = vmatpush1.bf16.msra.mxu1 (!%p376_p9), %v8332_v2  ;;  %735 = vmatpush1.bf16.msra.mxu0 (!%p376_p9), %v8333_v3  ;;  %v8336_v5 = vld [vmem:[%s12919_s2 + $0x140] ss:$12 sps:$4 sm:$0xff] (!%p376_p9)   ;;  %v8337_v6 = vld [vmem:[%s12919_s2 + $0x138] ss:$12 sps:$4 sm:$0xff] (!%p376_p9)   ;;  %v8341_v9 = vld [vmem:[%s12919_s2 + $0x150] ss:$12 sps:$4 sm:$0xff] (!%p376_p9)  }
  0x12   : > { %777 = vmatprep.subr.bf16.mxu1 (!%p376_p9), %v9538_v1  ;;  %736 = vmatprep.subr.bf16.mxu0 (!%p376_p9), %v8334_v4  ;;  %v8338_v7 = vld [vmem:[%s12919_s2 + $0x154] ss:$12 sps:$4 sm:$0xff] (!%p376_p9)   ;;  %v8340_v8 = vld [vmem:[%s12919_s2 + $0x158] ss:$12 sps:$4 sm:$0xff] (!%p376_p9)   ;;  %v8344_v11 = vld [vmem:[%s12919_s2 + $0x170] ss:$12 sps:$4 sm:$0xff] (!%p376_p9)  }
  0x13   : > { %v8342_v10 = vld [vmem:[%s12919_s2 + $0x16c] ss:$12 sps:$4 sm:$0xff] (!%p376_p9)   ;;  %v8345_v12 = vld [vmem:[%s12919_s2 + $0x168] ss:$12 sps:$4 sm:$0xff] (!%p376_p9)   ;;  %v8346_v13 = vld [vmem:[%s12919_s2 + $0x184] ss:$12 sps:$4 sm:$0xff] (!%p376_p9)  }
  0x14   : > { %v8348_v14 = vld [vmem:[%s12919_s2 + $0x188] ss:$12 sps:$4 sm:$0xff] (!%p376_p9)   ;;  %v8349_v15 = vld [vmem:[%s12919_s2 + $0x180] ss:$12 sps:$4 sm:$0xff] (!%p376_p9)   ;;  %v8353_v18 = vld [vmem:[%s12919_s2 + $0x198] ss:$12 sps:$4 sm:$0xff] (!%p376_p9)  }
  0x15   : > { %778 = vmatpush1.bf16.msra.mxu1 (!%p376_p9), %v8336_v5  ;;  %737 = vmatpush1.bf16.msra.mxu0 (!%p376_p9), %v8337_v6  ;;  %v8350_v16 = vld [vmem:[%s12919_s2 + $0x19c] ss:$12 sps:$4 sm:$0xff] (!%p376_p9)   ;;  %v8352_v17 = vld [vmem:[%s12919_s2 + $0x1a0] ss:$12 sps:$4 sm:$0xff] (!%p376_p9)   ;;  %v8356_v20 = vld [vmem:[%s12919_s2 + $0x1b8] ss:$12 sps:$4 sm:$0xff] (!%p376_p9)  }
  0x16   : > { %779 = vmatprep.subr.bf16.mxu1 (!%p376_p9), %v9538_v1  ;;  %738 = vmatprep.subr.bf16.mxu0 (!%p376_p9), %v8338_v7  ;;  %v8354_v19 = vld [vmem:[%s12919_s2 + $0x1b4] ss:$12 sps:$4 sm:$0xff] (!%p376_p9)   ;;  %v8357_v21 = vld [vmem:[%s12919_s2 + $0x1b0] ss:$12 sps:$4 sm:$0xff] (!%p376_p9)   ;;  %v8358_v22 = vld [vmem:[%s12919_s2 + $0x1cc] ss:$12 sps:$4 sm:$0xff] (!%p376_p9)  }
  0x17   : > { %s9708_s20 = scalar_select %p421_p10, %s9626_s25, 1  ;;  %v8360_v23 = vld [vmem:[%s12919_s2 + $0x1d0] ss:$12 sps:$4 sm:$0xff]   ;;  %v8361_v24 = vld [vmem:[%s12919_s2 + $0x1c8] ss:$12 sps:$4 sm:$0xff]   ;;  %vm4210_vm1 = vcmask 785408  }
  0x18   : > { %v8362_v26 = vld [vmem:[%s12919_s2 + $0x1e4] ss:$12 sps:$4 sm:$0xff]   ;;  %v8364_v28 = vld [vmem:[%s12919_s2 + $0x1e8] ss:$12 sps:$4 sm:$0xff]   ;;  %v8365_v29 = vld [vmem:[%s12919_s2 + $0x1e0] ss:$12 sps:$4 sm:$0xff]  }
  0x19   : > { %780 = vmatpush1.bf16.msra.mxu1 %v8340_v8  ;;  %739 = vmatpush1.bf16.msra.mxu0 %v8341_v9  ;;  %s12933_s18 = sshll.u32 %s9708_s20, 6  ;;  %v8366_v30 = vld [vmem:[%s12919_s2 + $0x1fc] ss:$12 sps:$4 sm:$0xff]   ;;  %v8368_v31 = vld [vmem:[%s12919_s2 + $0x200] ss:$12 sps:$4 sm:$0xff]   ;;  %s12939_s17 = sshll.u32 %s9708_s20, 6 }
  0x1a   : > { %781 = vmatprep.subr.bf16.mxu1 %v9538_v1  ;;  %740 = vmatprep.subr.bf16.mxu0 %v8342_v10  ;;  %s9736_s23 = scalar_lea.vmem %s12917_s0, %s12933_s18  ;;  %v8369_v32 = vld [vmem:[%s12919_s2 + $0x1f8] ss:$12 sps:$4 sm:$0xff]   ;;  %v8370_v33 = vld [vmem:[%s12919_s2 + $0x214] ss:$12 sps:$4 sm:$0xff]   ;;  %v8373_v35 = vld [vmem:[%s12919_s2 + $0x210] ss:$12 sps:$4 sm:$0xff]   ;;  %s10711_s19 = scalar_lea.vmem %s12918_s1, %s12939_s17 }
  0x1b   : > { %v6920_v25 = vld [vmem:[%s9736_s23 + $0x8] sm:$0x77]  ;;  %v8372_v34 = vld [vmem:[%s12919_s2 + $0x218] ss:$12 sps:$4 sm:$0xff]   ;;  %v8376_v37 = vld [vmem:[%s12919_s2 + $0x230] ss:$12 sps:$4 sm:$0xff]  }
  0x1c   : > { %v6970_v27 = vcombine.high %v6920_v25, %v6920_v25  ;;  %v8374_v36 = vld [vmem:[%s12919_s2 + $0x22c] ss:$12 sps:$4 sm:$0xff]   ;;  %v8377_v38 = vld [vmem:[%s12919_s2 + $0x228] ss:$12 sps:$4 sm:$0xff]   ;;  %v8382_v39 = vld [vmem:[%s12919_s2 + $0x4] ss:$12 sps:$4 sm:$0xff]   ;;  %v6969_v40 = vcombine.low %v6920_v25, %v6920_v25 }
  0x1d   : > { %782 = vmatpush1.bf16.msra.mxu1 %v8344_v11  ;;  %741 = vmatpush1.bf16.msra.mxu0 %v8345_v12  ;;  %v8383_v41 = vld [vmem:[%s12919_s2 + $0x8] ss:$12 sps:$4 sm:$0xff]   ;;  %v8380_v42 = vld [vmem:[%s12919_s2] ss:$12 sps:$4 sm:$0xff]   ;;  %v8384_v45 = vld [vmem:[%s12919_s2 + $0x18] ss:$12 sps:$4 sm:$0xff]  }
  0x1e   : > { %783 = vmatprep.subr.bf16.mxu1 %v9538_v1  ;;  %742 = vmatprep.subr.bf16.mxu0 %v8346_v13  ;;  %v8386_v43 = vld [vmem:[%s12919_s2 + $0x1c] ss:$12 sps:$4 sm:$0xff]   ;;  %v8387_v44 = vld [vmem:[%s12919_s2 + $0x20] ss:$12 sps:$4 sm:$0xff]   ;;  %v8391_v47 = vld [vmem:[%s12919_s2 + $0x38] ss:$12 sps:$4 sm:$0xff]  }
  0x1f   : > { %7008 = vmatprep.mubr.msk.bf16.mxu1 %vm730_vm0, %v6970_v27  ;;  %7007 = vmatprep.mubr.msk.bf16.mxu0 %vm730_vm0, %v6970_v27  ;;  %v8390_v46 = vld [vmem:[%s12919_s2 + $0x34] ss:$12 sps:$4 sm:$0xff]   ;;  %v8388_v48 = vld [vmem:[%s12919_s2 + $0x30] ss:$12 sps:$4 sm:$0xff]   ;;  %v8394_v50 = vld [vmem:[%s12919_s2 + $0x4c] ss:$12 sps:$4 sm:$0xff]  }
  0x20   : > { %v9819_v49 = vld [vmem:[%s9736_s23] sm:$0x77]  ;;  %v8395_v52 = vld [vmem:[%s12919_s2 + $0x50] ss:$12 sps:$4 sm:$0xff]   ;;  %v8392_v53 = vld [vmem:[%s12919_s2 + $0x48] ss:$12 sps:$4 sm:$0xff]  }
  0x21   : > { %784 = vmatpush1.bf16.msra.mxu1 %v8348_v14  ;;  %743 = vmatpush1.bf16.msra.mxu0 %v8349_v15  ;;  %v7010_v51 = vcombine.high %v9819_v49, %v9819_v49  ;;  %v8398_v54 = vld [vmem:[%s12919_s2 + $0x64] ss:$12 sps:$4 sm:$0xff]   ;;  %v8399_v55 = vld [vmem:[%s12919_s2 + $0x68] ss:$12 sps:$4 sm:$0xff]   ;;  %v8396_v56 = vld [vmem:[%s12919_s2 + $0x60] ss:$12 sps:$4 sm:$0xff]  }
  0x22   : > { %785 = vmatprep.subr.bf16.mxu1 %v9538_v1  ;;  %744 = vmatprep.subr.bf16.mxu0 %v8350_v16  ;;  %v8402_v57 = vld [vmem:[%s12919_s2 + $0x7c] ss:$12 sps:$4 sm:$0xff]   ;;  %v8403_v58 = vld [vmem:[%s12919_s2 + $0x80] ss:$12 sps:$4 sm:$0xff]   ;;  %v8400_v59 = vld [vmem:[%s12919_s2 + $0x78] ss:$12 sps:$4 sm:$0xff]   ;;  %v7009_v16 = vcombine.low %v9819_v49, %v9819_v49 }
  0x23   : > { %v8406_v60 = vld [vmem:[%s12919_s2 + $0x94] ss:$12 sps:$4 sm:$0xff]   ;;  %v8407_v61 = vld [vmem:[%s12919_s2 + $0x98] ss:$12 sps:$4 sm:$0xff]   ;;  %v8404_v62 = vld [vmem:[%s12919_s2 + $0x90] ss:$12 sps:$4 sm:$0xff]  }
  0x24   : > { %v8410_v63 = vld [vmem:[%s12919_s2 + $0xac] ss:$12 sps:$4 sm:$0xff]   ;;  %v8411_v0 = vld [vmem:[%s12919_s2 + $0xb0] ss:$12 sps:$4 sm:$0xff]   ;;  %v8408_v2 = vld [vmem:[%s12919_s2 + $0xa8] ss:$12 sps:$4 sm:$0xff]  }
  0x25   : > { %786 = vmatpush1.bf16.msra.mxu1 %v8352_v17  ;;  %745 = vmatpush1.bf16.msra.mxu0 %v8353_v18  ;;  %v8414_v3 = vld [vmem:[%s12919_s2 + $0xc4] ss:$12 sps:$4 sm:$0xff]   ;;  %v8415_v4 = vld [vmem:[%s12919_s2 + $0xc8] ss:$12 sps:$4 sm:$0xff]   ;;  %v8412_v5 = vld [vmem:[%s12919_s2 + $0xc0] ss:$12 sps:$4 sm:$0xff]  }
  0x26   : > { %787 = vmatprep.subr.bf16.mxu1 %v9538_v1  ;;  %746 = vmatprep.subr.bf16.mxu0 %v8354_v19  ;;  %v8418_v6 = vld [vmem:[%s12919_s2 + $0xdc] ss:$12 sps:$4 sm:$0xff]   ;;  %v8419_v7 = vld [vmem:[%s12919_s2 + $0xe0] ss:$12 sps:$4 sm:$0xff]   ;;  %v8416_v8 = vld [vmem:[%s12919_s2 + $0xd8] ss:$12 sps:$4 sm:$0xff]  }
  0x27   : > { %v8422_v9 = vld [vmem:[%s12919_s2 + $0xf4] ss:$12 sps:$4 sm:$0xff]   ;;  %v8423_v10 = vld [vmem:[%s12919_s2 + $0xf8] ss:$12 sps:$4 sm:$0xff]   ;;  %v8420_v11 = vld [vmem:[%s12919_s2 + $0xf0] ss:$12 sps:$4 sm:$0xff]  }
  0x28   : > { %v8426_v12 = vld [vmem:[%s12919_s2 + $0x10c] ss:$12 sps:$4 sm:$0xff]   ;;  %v8427_v13 = vld [vmem:[%s12919_s2 + $0x110] ss:$12 sps:$4 sm:$0xff]   ;;  %v8424_v14 = vld [vmem:[%s12919_s2 + $0x108] ss:$12 sps:$4 sm:$0xff]  }
  0x29   : > { %788 = vmatpush1.bf16.msra.mxu1 %v8356_v20  ;;  %747 = vmatpush1.bf16.msra.mxu0 %v8357_v21  ;;  %v8432_v15 = vld [vmem:[%s12919_s2 + $0x244] ss:$12 sps:$4 sm:$0xff]   ;;  %v8433_v18 = vld [vmem:[%s12919_s2 + $0x248] ss:$12 sps:$4 sm:$0xff]   ;;  %v8430_v19 = vld [vmem:[%s12919_s2 + $0x240] ss:$12 sps:$4 sm:$0xff]  }
  0x2a   : > { %789 = vmatprep.subr.bf16.mxu1 %v9538_v1  ;;  %748 = vmatprep.subr.bf16.mxu0 %v8358_v22  ;;  %v9921_v17 = vld [vmem:[%s9736_s23 + $0x10] sm:$0x77]  ;;  %v8436_v20 = vld [vmem:[%s12919_s2 + $0x25c] ss:$12 sps:$4 sm:$0xff]   ;;  %v8437_v22 = vld [vmem:[%s12919_s2 + $0x260] ss:$12 sps:$4 sm:$0xff]  }
  0x2b   : > { %v7099_v21 = vcombine.high %v9921_v17, %v9921_v17  ;;  %v8441_v25 = vld [vmem:[%s12919_s2 + $0x278] ss:$12 sps:$4 sm:$0xff]   ;;  %s8175_s20 = sshll.u32 %s9626_s25, 4  ;;  %vm6830_vm2 = vcmask 40960   ;;  %s9539_s25 = smov [#allocation2]  }
  0x2c   : > { %v8444_v27 = vld [vmem:[%s12919_s2 + $0x28c] ss:$12 sps:$4 sm:$0xff]   ;;  %s12875_s30 = scalar_lea.hbm %s12929_s12, %s8175_s20  ;;  %s9478_s28 = sshll.u32 %s9539_s25, 4  ;;  %s9479_s28 = int_to_ptr.vmem [resolvable:$false] %s9478_s28 }
  0x2d   : > { %790 = vmatpush1.bf16.msra.mxu1 %v8360_v23  ;;  %749 = vmatpush1.bf16.msra.mxu0 %v8361_v24  ;;  %v8434_v23 = vld [vmem:[%s12919_s2 + $0x258] ss:$12 sps:$4 sm:$0xff]   ;;  %v8440_v24 = vld [vmem:[%s12919_s2 + $0x274] ss:$12 sps:$4 sm:$0xff]   ;;  %s9480_s29 = scalar_lea.vmem %s9479_s28, 32 }
  0x2e   : > { %791 = vmatprep.subr.bf16.mxu1 %v9538_v1  ;;  %750 = vmatprep.subr.bf16.mxu0 %v8362_v26  ;;  %v8438_v26 = vld [vmem:[%s12919_s2 + $0x270] ss:$12 sps:$4 sm:$0xff]   ;;  %v8473_v49 = vld [vmem:[%s12919_s2 + $0x338] ss:$12 sps:$4 sm:$0xff]  }
  0x31   : > { %792 = vmatpush1.bf16.msra.mxu1 %v8364_v28  ;;  %751 = vmatpush1.bf16.msra.mxu0 %v8365_v29  ;;  %v8445_v28 = vld [vmem:[%s12919_s2 + $0x290] ss:$12 sps:$4 sm:$0xff]   ;;  %v8442_v29 = vld [vmem:[%s12919_s2 + $0x288] ss:$12 sps:$4 sm:$0xff]  }
  0x32   : > { %793 = vmatprep.subr.bf16.mxu1 %v9538_v1  ;;  %752 = vmatprep.subr.bf16.mxu0 %v8366_v30  ;;  %v8448_v30 = vld [vmem:[%s12919_s2 + $0x2a4] ss:$12 sps:$4 sm:$0xff]  }
  0x35   : > { %794 = vmatpush1.bf16.msra.mxu1 %v8368_v31  ;;  %753 = vmatpush1.bf16.msra.mxu0 %v8369_v32  ;;  %v8449_v31 = vld [vmem:[%s12919_s2 + $0x2a8] ss:$12 sps:$4 sm:$0xff]   ;;  %v8446_v32 = vld [vmem:[%s12919_s2 + $0x2a0] ss:$12 sps:$4 sm:$0xff]  }
  0x36   : > { %795 = vmatprep.subr.bf16.mxu1 %v9538_v1  ;;  %754 = vmatprep.subr.bf16.mxu0 %v8370_v33  ;;  %v8452_v33 = vld [vmem:[%s12919_s2 + $0x2bc] ss:$12 sps:$4 sm:$0xff]  }
  0x39   : > { %796 = vmatpush1.bf16.msra.mxu1 %v8372_v34  ;;  %755 = vmatpush1.bf16.msra.mxu0 %v8373_v35  ;;  %v8453_v34 = vld [vmem:[%s12919_s2 + $0x2c0] ss:$12 sps:$4 sm:$0xff]   ;;  %v8450_v35 = vld [vmem:[%s12919_s2 + $0x2b8] ss:$12 sps:$4 sm:$0xff]  }
  0x3a   : > { %797 = vmatprep.subr.bf16.mxu1 %v9538_v1  ;;  %756 = vmatprep.subr.bf16.mxu0 %v8374_v36  ;;  %v8456_v36 = vld [vmem:[%s12919_s2 + $0x2d4] ss:$12 sps:$4 sm:$0xff]  }
  0x3d   : > { %798 = vmatpush1.bf16.msra.mxu1 %v8376_v37  ;;  %757 = vmatpush1.bf16.msra.mxu0 %v8377_v38  ;;  %v8457_v37 = vld [vmem:[%s12919_s2 + $0x2d8] ss:$12 sps:$4 sm:$0xff]   ;;  %v8454_v38 = vld [vmem:[%s12919_s2 + $0x2d0] ss:$12 sps:$4 sm:$0xff]  }
  0x3e   : > { %1057 = vmatprep.subr.bf16.mxu1 %v9538_v1  ;;  %1016 = vmatprep.subr.bf16.mxu0 %v8382_v39  ;;  %v8460_v39 = vld [vmem:[%s12919_s2 + $0x2ec] ss:$12 sps:$4 sm:$0xff]  }
  0x40   : > { %808 = vmatmul.mubr.bf16.vlgmr.msra.gmra.mrb[0].mxu1 %v6969_v40  ;;  %767 = vmatmul.mubr.bf16.vlgmr.msra.gmra.mrb[0].mxu0 %v6969_v40  ;;  %v8461_v40 = vld [vmem:[%s12919_s2 + $0x2f0] ss:$12 sps:$4 sm:$0xff]  }
  0x41   : > { %1058 = vmatpush1.bf16.msra.mxu1 %v8383_v41  ;;  %1017 = vmatpush1.bf16.msra.mxu0 %v8380_v42  ;;  %v8458_v41 = vld [vmem:[%s12919_s2 + $0x2e8] ss:$12 sps:$4 sm:$0xff]   ;;  %v8464_v42 = vld [vmem:[%s12919_s2 + $0x304] ss:$12 sps:$4 sm:$0xff]  }
  0x42   : > { %1059 = vmatprep.subr.bf16.mxu1 %v9538_v1  ;;  %1018 = vmatprep.subr.bf16.mxu0 %v8386_v43  ;;  %v8465_v43 = vld [vmem:[%s12919_s2 + $0x308] ss:$12 sps:$4 sm:$0xff]  }
  0x43   : > { %7048 = vmatprep.mubr.msk.bf16.mxu1 %vm730_vm0, %v7010_v51  ;;  %7047 = vmatprep.mubr.msk.bf16.mxu0 %vm730_vm0, %v7010_v51  ;;  %v8476_v51 = vld [vmem:[%s12919_s2 + $0x34c] ss:$12 sps:$4 sm:$0xff]  }
  0x45   : > { %1060 = vmatpush1.bf16.msra.mxu1 %v8387_v44  ;;  %1019 = vmatpush1.bf16.msra.mxu0 %v8384_v45  ;;  %v8462_v44 = vld [vmem:[%s12919_s2 + $0x300] ss:$12 sps:$4 sm:$0xff]   ;;  %v8468_v45 = vld [vmem:[%s12919_s2 + $0x31c] ss:$12 sps:$4 sm:$0xff]  }
  0x46   : > { %1061 = vmatprep.subr.bf16.mxu1 %v9538_v1  ;;  %1020 = vmatprep.subr.bf16.mxu0 %v8390_v46  ;;  %v8469_v46 = vld [vmem:[%s12919_s2 + $0x320] ss:$12 sps:$4 sm:$0xff]  }
  0x49   : > { %1062 = vmatpush1.bf16.msra.mxu1 %v8391_v47  ;;  %1021 = vmatpush1.bf16.msra.mxu0 %v8388_v48  ;;  %v8466_v47 = vld [vmem:[%s12919_s2 + $0x318] ss:$12 sps:$4 sm:$0xff]   ;;  %v8472_v48 = vld [vmem:[%s12919_s2 + $0x334] ss:$12 sps:$4 sm:$0xff]  }
  0x4a   : > { %1063 = vmatprep.subr.bf16.mxu1 %v9538_v1  ;;  %1022 = vmatprep.subr.bf16.mxu0 %v8394_v50  ;;  %v8470_v50 = vld [vmem:[%s12919_s2 + $0x330] ss:$12 sps:$4 sm:$0xff]  }
  0x4d   : > { %1064 = vmatpush1.bf16.msra.mxu1 %v8395_v52  ;;  %1023 = vmatpush1.bf16.msra.mxu0 %v8392_v53  ;;  %v8477_v52 = vld [vmem:[%s12919_s2 + $0x350] ss:$12 sps:$4 sm:$0xff]   ;;  %v8474_v53 = vld [vmem:[%s12919_s2 + $0x348] ss:$12 sps:$4 sm:$0xff]  }
  0x4e   : > { %1065 = vmatprep.subr.bf16.mxu1 %v9538_v1  ;;  %1024 = vmatprep.subr.bf16.mxu0 %v8398_v54  ;;  %v8482_v54 = vld [vmem:[%s12919_s2 + $0x364] ss:$12 sps:$4 sm:$0xff]  }
  0x51   : > { %1066 = vmatpush1.bf16.msra.mxu1 %v8399_v55  ;;  %1025 = vmatpush1.bf16.msra.mxu0 %v8396_v56  ;;  %v7098_v55 = vcombine.low %v9921_v17, %v9921_v17  ;;  %v10050_v56 = vld [vmem:[%s9736_s23 + $0x18] sm:$0x77]  ;;  %v8508_v17 = vld [vmem:[%s12919_s2 + $0x408] ss:$12 sps:$4 sm:$0xff]  }
  0x52   : > { %1067 = vmatprep.subr.bf16.mxu1 %v9538_v1  ;;  %1026 = vmatprep.subr.bf16.mxu0 %v8402_v57  ;;  %v8483_v57 = vld [vmem:[%s12919_s2 + $0x368] ss:$12 sps:$4 sm:$0xff]  }
  0x55   : > { %1068 = vmatpush1.bf16.msra.mxu1 %v8403_v58  ;;  %1027 = vmatpush1.bf16.msra.mxu0 %v8400_v59  ;;  %v8480_v58 = vld [vmem:[%s12919_s2 + $0x360] ss:$12 sps:$4 sm:$0xff]   ;;  %v8486_v59 = vld [vmem:[%s12919_s2 + $0x37c] ss:$12 sps:$4 sm:$0xff]  }
  0x56   : > { %1069 = vmatprep.subr.bf16.mxu1 %v9538_v1  ;;  %1028 = vmatprep.subr.bf16.mxu0 %v8406_v60  ;;  %v7188_v60 = vcombine.high %v10050_v56, %v10050_v56 }
  0x59   : > { %1070 = vmatpush1.bf16.msra.mxu1 %v8407_v61  ;;  %1029 = vmatpush1.bf16.msra.mxu0 %v8404_v62  ;;  %v8487_v61 = vld [vmem:[%s12919_s2 + $0x380] ss:$12 sps:$4 sm:$0xff]   ;;  %v8484_v62 = vld [vmem:[%s12919_s2 + $0x378] ss:$12 sps:$4 sm:$0xff]  }
  0x5a   : > { %1071 = vmatprep.subr.bf16.mxu1 %v9538_v1  ;;  %1030 = vmatprep.subr.bf16.mxu0 %v8410_v63  ;;  %v8490_v63 = vld [vmem:[%s12919_s2 + $0x394] ss:$12 sps:$4 sm:$0xff]  }
  0x5d   : > { %1072 = vmatpush1.bf16.msra.mxu1 %v8411_v0  ;;  %1031 = vmatpush1.bf16.msra.mxu0 %v8408_v2  ;;  %v8491_v0 = vld [vmem:[%s12919_s2 + $0x398] ss:$12 sps:$4 sm:$0xff]   ;;  %v8488_v2 = vld [vmem:[%s12919_s2 + $0x390] ss:$12 sps:$4 sm:$0xff]  }
  0x5e   : > { %1073 = vmatprep.subr.bf16.mxu1 %v9538_v1  ;;  %1032 = vmatprep.subr.bf16.mxu0 %v8414_v3  ;;  %v8494_v3 = vld [vmem:[%s12919_s2 + $0x3ac] ss:$12 sps:$4 sm:$0xff]  }
  0x61   : > { %1074 = vmatpush1.bf16.msra.mxu1 %v8415_v4  ;;  %1033 = vmatpush1.bf16.msra.mxu0 %v8412_v5  ;;  %v8495_v4 = vld [vmem:[%s12919_s2 + $0x3b0] ss:$12 sps:$4 sm:$0xff]   ;;  %v8492_v5 = vld [vmem:[%s12919_s2 + $0x3a8] ss:$12 sps:$4 sm:$0xff]  }
  0x62   : > { %1075 = vmatprep.subr.bf16.mxu1 %v9538_v1  ;;  %1034 = vmatprep.subr.bf16.mxu0 %v8418_v6  ;;  %v8498_v6 = vld [vmem:[%s12919_s2 + $0x3c4] ss:$12 sps:$4 sm:$0xff]  }
  0x65   : > { %1076 = vmatpush1.bf16.msra.mxu1 %v8419_v7  ;;  %1035 = vmatpush1.bf16.msra.mxu0 %v8416_v8  ;;  %v8499_v7 = vld [vmem:[%s12919_s2 + $0x3c8] ss:$12 sps:$4 sm:$0xff]   ;;  %v8496_v8 = vld [vmem:[%s12919_s2 + $0x3c0] ss:$12 sps:$4 sm:$0xff]  }
  0x66   : > { %1077 = vmatprep.subr.bf16.mxu1 %v9538_v1  ;;  %1036 = vmatprep.subr.bf16.mxu0 %v8422_v9  ;;  %v8502_v9 = vld [vmem:[%s12919_s2 + $0x3dc] ss:$12 sps:$4 sm:$0xff]  }
  0x69   : > { %1078 = vmatpush1.bf16.msra.mxu1 %v8423_v10  ;;  %1037 = vmatpush1.bf16.msra.mxu0 %v8420_v11  ;;  %v8503_v10 = vld [vmem:[%s12919_s2 + $0x3e0] ss:$12 sps:$4 sm:$0xff]   ;;  %v8500_v11 = vld [vmem:[%s12919_s2 + $0x3d8] ss:$12 sps:$4 sm:$0xff]  }
  0x6a   : > { %1079 = vmatprep.subr.bf16.mxu1 %v9538_v1  ;;  %1038 = vmatprep.subr.bf16.mxu0 %v8426_v12  ;;  %v8506_v12 = vld [vmem:[%s12919_s2 + $0x3f4] ss:$12 sps:$4 sm:$0xff]  }
  0x6d   : > { %1080 = vmatpush1.bf16.msra.mxu1 %v8427_v13  ;;  %1039 = vmatpush1.bf16.msra.mxu0 %v8424_v14  ;;  %v8507_v13 = vld [vmem:[%s12919_s2 + $0x3f8] ss:$12 sps:$4 sm:$0xff]   ;;  %v8504_v14 = vld [vmem:[%s12919_s2 + $0x3f0] ss:$12 sps:$4 sm:$0xff]  }
  0x6e   : > { %1390 = vmatprep.subr.bf16.mxu1 %v9538_v1  ;;  %1349 = vmatprep.subr.bf16.mxu0 %v8432_v15  ;;  %v8510_v15 = vld [vmem:[%s12919_s2 + $0x40c] ss:$12 sps:$4 sm:$0xff]  }
  0x70   : > { %1090 = vmatmul.mubr.bf16.vlgmr.msra.gmra.mrb[4].mxu1 %v7009_v16  ;;  %1049 = vmatmul.mubr.bf16.vlgmr.msra.gmra.mrb[4].mxu0 %v7009_v16  ;;  %v8511_v16 = vld [vmem:[%s12919_s2 + $0x410] ss:$12 sps:$4 sm:$0xff]  }
  0x71   : > { %1391 = vmatpush1.bf16.msra.mxu1 %v8433_v18  ;;  %1350 = vmatpush1.bf16.msra.mxu0 %v8430_v19  ;;  %v8514_v18 = vld [vmem:[%s12919_s2 + $0x424] ss:$12 sps:$4 sm:$0xff]   ;;  %v8515_v19 = vld [vmem:[%s12919_s2 + $0x428] ss:$12 sps:$4 sm:$0xff]  }
  0x72   : > { %1392 = vmatprep.subr.bf16.mxu1 %v9538_v1  ;;  %1351 = vmatprep.subr.bf16.mxu0 %v8436_v20  ;;  %v8512_v20 = vld [vmem:[%s12919_s2 + $0x420] ss:$12 sps:$4 sm:$0xff]  }
  0x73   : > { %7137 = vmatprep.mubr.msk.bf16.mxu1 %vm730_vm0, %v7099_v21  ;;  %7136 = vmatprep.mubr.msk.bf16.mxu0 %vm730_vm0, %v7099_v21  ;;  %v8518_v21 = vld [vmem:[%s12919_s2 + $0x43c] ss:$12 sps:$4 sm:$0xff]  }
  0x75   : > { %1393 = vmatpush1.bf16.msra.mxu1 %v8437_v22  ;;  %1352 = vmatpush1.bf16.msra.mxu0 %v8434_v23  ;;  %v8519_v22 = vld [vmem:[%s12919_s2 + $0x440] ss:$12 sps:$4 sm:$0xff]   ;;  %v8516_v23 = vld [vmem:[%s12919_s2 + $0x438] ss:$12 sps:$4 sm:$0xff]  }
  0x76   : > { %1394 = vmatprep.subr.bf16.mxu1 %v9538_v1  ;;  %1353 = vmatprep.subr.bf16.mxu0 %v8440_v24  ;;  %v8522_v24 = vld [vmem:[%s12919_s2 + $0x454] ss:$12 sps:$4 sm:$0xff]  }
  0x79   : > { %1395 = vmatpush1.bf16.msra.mxu1 %v8441_v25  ;;  %1354 = vmatpush1.bf16.msra.mxu0 %v8438_v26  ;;  %v8523_v25 = vld [vmem:[%s12919_s2 + $0x458] ss:$12 sps:$4 sm:$0xff]   ;;  %v8520_v26 = vld [vmem:[%s12919_s2 + $0x450] ss:$12 sps:$4 sm:$0xff]  }
  0x7a   : > { %1396 = vmatprep.subr.bf16.mxu1 %v9538_v1  ;;  %1355 = vmatprep.subr.bf16.mxu0 %v8444_v27  ;;  %v8526_v27 = vld [vmem:[%s12919_s2 + $0x46c] ss:$12 sps:$4 sm:$0xff]  }
  0x7d   : > { %1397 = vmatpush1.bf16.msra.mxu1 %v8445_v28  ;;  %1356 = vmatpush1.bf16.msra.mxu0 %v8442_v29  ;;  %v8527_v28 = vld [vmem:[%s12919_s2 + $0x470] ss:$12 sps:$4 sm:$0xff]   ;;  %v8524_v29 = vld [vmem:[%s12919_s2 + $0x468] ss:$12 sps:$4 sm:$0xff]  }
  0x7e   : > { %1398 = vmatprep.subr.bf16.mxu1 %v9538_v1  ;;  %1357 = vmatprep.subr.bf16.mxu0 %v8448_v30  ;;  %v8532_v30 = vld [vmem:[%s12919_s2 + $0x484] ss:$12 sps:$4 sm:$0xff]  }
  0x81   : > { %1399 = vmatpush1.bf16.msra.mxu1 %v8449_v31  ;;  %1358 = vmatpush1.bf16.msra.mxu0 %v8446_v32  ;;  %v8533_v31 = vld [vmem:[%s12919_s2 + $0x488] ss:$12 sps:$4 sm:$0xff]   ;;  %v10180_v32 = vld [vmem:[%s9736_s23 + $0x20] sm:$0x77] }
  0x82   : > { %1400 = vmatprep.subr.bf16.mxu1 %v9538_v1  ;;  %1359 = vmatprep.subr.bf16.mxu0 %v8452_v33  ;;  %v7187_v33 = vcombine.low %v10050_v56, %v10050_v56  ;;  %v8558_v56 = vld [vmem:[%s12919_s2 + $0x528] ss:$12 sps:$4 sm:$0xff]  }
  0x85   : > { %1401 = vmatpush1.bf16.msra.mxu1 %v8453_v34  ;;  %1360 = vmatpush1.bf16.msra.mxu0 %v8450_v35  ;;  %v8530_v34 = vld [vmem:[%s12919_s2 + $0x480] ss:$12 sps:$4 sm:$0xff]   ;;  %v8536_v35 = vld [vmem:[%s12919_s2 + $0x49c] ss:$12 sps:$4 sm:$0xff]  }
  0x86   : > { %1402 = vmatprep.subr.bf16.mxu1 %v9538_v1  ;;  %1361 = vmatprep.subr.bf16.mxu0 %v8456_v36  ;;  %v8537_v36 = vld [vmem:[%s12919_s2 + $0x4a0] ss:$12 sps:$4 sm:$0xff]  }
  0x89   : > { %1403 = vmatpush1.bf16.msra.mxu1 %v8457_v37  ;;  %1362 = vmatpush1.bf16.msra.mxu0 %v8454_v38  ;;  %v7277_v37 = vcombine.high %v10180_v32, %v10180_v32  ;;  %v8534_v38 = vld [vmem:[%s12919_s2 + $0x498] ss:$12 sps:$4 sm:$0xff]  }
  0x8a   : > { %1404 = vmatprep.subr.bf16.mxu1 %v9538_v1  ;;  %1363 = vmatprep.subr.bf16.mxu0 %v8460_v39  ;;  %v8540_v39 = vld [vmem:[%s12919_s2 + $0x4b4] ss:$12 sps:$4 sm:$0xff]  }
  0x8d   : > { %1405 = vmatpush1.bf16.msra.mxu1 %v8461_v40  ;;  %1364 = vmatpush1.bf16.msra.mxu0 %v8458_v41  ;;  %v8541_v40 = vld [vmem:[%s12919_s2 + $0x4b8] ss:$12 sps:$4 sm:$0xff]   ;;  %v8538_v41 = vld [vmem:[%s12919_s2 + $0x4b0] ss:$12 sps:$4 sm:$0xff]  }
  0x8e   : > { %1406 = vmatprep.subr.bf16.mxu1 %v9538_v1  ;;  %1365 = vmatprep.subr.bf16.mxu0 %v8464_v42  ;;  %v8544_v42 = vld [vmem:[%s12919_s2 + $0x4cc] ss:$12 sps:$4 sm:$0xff]  }
  0x91   : > { %1407 = vmatpush1.bf16.msra.mxu1 %v8465_v43  ;;  %1366 = vmatpush1.bf16.msra.mxu0 %v8462_v44  ;;  %v8545_v43 = vld [vmem:[%s12919_s2 + $0x4d0] ss:$12 sps:$4 sm:$0xff]   ;;  %v8542_v44 = vld [vmem:[%s12919_s2 + $0x4c8] ss:$12 sps:$4 sm:$0xff]  }
  0x92   : > { %1408 = vmatprep.subr.bf16.mxu1 %v9538_v1  ;;  %1367 = vmatprep.subr.bf16.mxu0 %v8468_v45  ;;  %v8548_v45 = vld [vmem:[%s12919_s2 + $0x4e4] ss:$12 sps:$4 sm:$0xff]  }
  0x95   : > { %1409 = vmatpush1.bf16.msra.mxu1 %v8469_v46  ;;  %1368 = vmatpush1.bf16.msra.mxu0 %v8466_v47  ;;  %v8546_v46 = vld [vmem:[%s12919_s2 + $0x4e0] ss:$12 sps:$4 sm:$0xff]   ;;  %v8549_v47 = vld [vmem:[%s12919_s2 + $0x4e8] ss:$12 sps:$4 sm:$0xff]  }
  0x96   : > { %1410 = vmatprep.subr.bf16.mxu1 %v9538_v1  ;;  %1369 = vmatprep.subr.bf16.mxu0 %v8472_v48  ;;  %v8552_v48 = vld [vmem:[%s12919_s2 + $0x4fc] ss:$12 sps:$4 sm:$0xff]  }
  0x99   : > { %1411 = vmatpush1.bf16.msra.mxu1 %v8473_v49  ;;  %1370 = vmatpush1.bf16.msra.mxu0 %v8470_v50  ;;  %v8553_v49 = vld [vmem:[%s12919_s2 + $0x500] ss:$12 sps:$4 sm:$0xff]   ;;  %v8550_v50 = vld [vmem:[%s12919_s2 + $0x4f8] ss:$12 sps:$4 sm:$0xff]  }
  0x9a   : > { %1412 = vmatprep.subr.bf16.mxu1 %v9538_v1  ;;  %1371 = vmatprep.subr.bf16.mxu0 %v8476_v51  ;;  %v8556_v51 = vld [vmem:[%s12919_s2 + $0x514] ss:$12 sps:$4 sm:$0xff]  }
  0x9d   : > { %1413 = vmatpush1.bf16.msra.mxu1 %v8477_v52  ;;  %1372 = vmatpush1.bf16.msra.mxu0 %v8474_v53  ;;  %v8557_v52 = vld [vmem:[%s12919_s2 + $0x518] ss:$12 sps:$4 sm:$0xff]   ;;  %v8554_v53 = vld [vmem:[%s12919_s2 + $0x510] ss:$12 sps:$4 sm:$0xff]  }
  0x9e   : > { %1726 = vmatprep.subr.bf16.mxu1 %v9538_v1  ;;  %1685 = vmatprep.subr.bf16.mxu0 %v8482_v54  ;;  %v8560_v54 = vld [vmem:[%s12919_s2 + $0x52c] ss:$12 sps:$4 sm:$0xff]  }
  0xa0   : > { %1423 = vmatmul.mubr.bf16.vlgmr.msra.gmra.mrb[8].mxu1 %v7098_v55  ;;  %1382 = vmatmul.mubr.bf16.vlgmr.msra.gmra.mrb[8].mxu0 %v7098_v55  ;;  %v8561_v55 = vld [vmem:[%s12919_s2 + $0x530] ss:$12 sps:$4 sm:$0xff]  }
  0xa1   : > { %1727 = vmatpush1.bf16.msra.mxu1 %v8483_v57  ;;  %1686 = vmatpush1.bf16.msra.mxu0 %v8480_v58  ;;  %v8564_v57 = vld [vmem:[%s12919_s2 + $0x544] ss:$12 sps:$4 sm:$0xff]   ;;  %v8565_v58 = vld [vmem:[%s12919_s2 + $0x548] ss:$12 sps:$4 sm:$0xff]  }
  0xa2   : > { %1728 = vmatprep.subr.bf16.mxu1 %v9538_v1  ;;  %1687 = vmatprep.subr.bf16.mxu0 %v8486_v59  ;;  %v8562_v59 = vld [vmem:[%s12919_s2 + $0x540] ss:$12 sps:$4 sm:$0xff]  }
  0xa3   : > { %7226 = vmatprep.mubr.msk.bf16.mxu1 %vm730_vm0, %v7188_v60  ;;  %7225 = vmatprep.mubr.msk.bf16.mxu0 %vm730_vm0, %v7188_v60  ;;  %v8568_v60 = vld [vmem:[%s12919_s2 + $0x55c] ss:$12 sps:$4 sm:$0xff]  }
  0xa5   : > { %1729 = vmatpush1.bf16.msra.mxu1 %v8487_v61  ;;  %1688 = vmatpush1.bf16.msra.mxu0 %v8484_v62  ;;  %v8569_v61 = vld [vmem:[%s12919_s2 + $0x560] ss:$12 sps:$4 sm:$0xff]   ;;  %v8566_v62 = vld [vmem:[%s12919_s2 + $0x558] ss:$12 sps:$4 sm:$0xff]  }
  0xa6   : > { %1730 = vmatprep.subr.bf16.mxu1 %v9538_v1  ;;  %1689 = vmatprep.subr.bf16.mxu0 %v8490_v63  ;;  %v8572_v63 = vld [vmem:[%s12919_s2 + $0x574] ss:$12 sps:$4 sm:$0xff]  }
  0xa9   : > { %1731 = vmatpush1.bf16.msra.mxu1 %v8491_v0  ;;  %1690 = vmatpush1.bf16.msra.mxu0 %v8488_v2  ;;  %v8573_v0 = vld [vmem:[%s12919_s2 + $0x578] ss:$12 sps:$4 sm:$0xff]   ;;  %v8570_v2 = vld [vmem:[%s12919_s2 + $0x570] ss:$12 sps:$4 sm:$0xff]  }
  0xaa   : > { %1732 = vmatprep.subr.bf16.mxu1 %v9538_v1  ;;  %1691 = vmatprep.subr.bf16.mxu0 %v8494_v3  ;;  %v8576_v3 = vld [vmem:[%s12919_s2 + $0x58c] ss:$12 sps:$4 sm:$0xff]  }
  0xad   : > { %1733 = vmatpush1.bf16.msra.mxu1 %v8495_v4  ;;  %1692 = vmatpush1.bf16.msra.mxu0 %v8492_v5  ;;  %v8577_v4 = vld [vmem:[%s12919_s2 + $0x590] ss:$12 sps:$4 sm:$0xff]   ;;  %v8574_v5 = vld [vmem:[%s12919_s2 + $0x588] ss:$12 sps:$4 sm:$0xff]  }
  0xae   : > { %1734 = vmatprep.subr.bf16.mxu1 %v9538_v1  ;;  %1693 = vmatprep.subr.bf16.mxu0 %v8498_v6  ;;  %v8582_v6 = vld [vmem:[%s12919_s2 + $0x5a4] ss:$12 sps:$4 sm:$0xff]  }
  0xb1   : > { %1735 = vmatpush1.bf16.msra.mxu1 %v8499_v7  ;;  %1694 = vmatpush1.bf16.msra.mxu0 %v8496_v8  ;;  %v8583_v7 = vld [vmem:[%s12919_s2 + $0x5a8] ss:$12 sps:$4 sm:$0xff]  }
  0xb2   : > { %1736 = vmatprep.subr.bf16.mxu1 %v9538_v1  ;;  %1695 = vmatprep.subr.bf16.mxu0 %v8502_v9  ;;  %v10309_v8 = vld [vmem:[%s9736_s23 + $0x28] sm:$0x77]  ;;  %v7276_v9 = vcombine.low %v10180_v32, %v10180_v32 }
  0xb5   : > { %1737 = vmatpush1.bf16.msra.mxu1 %v8503_v10  ;;  %1696 = vmatpush1.bf16.msra.mxu0 %v8500_v11  ;;  %v8580_v10 = vld [vmem:[%s12919_s2 + $0x5a0] ss:$12 sps:$4 sm:$0xff]   ;;  %v8586_v11 = vld [vmem:[%s12919_s2 + $0x5bc] ss:$12 sps:$4 sm:$0xff]  }
  0xb6   : > { %1738 = vmatprep.subr.bf16.mxu1 %v9538_v1  ;;  %1697 = vmatprep.subr.bf16.mxu0 %v8506_v12  ;;  %v8587_v12 = vld [vmem:[%s12919_s2 + $0x5c0] ss:$12 sps:$4 sm:$0xff]  }
  0xb9   : > { %1739 = vmatpush1.bf16.msra.mxu1 %v8507_v13  ;;  %1698 = vmatpush1.bf16.msra.mxu0 %v8504_v14  ;;  %v7366_v13 = vcombine.high %v10309_v8, %v10309_v8  ;;  %v8584_v14 = vld [vmem:[%s12919_s2 + $0x5b8] ss:$12 sps:$4 sm:$0xff]  }
  0xba   : > { %1740 = vmatprep.subr.bf16.mxu1 %v9538_v1  ;;  %1699 = vmatprep.subr.bf16.mxu0 %v8510_v15  ;;  %v8590_v15 = vld [vmem:[%s12919_s2 + $0x5d4] ss:$12 sps:$4 sm:$0xff]  }
  0xbd   : > { %1741 = vmatpush1.bf16.msra.mxu1 %v8511_v16  ;;  %1700 = vmatpush1.bf16.msra.mxu0 %v8508_v17  ;;  %v8591_v16 = vld [vmem:[%s12919_s2 + $0x5d8] ss:$12 sps:$4 sm:$0xff]   ;;  %v8588_v17 = vld [vmem:[%s12919_s2 + $0x5d0] ss:$12 sps:$4 sm:$0xff]  }
  0xbe   : > { %1742 = vmatprep.subr.bf16.mxu1 %v9538_v1  ;;  %1701 = vmatprep.subr.bf16.mxu0 %v8514_v18  ;;  %v8594_v18 = vld [vmem:[%s12919_s2 + $0x5ec] ss:$12 sps:$4 sm:$0xff]  }
  0xc1   : > { %1743 = vmatpush1.bf16.msra.mxu1 %v8515_v19  ;;  %1702 = vmatpush1.bf16.msra.mxu0 %v8512_v20  ;;  %v8595_v19 = vld [vmem:[%s12919_s2 + $0x5f0] ss:$12 sps:$4 sm:$0xff]   ;;  %v8592_v20 = vld [vmem:[%s12919_s2 + $0x5e8] ss:$12 sps:$4 sm:$0xff]  }
  0xc2   : > { %1744 = vmatprep.subr.bf16.mxu1 %v9538_v1  ;;  %1703 = vmatprep.subr.bf16.mxu0 %v8518_v21  ;;  %v8598_v21 = vld [vmem:[%s12919_s2 + $0x604] ss:$12 sps:$4 sm:$0xff]  }
  0xc5   : > { %1745 = vmatpush1.bf16.msra.mxu1 %v8519_v22  ;;  %1704 = vmatpush1.bf16.msra.mxu0 %v8516_v23  ;;  %v8596_v22 = vld [vmem:[%s12919_s2 + $0x600] ss:$12 sps:$4 sm:$0xff]   ;;  %v8599_v23 = vld [vmem:[%s12919_s2 + $0x608] ss:$12 sps:$4 sm:$0xff]  }
  0xc6   : > { %1746 = vmatprep.subr.bf16.mxu1 %v9538_v1  ;;  %1705 = vmatprep.subr.bf16.mxu0 %v8522_v24  ;;  %v8602_v24 = vld [vmem:[%s12919_s2 + $0x61c] ss:$12 sps:$4 sm:$0xff]  }
  0xc9   : > { %1747 = vmatpush1.bf16.msra.mxu1 %v8523_v25  ;;  %1706 = vmatpush1.bf16.msra.mxu0 %v8520_v26  ;;  %v8603_v25 = vld [vmem:[%s12919_s2 + $0x620] ss:$12 sps:$4 sm:$0xff]   ;;  %v8600_v26 = vld [vmem:[%s12919_s2 + $0x618] ss:$12 sps:$4 sm:$0xff]  }
  0xca   : > { %1748 = vmatprep.subr.bf16.mxu1 %v9538_v1  ;;  %1707 = vmatprep.subr.bf16.mxu0 %v8526_v27  ;;  %v8606_v27 = vld [vmem:[%s12919_s2 + $0x634] ss:$12 sps:$4 sm:$0xff]  }
  0xcd   : > { %1749 = vmatpush1.bf16.msra.mxu1 %v8527_v28  ;;  %1708 = vmatpush1.bf16.msra.mxu0 %v8524_v29  ;;  %v8607_v29 = vld [vmem:[%s12919_s2 + $0x638] ss:$12 sps:$4 sm:$0xff]  }
  0xce   : > { %2062 = vmatprep.subr.bf16.mxu1 %v9538_v1  ;;  %2021 = vmatprep.subr.bf16.mxu0 %v8532_v30 }
  0xd0   : > { %1759 = vmatmul.mubr.bf16.vlgmr.msra.gmra.mrb[12].mxu1 %v7187_v33  ;;  %1718 = vmatmul.mubr.bf16.vlgmr.msra.gmra.mrb[12].mxu0 %v7187_v33 }
  0xd1   : > { %2063 = vmatpush1.bf16.msra.mxu1 %v8533_v31  ;;  %2022 = vmatpush1.bf16.msra.mxu0 %v8530_v34  ;;  %v8604_v31 = vld [vmem:[%s12919_s2 + $0x630] ss:$12 sps:$4 sm:$0xff]   ;;  %v8610_v34 = vld [vmem:[%s12919_s2 + $0x64c] ss:$12 sps:$4 sm:$0xff]  }
  0xd2   : > { %2064 = vmatprep.subr.bf16.mxu1 %v9538_v1  ;;  %2023 = vmatprep.subr.bf16.mxu0 %v8536_v35 }
  0xd3   : > { %7315 = vmatprep.mubr.msk.bf16.mxu1 %vm730_vm0, %v7277_v37  ;;  %7314 = vmatprep.mubr.msk.bf16.mxu0 %vm730_vm0, %v7277_v37 }
  0xd5   : > { %2065 = vmatpush1.bf16.msra.mxu1 %v8537_v36  ;;  %2024 = vmatpush1.bf16.msra.mxu0 %v8534_v38  ;;  %v8611_v38 = vld [vmem:[%s12919_s2 + $0x650] ss:$12 sps:$4 sm:$0xff]  }
  0xd6   : > { %2066 = vmatprep.subr.bf16.mxu1 %v9538_v1  ;;  %2025 = vmatprep.subr.bf16.mxu0 %v8540_v39 }
  0xd9   : > { %2067 = vmatpush1.bf16.msra.mxu1 %v8541_v40  ;;  %2026 = vmatpush1.bf16.msra.mxu0 %v8538_v41  ;;  %v8608_v40 = vld [vmem:[%s12919_s2 + $0x648] ss:$12 sps:$4 sm:$0xff]   ;;  %v8614_v41 = vld [vmem:[%s12919_s2 + $0x664] ss:$12 sps:$4 sm:$0xff]  }
  0xda   : > { %2068 = vmatprep.subr.bf16.mxu1 %v9538_v1  ;;  %2027 = vmatprep.subr.bf16.mxu0 %v8544_v42  ;;  %v8615_v42 = vld [vmem:[%s12919_s2 + $0x668] ss:$12 sps:$4 sm:$0xff]  }
  0xdd   : > { %2069 = vmatpush1.bf16.msra.mxu1 %v8545_v43  ;;  %2028 = vmatpush1.bf16.msra.mxu0 %v8542_v44  ;;  %v8612_v43 = vld [vmem:[%s12919_s2 + $0x660] ss:$12 sps:$4 sm:$0xff]   ;;  %v8618_v44 = vld [vmem:[%s12919_s2 + $0x67c] ss:$12 sps:$4 sm:$0xff]  }
  0xde   : > { %2070 = vmatprep.subr.bf16.mxu1 %v9538_v1  ;;  %2029 = vmatprep.subr.bf16.mxu0 %v8548_v45  ;;  %v8619_v45 = vld [vmem:[%s12919_s2 + $0x680] ss:$12 sps:$4 sm:$0xff]  }
  0xe1   : > { %2071 = vmatpush1.bf16.msra.mxu1 %v8549_v47  ;;  %2030 = vmatpush1.bf16.msra.mxu0 %v8546_v46  ;;  %v8616_v46 = vld [vmem:[%s12919_s2 + $0x678] ss:$12 sps:$4 sm:$0xff]   ;;  %v8622_v47 = vld [vmem:[%s12919_s2 + $0x694] ss:$12 sps:$4 sm:$0xff]  }
  0xe2   : > { %2072 = vmatprep.subr.bf16.mxu1 %v9538_v1  ;;  %2031 = vmatprep.subr.bf16.mxu0 %v8552_v48  ;;  %v8623_v48 = vld [vmem:[%s12919_s2 + $0x698] ss:$12 sps:$4 sm:$0xff]  }
  0xe5   : > { %2073 = vmatpush1.bf16.msra.mxu1 %v8553_v49  ;;  %2032 = vmatpush1.bf16.msra.mxu0 %v8550_v50  ;;  %v8620_v49 = vld [vmem:[%s12919_s2 + $0x690] ss:$12 sps:$4 sm:$0xff]   ;;  %v8626_v50 = vld [vmem:[%s12919_s2 + $0x6ac] ss:$12 sps:$4 sm:$0xff]  }
  0xe6   : > { %2074 = vmatprep.subr.bf16.mxu1 %v9538_v1  ;;  %2033 = vmatprep.subr.bf16.mxu0 %v8556_v51  ;;  %v8627_v51 = vld [vmem:[%s12919_s2 + $0x6b0] ss:$12 sps:$4 sm:$0xff]  }
  0xe9   : > { %2075 = vmatpush1.bf16.msra.mxu1 %v8557_v52  ;;  %2034 = vmatpush1.bf16.msra.mxu0 %v8554_v53  ;;  %v8624_v52 = vld [vmem:[%s12919_s2 + $0x6a8] ss:$12 sps:$4 sm:$0xff]   ;;  %v8632_v53 = vld [vmem:[%s12919_s2 + $0x6c4] ss:$12 sps:$4 sm:$0xff]  }
  0xea   : > { %2076 = vmatprep.subr.bf16.mxu1 %v9538_v1  ;;  %2035 = vmatprep.subr.bf16.mxu0 %v8560_v54  ;;  %v10441_v54 = vld [vmem:[%s9736_s23 + $0x30] sm:$0x77] }
  0xed   : > { %2077 = vmatpush1.bf16.msra.mxu1 %v8561_v55  ;;  %2036 = vmatpush1.bf16.msra.mxu0 %v8558_v56  ;;  %v8633_v55 = vld [vmem:[%s12919_s2 + $0x6c8] ss:$12 sps:$4 sm:$0xff]   ;;  %v7365_v56 = vcombine.low %v10309_v8, %v10309_v8 }
  0xee   : > { %2078 = vmatprep.subr.bf16.mxu1 %v9538_v1  ;;  %2037 = vmatprep.subr.bf16.mxu0 %v8564_v57  ;;  %v8630_v57 = vld [vmem:[%s12919_s2 + $0x6c0] ss:$12 sps:$4 sm:$0xff]   ;;  %v8652_v8 = vld [vmem:[%s12919_s2 + $0x73c] ss:$12 sps:$4 sm:$0xff]  }
  0xf1   : > { %2079 = vmatpush1.bf16.msra.mxu1 %v8565_v58  ;;  %2038 = vmatpush1.bf16.msra.mxu0 %v8562_v59  ;;  %v8636_v58 = vld [vmem:[%s12919_s2 + $0x6dc] ss:$12 sps:$4 sm:$0xff]   ;;  %v8637_v59 = vld [vmem:[%s12919_s2 + $0x6e0] ss:$12 sps:$4 sm:$0xff]  }
  0xf2   : > { %2080 = vmatprep.subr.bf16.mxu1 %v9538_v1  ;;  %2039 = vmatprep.subr.bf16.mxu0 %v8568_v60  ;;  %v7455_v60 = vcombine.high %v10441_v54, %v10441_v54 }
  0xf5   : > { %2081 = vmatpush1.bf16.msra.mxu1 %v8569_v61  ;;  %2040 = vmatpush1.bf16.msra.mxu0 %v8566_v62  ;;  %v8634_v61 = vld [vmem:[%s12919_s2 + $0x6d8] ss:$12 sps:$4 sm:$0xff]   ;;  %v8640_v62 = vld [vmem:[%s12919_s2 + $0x6f4] ss:$12 sps:$4 sm:$0xff]  }
  0xf6   : > { %2082 = vmatprep.subr.bf16.mxu1 %v9538_v1  ;;  %2041 = vmatprep.subr.bf16.mxu0 %v8572_v63  ;;  %v8641_v63 = vld [vmem:[%s12919_s2 + $0x6f8] ss:$12 sps:$4 sm:$0xff]  }
  0xf9   : > { %2083 = vmatpush1.bf16.msra.mxu1 %v8573_v0  ;;  %2042 = vmatpush1.bf16.msra.mxu0 %v8570_v2  ;;  %v8638_v0 = vld [vmem:[%s12919_s2 + $0x6f0] ss:$12 sps:$4 sm:$0xff]   ;;  %v8644_v2 = vld [vmem:[%s12919_s2 + $0x70c] ss:$12 sps:$4 sm:$0xff]  }
  0xfa   : > { %2084 = vmatprep.subr.bf16.mxu1 %v9538_v1  ;;  %2043 = vmatprep.subr.bf16.mxu0 %v8576_v3  ;;  %v8645_v3 = vld [vmem:[%s12919_s2 + $0x710] ss:$12 sps:$4 sm:$0xff]  }
  0xfd   : > { %2085 = vmatpush1.bf16.msra.mxu1 %v8577_v4  ;;  %2044 = vmatpush1.bf16.msra.mxu0 %v8574_v5  ;;  %v8642_v4 = vld [vmem:[%s12919_s2 + $0x708] ss:$12 sps:$4 sm:$0xff]   ;;  %v8648_v5 = vld [vmem:[%s12919_s2 + $0x724] ss:$12 sps:$4 sm:$0xff]  }
  0xfe   : > { %2398 = vmatprep.subr.bf16.mxu1 %v9538_v1  ;;  %2357 = vmatprep.subr.bf16.mxu0 %v8582_v6  ;;  %v8646_v6 = vld [vmem:[%s12919_s2 + $0x720] ss:$12 sps:$4 sm:$0xff]  }
 0x100   : > { %2095 = vmatmul.mubr.bf16.vlgmr.msra.gmra.mrb[16].mxu1 %v7276_v9  ;;  %2054 = vmatmul.mubr.bf16.vlgmr.msra.gmra.mrb[16].mxu0 %v7276_v9  ;;  %v8653_v9 = vld [vmem:[%s12919_s2 + $0x740] ss:$12 sps:$4 sm:$0xff]  }
 0x101   : > { %2399 = vmatpush1.bf16.msra.mxu1 %v8583_v7  ;;  %2358 = vmatpush1.bf16.msra.mxu0 %v8580_v10  ;;  %v8649_v7 = vld [vmem:[%s12919_s2 + $0x728] ss:$12 sps:$4 sm:$0xff]   ;;  %v8650_v10 = vld [vmem:[%s12919_s2 + $0x738] ss:$12 sps:$4 sm:$0xff]  }
 0x102   : > { %2400 = vmatprep.subr.bf16.mxu1 %v9538_v1  ;;  %2359 = vmatprep.subr.bf16.mxu0 %v8586_v11  ;;  %v8656_v11 = vld [vmem:[%s12919_s2 + $0x754] ss:$12 sps:$4 sm:$0xff]  }
 0x103   : > { %7404 = vmatprep.mubr.msk.bf16.mxu1 %vm730_vm0, %v7366_v13  ;;  %7403 = vmatprep.mubr.msk.bf16.mxu0 %vm730_vm0, %v7366_v13  ;;  %v8657_v13 = vld [vmem:[%s12919_s2 + $0x758] ss:$12 sps:$4 sm:$0xff]  }
 0x105   : > { %2401 = vmatpush1.bf16.msra.mxu1 %v8587_v12  ;;  %2360 = vmatpush1.bf16.msra.mxu0 %v8584_v14 }
 0x106   : > { %2402 = vmatprep.subr.bf16.mxu1 %v9538_v1  ;;  %2361 = vmatprep.subr.bf16.mxu0 %v8590_v15 }
 0x109   : > { %2403 = vmatpush1.bf16.msra.mxu1 %v8591_v16  ;;  %2362 = vmatpush1.bf16.msra.mxu0 %v8588_v17  ;;  %v8654_v16 = vld [vmem:[%s12919_s2 + $0x750] ss:$12 sps:$4 sm:$0xff]  }
 0x10a   : > { %2404 = vmatprep.subr.bf16.mxu1 %v9538_v1  ;;  %2363 = vmatprep.subr.bf16.mxu0 %v8594_v18 }
 0x10d   : > { %2405 = vmatpush1.bf16.msra.mxu1 %v8595_v19  ;;  %2364 = vmatpush1.bf16.msra.mxu0 %v8592_v20  ;;  %v8660_v19 = vld [vmem:[%s12919_s2 + $0x76c] ss:$12 sps:$4 sm:$0xff]  }
 0x10e   : > { %2406 = vmatprep.subr.bf16.mxu1 %v9538_v1  ;;  %2365 = vmatprep.subr.bf16.mxu0 %v8598_v21 }
 0x111   : > { %2407 = vmatpush1.bf16.msra.mxu1 %v8599_v23  ;;  %2366 = vmatpush1.bf16.msra.mxu0 %v8596_v22 }
 0x112   : > { %2408 = vmatprep.subr.bf16.mxu1 %v9538_v1  ;;  %2367 = vmatprep.subr.bf16.mxu0 %v8602_v24 }
 0x113   : > { %v10374_v28 = vpop.f32.mrb[0].mxu1  ;;  %v10382_v32 = vpop.f32.mrb[0].mxu0 }
 0x114   : > { %v811_v30 = vpop.f32.mrb[1].mxu1  ;;  %v10387_v35 = vpop.f32.mrb[1].mxu0 }
 0x115   : > { %v812_v33 = vpop.f32.mrb[2].mxu1  ;;  %2409 = vmatpush1.bf16.msra.mxu1 %v8603_v25  ;;  %2368 = vmatpush1.bf16.msra.mxu0 %v8600_v26  ;;  %v772_v37 = vpop.f32.mrb[2].mxu0  ;;  %v8661_v25 = vld [vmem:[%s12919_s2 + $0x770] ss:$12 sps:$4 sm:$0xff]   ;;  %v8662_v30 = vld [vmem:[%s12919_s2 + $0x780] ss:$12 sps:$4 sm:$0xff]  }
 0x116   : > { %v813_v36 = vpop.f32.mrb[3].mxu1  ;;  %2410 = vmatprep.subr.bf16.mxu1 %v9538_v1  ;;  %2369 = vmatprep.subr.bf16.mxu0 %v8606_v27  ;;  %v773_v39 = vpop.f32.mrb[3].mxu0  ;;  %v8658_v27 = vld [vmem:[%s12919_s2 + $0x768] ss:$12 sps:$4 sm:$0xff]   ;;  %v8666_v33 = vld [vmem:[%s12919_s2 + $0x798] ss:$12 sps:$4 sm:$0xff]  }
 0x117   : > { %v8670_v36 = vld [vmem:[%s12919_s2 + $0x7b0] ss:$12 sps:$4 sm:$0xff]   ;;  %v8676_v37 = vld [vmem:[%s12919_s2 + $0x7cc] ss:$12 sps:$4 sm:$0xff]   ;;  %v8674_v39 = vld [vmem:[%s12919_s2 + $0x7c8] ss:$12 sps:$4 sm:$0xff]  }
 0x119   : > { %2411 = vmatpush1.bf16.msra.mxu1 %v8607_v29  ;;  %2370 = vmatpush1.bf16.msra.mxu0 %v8604_v31  ;;  %v8665_v29 = vld [vmem:[%s12919_s2 + $0x788] ss:$12 sps:$4 sm:$0xff]  }
 0x11a   : > { %2412 = vmatprep.subr.bf16.mxu1 %v9538_v1  ;;  %2371 = vmatprep.subr.bf16.mxu0 %v8610_v34  ;;  %v8668_v31 = vld [vmem:[%s12919_s2 + $0x79c] ss:$12 sps:$4 sm:$0xff]   ;;  %v8672_v34 = vld [vmem:[%s12919_s2 + $0x7b4] ss:$12 sps:$4 sm:$0xff]  }
 0x11d   : > { %2413 = vmatpush1.bf16.msra.mxu1 %v8611_v38  ;;  %2372 = vmatpush1.bf16.msra.mxu0 %v8608_v40  ;;  %v8677_v38 = vld [vmem:[%s12919_s2 + $0x7d0] ss:$12 sps:$4 sm:$0xff]  }
 0x11e   : > { %2414 = vmatprep.subr.bf16.mxu1 %v9538_v1  ;;  %2373 = vmatprep.subr.bf16.mxu0 %v8614_v41  ;;  %v8682_v40 = vld [vmem:[%s12919_s2 + $0x7e4] ss:$12 sps:$4 sm:$0xff]   ;;  %v10579_v41 = vld [vmem:[%s9736_s23 + $0x38] sm:$0x77]  ;;  %s419_s23 = sand.u32 1, %s9528_s22  }
 0x11f   : > { %s420_s15 = scalar_lea.vmem [#allocation2], %s419_s23  ;;  %s6833_s18 = scalar_lea.sflag [#allocation3], %s419_s23 }
 0x120   : > { %s6845_s16 = sshll.u32 %s420_s15, 4  ;;  %s12877_s16 = int_to_ptr.vmem [resolvable:$true] %s6845_s16 }
 0x121   : > { %2415 = vmatpush1.bf16.msra.mxu1 %v8615_v42  ;;  %2374 = vmatpush1.bf16.msra.mxu0 %v8612_v43  ;;  %v8683_v42 = vld [vmem:[%s12919_s2 + $0x7e8] ss:$12 sps:$4 sm:$0xff]   ;;  %v7454_v43 = vcombine.low %v10441_v54, %v10441_v54  ;;  %s9474_s26 = scalar_lea.vmem %s12877_s16, 16  ;;  %p9481_p0 = scmp.lt.s32.totalorder %s12877_s16, %s9479_s28 }
 0x122   : > { %2416 = vmatprep.subr.bf16.mxu1 %v9538_v1  ;;  %2375 = vmatprep.subr.bf16.mxu0 %v8618_v44  ;;  %v8680_v44 = vld [vmem:[%s12919_s2 + $0x7e0] ss:$12 sps:$4 sm:$0xff]   ;;  %v8692_v54 = vld [vmem:[%s12919_s2 + $0x828] ss:$12 sps:$4 sm:$0xff]   ;;  %p9475_p11 = scmp.ne.s32.totalorder %s12877_s16, %s9474_s26  ;;  %p9482_p1 = scmp.lt.s32.totalorder %s9480_s29, %s9474_s26 }
 0x124   : > { %p9476_p12 = pnand %p9475_p11, %p9643_p5  ;;  %p9483_p2 = por %p9482_p1, %p9481_p0 }
 0x125   : > { %2417 = vmatpush1.bf16.msra.mxu1 %v8619_v45  ;;  %2376 = vmatpush1.bf16.msra.mxu0 %v8616_v46  ;;  %v8686_v45 = vld [vmem:[%s12919_s2 + $0x7fc] ss:$12 sps:$4 sm:$0xff]   ;;  %v8687_v46 = vld [vmem:[%s12919_s2 + $0x800] ss:$12 sps:$4 sm:$0xff]  }
 0x126   : > { %2418 = vmatprep.subr.bf16.mxu1 %v9538_v1  ;;  %2377 = vmatprep.subr.bf16.mxu0 %v8622_v47  ;;  %v7544_v47 = vcombine.high %v10579_v41, %v10579_v41  ;;  %p9477_p13 = pneg %p9476_p12 }
 0x128   : > { %p9484_p3 = pnand %p9483_p2, %p9477_p13 }
 0x129   : > { %2419 = vmatpush1.bf16.msra.mxu1 %v8623_v48  ;;  %2378 = vmatpush1.bf16.msra.mxu0 %v8620_v49  ;;  %v8684_v48 = vld [vmem:[%s12919_s2 + $0x7f8] ss:$12 sps:$4 sm:$0xff]   ;;  %v8690_v49 = vld [vmem:[%s12919_s2 + $0x814] ss:$12 sps:$4 sm:$0xff]  }
 0x12a   : > { %2420 = vmatprep.subr.bf16.mxu1 %v9538_v1  ;;  %2379 = vmatprep.subr.bf16.mxu0 %v8626_v50  ;;  %v8691_v50 = vld [vmem:[%s12919_s2 + $0x818] ss:$12 sps:$4 sm:$0xff]  }
 0x12d   : > { %2421 = vmatpush1.bf16.msra.mxu1 %v8627_v51  ;;  %2380 = vmatpush1.bf16.msra.mxu0 %v8624_v52  ;;  %v8688_v51 = vld [vmem:[%s12919_s2 + $0x810] ss:$12 sps:$4 sm:$0xff]   ;;  %v8694_v52 = vld [vmem:[%s12919_s2 + $0x82c] ss:$12 sps:$4 sm:$0xff]  }
 0x12e   : > { %2734 = vmatprep.subr.bf16.mxu1 %v9538_v1  ;;  %2693 = vmatprep.subr.bf16.mxu0 %v8632_v53  ;;  %v8695_v53 = vld [vmem:[%s12919_s2 + $0x830] ss:$12 sps:$4 sm:$0xff]  }
 0x130   : > { %2431 = vmatmul.mubr.bf16.vlgmr.msra.gmra.mrb[20].mxu1 %v7365_v56  ;;  %2390 = vmatmul.mubr.bf16.vlgmr.msra.gmra.mrb[20].mxu0 %v7365_v56  ;;  %v8696_v56 = vld [vmem:[%s12919_s2 + $0x840] ss:$12 sps:$4 sm:$0xff]  }
 0x131   : > { %2735 = vmatpush1.bf16.msra.mxu1 %v8633_v55  ;;  %2694 = vmatpush1.bf16.msra.mxu0 %v8630_v57  ;;  %v8698_v55 = vld [vmem:[%s12919_s2 + $0x844] ss:$12 sps:$4 sm:$0xff]   ;;  %v8699_v57 = vld [vmem:[%s12919_s2 + $0x848] ss:$12 sps:$4 sm:$0xff]  }
 0x132   : > { %2736 = vmatprep.subr.bf16.mxu1 %v9538_v1  ;;  %2695 = vmatprep.subr.bf16.mxu0 %v8636_v58  ;;  %v8702_v58 = vld [vmem:[%s12919_s2 + $0x85c] ss:$12 sps:$4 sm:$0xff]  }
 0x133   : > { %7493 = vmatprep.mubr.msk.bf16.mxu1 %vm730_vm0, %v7455_v60  ;;  %7492 = vmatprep.mubr.msk.bf16.mxu0 %vm730_vm0, %v7455_v60  ;;  %v8700_v60 = vld [vmem:[%s12919_s2 + $0x858] ss:$12 sps:$4 sm:$0xff]  }
 0x135   : > { %2737 = vmatpush1.bf16.msra.mxu1 %v8637_v59  ;;  %2696 = vmatpush1.bf16.msra.mxu0 %v8634_v61  ;;  %v8703_v59 = vld [vmem:[%s12919_s2 + $0x860] ss:$12 sps:$4 sm:$0xff]  }
 0x136   : > { %2738 = vmatprep.subr.bf16.mxu1 %v9538_v1  ;;  %2697 = vmatprep.subr.bf16.mxu0 %v8640_v62  ;;  %v8706_v61 = vld [vmem:[%s12919_s2 + $0x874] ss:$12 sps:$4 sm:$0xff]  }
 0x139   : > { %2739 = vmatpush1.bf16.msra.mxu1 %v8641_v63  ;;  %2698 = vmatpush1.bf16.msra.mxu0 %v8638_v0  ;;  %v8707_v63 = vld [vmem:[%s12919_s2 + $0x878] ss:$12 sps:$4 sm:$0xff]  }
 0x13a   : > { %2740 = vmatprep.subr.bf16.mxu1 %v9538_v1  ;;  %2699 = vmatprep.subr.bf16.mxu0 %v8644_v2 }
 0x13d   : > { %2741 = vmatpush1.bf16.msra.mxu1 %v8645_v3  ;;  %2700 = vmatpush1.bf16.msra.mxu0 %v8642_v4  ;;  %v8704_v4 = vld [vmem:[%s12919_s2 + $0x870] ss:$12 sps:$4 sm:$0xff]  }
 0x13e   : > { %2742 = vmatprep.subr.bf16.mxu1 %v9538_v1  ;;  %2701 = vmatprep.subr.bf16.mxu0 %v8648_v5 }
 0x141   : > { %2743 = vmatpush1.bf16.msra.mxu1 %v8649_v7  ;;  %2702 = vmatpush1.bf16.msra.mxu0 %v8646_v6 }
 0x142   : > { %2744 = vmatprep.subr.bf16.mxu1 %v9538_v1  ;;  %2703 = vmatprep.subr.bf16.mxu0 %v8652_v8  ;;  %v8710_v8 = vld [vmem:[%s12919_s2 + $0x88c] ss:$12 sps:$4 sm:$0xff]  }
 0x143   : > { %v1091_v12 = vpop.f32.mrb[4].mxu1  ;;  %v1050_v17 = vpop.f32.mrb[4].mxu0 }
 0x144   : > { %v10513_v14 = vadd.f32 %v1091_v12, %v10374_v28  ;;  %v1093_v15 = vpop.f32.mrb[5].mxu1  ;;  %v10522_v20 = vadd.f32 %v1050_v17, %v10382_v32  ;;  %v1052_v21 = vpop.f32.mrb[5].mxu0  ;;  %v8664_v28 = vld [vmem:[%s12919_s2 + $0x784] ss:$12 sps:$4 sm:$0xff]   ;;  %v8669_v32 = vld [vmem:[%s12919_s2 + $0x7a0] ss:$12 sps:$4 sm:$0xff]  }
 0x145   : > { %v1094_v18 = vpop.f32.mrb[6].mxu1  ;;  %2745 = vmatpush1.bf16.msra.mxu1 %v8653_v9  ;;  %2704 = vmatpush1.bf16.msra.mxu0 %v8650_v10  ;;  %v10526_v23 = vadd.f32 %v1052_v21, %v10387_v35  ;;  %v1054_v24 = vpop.f32.mrb[6].mxu0  ;;  %v8673_v35 = vld [vmem:[%s12919_s2 + $0x7b8] ss:$12 sps:$4 sm:$0xff]   ;;  %v8712_v17 = vld [vmem:[%s12919_s2 + $0x8a0] ss:$12 sps:$4 sm:$0xff]  }
 0x146   : > { %v1095_v22 = vpop.f32.mrb[7].mxu1  ;;  %2746 = vmatprep.subr.bf16.mxu1 %v9538_v1  ;;  %2705 = vmatprep.subr.bf16.mxu0 %v8656_v11  ;;  %v1055_v26 = vpop.f32.mrb[7].mxu0  ;;  %v8714_v15 = vld [vmem:[%s12919_s2 + $0x8a4] ss:$12 sps:$4 sm:$0xff]   ;;  %v8718_v18 = vld [vmem:[%s12919_s2 + $0x8bc] ss:$12 sps:$4 sm:$0xff]  }
 0x147   : > { %v8722_v21 = vld [vmem:[%s12919_s2 + $0x8d4] ss:$12 sps:$4 sm:$0xff]   ;;  %v8723_v22 = vld [vmem:[%s12919_s2 + $0x8d8] ss:$12 sps:$4 sm:$0xff]  }
 0x148   : > { %v8726_v24 = vld [vmem:[%s12919_s2 + $0x8ec] ss:$12 sps:$4 sm:$0xff]   ;;  %v8724_v26 = vld [vmem:[%s12919_s2 + $0x8e8] ss:$12 sps:$4 sm:$0xff]  }
 0x149   : > { %2747 = vmatpush1.bf16.msra.mxu1 %v8657_v13  ;;  %2706 = vmatpush1.bf16.msra.mxu0 %v8654_v16  ;;  %v8711_v13 = vld [vmem:[%s12919_s2 + $0x890] ss:$12 sps:$4 sm:$0xff]   ;;  %v8715_v16 = vld [vmem:[%s12919_s2 + $0x8a8] ss:$12 sps:$4 sm:$0xff]  }
 0x14a   : > { %2748 = vmatprep.subr.bf16.mxu1 %v9538_v1  ;;  %2707 = vmatprep.subr.bf16.mxu0 %v8660_v19  ;;  %v8719_v19 = vld [vmem:[%s12919_s2 + $0x8c0] ss:$12 sps:$4 sm:$0xff]  }
 0x14d   : > { %2749 = vmatpush1.bf16.msra.mxu1 %v8661_v25  ;;  %2708 = vmatpush1.bf16.msra.mxu0 %v8658_v27  ;;  %v8727_v25 = vld [vmem:[%s12919_s2 + $0x8f0] ss:$12 sps:$4 sm:$0xff]   ;;  %v7543_v27 = vcombine.low %v10579_v41, %v10579_v41  ;;  %v9197_v41 = vld [vmem:[%s12919_s2 + $0x168] ss:$12 sps:$4 sm:$0xff]  }
 0x14e   : > { %2750 = vmatprep.subr.bf16.mxu1 %v9538_v1  ;;  %2709 = vmatprep.subr.bf16.mxu0 %v8664_v28  ;;  %v10723_v28 = vld [vmem:[%s10711_s19 + $0x8] sm:$0x77] }
 0x151   : > { %2751 = vmatpush1.bf16.msra.mxu1 %v8665_v29  ;;  %2710 = vmatpush1.bf16.msra.mxu0 %v8662_v30  ;;  %v9186_v29 = vld [vmem:[%s12919_s2 + $0x124] ss:$12 sps:$4 sm:$0xff]   ;;  %v7585_v30 = vcombine.high %v10723_v28, %v10723_v28 }
 0x152   : > { %2752 = vmatprep.subr.bf16.mxu1 %v9538_v1  ;;  %2711 = vmatprep.subr.bf16.mxu0 %v8668_v31  ;;  %v9187_v31 = vld [vmem:[%s12919_s2 + $0x128] ss:$12 sps:$4 sm:$0xff]  }
 0x155   : > { %2753 = vmatpush1.bf16.msra.mxu1 %v8669_v32  ;;  %2712 = vmatpush1.bf16.msra.mxu0 %v8666_v33  ;;  %v9188_v32 = vld [vmem:[%s12919_s2 + $0x120] ss:$12 sps:$4 sm:$0xff]   ;;  %v9189_v33 = vld [vmem:[%s12919_s2 + $0x13c] ss:$12 sps:$4 sm:$0xff]  }
 0x156   : > { %2754 = vmatprep.subr.bf16.mxu1 %v9538_v1  ;;  %2713 = vmatprep.subr.bf16.mxu0 %v8672_v34  ;;  %v9190_v34 = vld [vmem:[%s12919_s2 + $0x140] ss:$12 sps:$4 sm:$0xff]  }
 0x159   : > { %2755 = vmatpush1.bf16.msra.mxu1 %v8673_v35  ;;  %2714 = vmatpush1.bf16.msra.mxu0 %v8670_v36  ;;  %v9191_v35 = vld [vmem:[%s12919_s2 + $0x138] ss:$12 sps:$4 sm:$0xff]   ;;  %v9192_v36 = vld [vmem:[%s12919_s2 + $0x154] ss:$12 sps:$4 sm:$0xff]  }
 0x15a   : > { %2756 = vmatprep.subr.bf16.mxu1 %v9538_v1  ;;  %2715 = vmatprep.subr.bf16.mxu0 %v8676_v37  ;;  %v9193_v37 = vld [vmem:[%s12919_s2 + $0x158] ss:$12 sps:$4 sm:$0xff]  }
 0x15d   : > { %2757 = vmatpush1.bf16.msra.mxu1 %v8677_v38  ;;  %2716 = vmatpush1.bf16.msra.mxu0 %v8674_v39  ;;  %v9194_v38 = vld [vmem:[%s12919_s2 + $0x150] ss:$12 sps:$4 sm:$0xff]   ;;  %v9195_v39 = vld [vmem:[%s12919_s2 + $0x16c] ss:$12 sps:$4 sm:$0xff]  }
 0x15e   : > { %3070 = vmatprep.subr.bf16.mxu1 %v9538_v1  ;;  %3029 = vmatprep.subr.bf16.mxu0 %v8682_v40  ;;  %v9196_v40 = vld [vmem:[%s12919_s2 + $0x170] ss:$12 sps:$4 sm:$0xff]  }
 0x160   : > { %2767 = vmatmul.mubr.bf16.vlgmr.msra.gmra.mrb[24].mxu1 %v7454_v43  ;;  %2726 = vmatmul.mubr.bf16.vlgmr.msra.gmra.mrb[24].mxu0 %v7454_v43  ;;  %v9199_v43 = vld [vmem:[%s12919_s2 + $0x188] ss:$12 sps:$4 sm:$0xff]  }
 0x161   : > { %3071 = vmatpush1.bf16.msra.mxu1 %v8683_v42  ;;  %3030 = vmatpush1.bf16.msra.mxu0 %v8680_v44  ;;  %v9198_v42 = vld [vmem:[%s12919_s2 + $0x184] ss:$12 sps:$4 sm:$0xff]   ;;  %v9200_v44 = vld [vmem:[%s12919_s2 + $0x180] ss:$12 sps:$4 sm:$0xff]  }
 0x162   : > { %3072 = vmatprep.subr.bf16.mxu1 %v9538_v1  ;;  %3031 = vmatprep.subr.bf16.mxu0 %v8686_v45 }
 0x163   : > { %7582 = vmatprep.mubr.msk.bf16.mxu1 %vm730_vm0, %v7544_v47  ;;  %7581 = vmatprep.mubr.msk.bf16.mxu0 %vm730_vm0, %v7544_v47 }
 0x165   : > { %3073 = vmatpush1.bf16.msra.mxu1 %v8687_v46  ;;  %3032 = vmatpush1.bf16.msra.mxu0 %v8684_v48  ;;  %v9201_v46 = vld [vmem:[%s12919_s2 + $0x19c] ss:$12 sps:$4 sm:$0xff]  }
 0x166   : > { %3074 = vmatprep.subr.bf16.mxu1 %v9538_v1  ;;  %3033 = vmatprep.subr.bf16.mxu0 %v8690_v49 }
 0x169   : > { %3075 = vmatpush1.bf16.msra.mxu1 %v8691_v50  ;;  %3034 = vmatpush1.bf16.msra.mxu0 %v8688_v51 }
 0x16a   : > { %3076 = vmatprep.subr.bf16.mxu1 %v9538_v1  ;;  %3035 = vmatprep.subr.bf16.mxu0 %v8694_v52 }
 0x16d   : > { %3077 = vmatpush1.bf16.msra.mxu1 %v8695_v53  ;;  %3036 = vmatpush1.bf16.msra.mxu0 %v8692_v54  ;;  %v9202_v53 = vld [vmem:[%s12919_s2 + $0x1a0] ss:$12 sps:$4 sm:$0xff]  }
 0x16e   : > { %3078 = vmatprep.subr.bf16.mxu1 %v9538_v1  ;;  %3037 = vmatprep.subr.bf16.mxu0 %v8698_v55 }
 0x171   : > { %3079 = vmatpush1.bf16.msra.mxu1 %v8699_v57  ;;  %3038 = vmatpush1.bf16.msra.mxu0 %v8696_v56  ;;  %v9203_v56 = vld [vmem:[%s12919_s2 + $0x198] ss:$12 sps:$4 sm:$0xff]  }
 0x172   : > { %3080 = vmatprep.subr.bf16.mxu1 %v9538_v1  ;;  %3039 = vmatprep.subr.bf16.mxu0 %v8702_v58  ;;  %v9204_v58 = vld [vmem:[%s12919_s2 + $0x1b4] ss:$12 sps:$4 sm:$0xff]  }
 0x173   : > { %v1424_v62 = vpop.f32.mrb[8].mxu1  ;;  %v1383_v2 = vpop.f32.mrb[8].mxu0 }
 0x174   : > { %v10651_v0 = vadd.f32 %v1424_v62, %v10513_v14  ;;  %v1426_v3 = vpop.f32.mrb[9].mxu1  ;;  %v10657_v5 = vadd.f32 %v1383_v2, %v10522_v20  ;;  %v1385_v6 = vpop.f32.mrb[9].mxu0  ;;  %v8708_v14 = vld [vmem:[%s12919_s2 + $0x888] ss:$12 sps:$4 sm:$0xff]   ;;  %v8716_v20 = vld [vmem:[%s12919_s2 + $0x8b8] ss:$12 sps:$4 sm:$0xff]  }
 0x175   : > { %v1427_v7 = vpop.f32.mrb[10].mxu1  ;;  %3081 = vmatpush1.bf16.msra.mxu1 %v8703_v59  ;;  %v10663_v9 = vadd.f32 %v1385_v6, %v10526_v23  ;;  %3040 = vmatpush1.bf16.msra.mxu0 %v8700_v60  ;;  %v1387_v11 = vpop.f32.mrb[10].mxu0  ;;  %v8720_v23 = vld [vmem:[%s12919_s2 + $0x8d0] ss:$12 sps:$4 sm:$0xff]   ;;  %v9205_v60 = vld [vmem:[%s12919_s2 + $0x1b8] ss:$12 sps:$4 sm:$0xff]  }
 0x176   : > { %v1428_v10 = vpop.f32.mrb[11].mxu1  ;;  %3082 = vmatprep.subr.bf16.mxu1 %v9538_v1  ;;  %3041 = vmatprep.subr.bf16.mxu0 %v8706_v61  ;;  %v1388_v12 = vpop.f32.mrb[11].mxu0  ;;  %v9206_v61 = vld [vmem:[%s12919_s2 + $0x1b0] ss:$12 sps:$4 sm:$0xff]   ;;  %v9207_v62 = vld [vmem:[%s12919_s2 + $0x1cc] ss:$12 sps:$4 sm:$0xff]  }
 0x177   : > { %v9210_v2 = vld [vmem:[%s12919_s2 + $0x1e4] ss:$12 sps:$4 sm:$0xff]   ;;  %v9211_v3 = vld [vmem:[%s12919_s2 + $0x1e8] ss:$12 sps:$4 sm:$0xff]   ;;  %v9214_v6 = vld [vmem:[%s12919_s2 + $0x200] ss:$12 sps:$4 sm:$0xff]   ;;  %v7584_v12 = vcombine.low %v10723_v28, %v10723_v28 }
 0x178   : > { %v9215_v7 = vld [vmem:[%s12919_s2 + $0x1f8] ss:$12 sps:$4 sm:$0xff]   ;;  %v9218_v10 = vld [vmem:[%s12919_s2 + $0x210] ss:$12 sps:$4 sm:$0xff]   ;;  %v9233_v28 = vld [vmem:[%s12919_s2 + $0x48] ss:$12 sps:$4 sm:$0xff]  }
 0x179   : > { %3083 = vmatpush1.bf16.msra.mxu1 %v8707_v63  ;;  %3042 = vmatpush1.bf16.msra.mxu0 %v8704_v4  ;;  %v9208_v63 = vld [vmem:[%s12919_s2 + $0x1d0] ss:$12 sps:$4 sm:$0xff]   ;;  %v9212_v4 = vld [vmem:[%s12919_s2 + $0x1e0] ss:$12 sps:$4 sm:$0xff]  }
 0x17a   : > { %3084 = vmatprep.subr.bf16.mxu1 %v9538_v1  ;;  %3043 = vmatprep.subr.bf16.mxu0 %v8710_v8  ;;  %v9216_v8 = vld [vmem:[%s12919_s2 + $0x214] ss:$12 sps:$4 sm:$0xff]   ;;  %v9219_v11 = vld [vmem:[%s12919_s2 + $0x22c] ss:$12 sps:$4 sm:$0xff]  }
 0x17d   : > { %3085 = vmatpush1.bf16.msra.mxu1 %v8711_v13  ;;  %3044 = vmatpush1.bf16.msra.mxu0 %v8708_v14  ;;  %v10855_v13 = vld [vmem:[%s10711_s19] sm:$0x77]  ;;  %v9220_v14 = vld [vmem:[%s12919_s2 + $0x230] ss:$12 sps:$4 sm:$0xff]  }
 0x17e   : > { %3086 = vmatprep.subr.bf16.mxu1 %v9538_v1  ;;  %3045 = vmatprep.subr.bf16.mxu0 %v8714_v15  ;;  %v9221_v15 = vld [vmem:[%s12919_s2 + $0x228] ss:$12 sps:$4 sm:$0xff]  }
 0x181   : > { %3087 = vmatpush1.bf16.msra.mxu1 %v8715_v16  ;;  %3046 = vmatpush1.bf16.msra.mxu0 %v8712_v17  ;;  %v9222_v16 = vld [vmem:[%s12919_s2 + $0x4] ss:$12 sps:$4 sm:$0xff]   ;;  %v7589_v17 = vcombine.high %v10855_v13, %v10855_v13 }
 0x182   : > { %3088 = vmatprep.subr.bf16.mxu1 %v9538_v1  ;;  %3047 = vmatprep.subr.bf16.mxu0 %v8718_v18  ;;  %v9223_v18 = vld [vmem:[%s12919_s2 + $0x8] ss:$12 sps:$4 sm:$0xff]  }
 0x185   : > { %3089 = vmatpush1.bf16.msra.mxu1 %v8719_v19  ;;  %3048 = vmatpush1.bf16.msra.mxu0 %v8716_v20  ;;  %v9224_v19 = vld [vmem:[%s12919_s2] ss:$12 sps:$4 sm:$0xff]   ;;  %v9225_v20 = vld [vmem:[%s12919_s2 + $0x1c] ss:$12 sps:$4 sm:$0xff]  }
 0x186   : > { %3090 = vmatprep.subr.bf16.mxu1 %v9538_v1  ;;  %3049 = vmatprep.subr.bf16.mxu0 %v8722_v21  ;;  %v9226_v21 = vld [vmem:[%s12919_s2 + $0x20] ss:$12 sps:$4 sm:$0xff]  }
 0x189   : > { %3091 = vmatpush1.bf16.msra.mxu1 %v8723_v22  ;;  %3050 = vmatpush1.bf16.msra.mxu0 %v8720_v23  ;;  %v9227_v22 = vld [vmem:[%s12919_s2 + $0x18] ss:$12 sps:$4 sm:$0xff]   ;;  %v9228_v23 = vld [vmem:[%s12919_s2 + $0x34] ss:$12 sps:$4 sm:$0xff]  }
 0x18a   : > { %3092 = vmatprep.subr.bf16.mxu1 %v9538_v1  ;;  %3051 = vmatprep.subr.bf16.mxu0 %v8726_v24  ;;  %v9229_v24 = vld [vmem:[%s12919_s2 + $0x38] ss:$12 sps:$4 sm:$0xff]  }
 0x18d   : > { %3093 = vmatpush1.bf16.msra.mxu1 %v8727_v25  ;;  %3052 = vmatpush1.bf16.msra.mxu0 %v8724_v26  ;;  %v9230_v25 = vld [vmem:[%s12919_s2 + $0x30] ss:$12 sps:$4 sm:$0xff]   ;;  %v9231_v26 = vld [vmem:[%s12919_s2 + $0x4c] ss:$12 sps:$4 sm:$0xff]  }
 0x18e   : > { %3189 = vmatprep.subr.bf16.mxu1 %v9538_v1  ;;  %3148 = vmatprep.subr.bf16.mxu0 %v9186_v29  ;;  %v9234_v29 = vld [vmem:[%s12919_s2 + $0x64] ss:$12 sps:$4 sm:$0xff]  }
 0x190   : > { %3103 = vmatmul.mubr.bf16.vlgmr.msra.gmra.mrb[28].mxu1 %v7543_v27  ;;  %3062 = vmatmul.mubr.bf16.vlgmr.msra.gmra.mrb[28].mxu0 %v7543_v27  ;;  %v9232_v27 = vld [vmem:[%s12919_s2 + $0x50] ss:$12 sps:$4 sm:$0xff]  }
 0x191   : > { %3190 = vmatpush1.bf16.msra.mxu1 %v9187_v31  ;;  %3149 = vmatpush1.bf16.msra.mxu0 %v9188_v32  ;;  %v9236_v31 = vld [vmem:[%s12919_s2 + $0x60] ss:$12 sps:$4 sm:$0xff]  }
 0x192   : > { %3191 = vmatprep.subr.bf16.mxu1 %v9538_v1  ;;  %3150 = vmatprep.subr.bf16.mxu0 %v9189_v33  ;;  %v9237_v33 = vld [vmem:[%s12919_s2 + $0x7c] ss:$12 sps:$4 sm:$0xff]  }
 0x193   : > { %7587 = vmatprep.mubr.msk.bf16.mxu1 %vm730_vm0, %v7585_v30  ;;  %7586 = vmatprep.mubr.msk.bf16.mxu0 %vm730_vm0, %v7585_v30  ;;  %v9235_v30 = vld [vmem:[%s12919_s2 + $0x68] ss:$12 sps:$4 sm:$0xff]  }
 0x195   : > { %3192 = vmatpush1.bf16.msra.mxu1 %v9190_v34  ;;  %3151 = vmatpush1.bf16.msra.mxu0 %v9191_v35 }
 0x196   : > { %3193 = vmatprep.subr.bf16.mxu1 %v9538_v1  ;;  %3152 = vmatprep.subr.bf16.mxu0 %v9192_v36 }
 0x199   : > { %3194 = vmatpush1.bf16.msra.mxu1 %v9193_v37  ;;  %3153 = vmatpush1.bf16.msra.mxu0 %v9194_v38 }
 0x19a   : > { %3195 = vmatprep.subr.bf16.mxu1 %v9538_v1  ;;  %3154 = vmatprep.subr.bf16.mxu0 %v9195_v39 }
 0x19d   : > { %3196 = vmatpush1.bf16.msra.mxu1 %v9196_v40  ;;  %3155 = vmatpush1.bf16.msra.mxu0 %v9197_v41  ;;  %v9238_v40 = vld [vmem:[%s12919_s2 + $0x80] ss:$12 sps:$4 sm:$0xff]  }
 0x19e   : > { %3197 = vmatprep.subr.bf16.mxu1 %v9538_v1  ;;  %3156 = vmatprep.subr.bf16.mxu0 %v9198_v42 }
 0x1a1   : > { %3198 = vmatpush1.bf16.msra.mxu1 %v9199_v43  ;;  %3157 = vmatpush1.bf16.msra.mxu0 %v9200_v44  ;;  %v9239_v43 = vld [vmem:[%s12919_s2 + $0x78] ss:$12 sps:$4 sm:$0xff]  }
 0x1a2   : > { %3199 = vmatprep.subr.bf16.mxu1 %v9538_v1  ;;  %3158 = vmatprep.subr.bf16.mxu0 %v9201_v46 }
 0x1a3   : > { %v1760_v45 = vpop.f32.mrb[12].mxu1  ;;  %v1719_v48 = vpop.f32.mrb[12].mxu0 }
 0x1a4   : > { %v10784_v47 = vadd.f32 %v1760_v45, %v10651_v0  ;;  %v1762_v49 = vpop.f32.mrb[13].mxu1  ;;  %v10787_v50 = vadd.f32 %v1719_v48, %v10657_v5  ;;  %v1721_v51 = vpop.f32.mrb[13].mxu0  ;;  %v9209_v0 = vld [vmem:[%s12919_s2 + $0x1c8] ss:$12 sps:$4 sm:$0xff]   ;;  %v9242_v48 = vld [vmem:[%s12919_s2 + $0x90] ss:$12 sps:$4 sm:$0xff]  }
 0x1a5   : > { %v1763_v52 = vpop.f32.mrb[14].mxu1  ;;  %3200 = vmatpush1.bf16.msra.mxu1 %v9202_v53  ;;  %v10793_v54 = vadd.f32 %v1721_v51, %v10663_v9  ;;  %3159 = vmatpush1.bf16.msra.mxu0 %v9203_v56  ;;  %v1723_v57 = vpop.f32.mrb[14].mxu0  ;;  %v9213_v5 = vld [vmem:[%s12919_s2 + $0x1fc] ss:$12 sps:$4 sm:$0xff]   ;;  %v9217_v9 = vld [vmem:[%s12919_s2 + $0x218] ss:$12 sps:$4 sm:$0xff]  }
 0x1a6   : > { %v1764_v55 = vpop.f32.mrb[15].mxu1  ;;  %3201 = vmatprep.subr.bf16.mxu1 %v9538_v1  ;;  %3160 = vmatprep.subr.bf16.mxu0 %v9204_v58  ;;  %v1724_v59 = vpop.f32.mrb[15].mxu0  ;;  %v9240_v45 = vld [vmem:[%s12919_s2 + $0x94] ss:$12 sps:$4 sm:$0xff]   ;;  %v9243_v49 = vld [vmem:[%s12919_s2 + $0xac] ss:$12 sps:$4 sm:$0xff]  }
 0x1a7   : > { %v9245_v51 = vld [vmem:[%s12919_s2 + $0xa8] ss:$12 sps:$4 sm:$0xff]   ;;  %v9246_v52 = vld [vmem:[%s12919_s2 + $0xc4] ss:$12 sps:$4 sm:$0xff]   ;;  %v9250_v56 = vld [vmem:[%s12919_s2 + $0xe0] ss:$12 sps:$4 sm:$0xff]  }
 0x1a8   : > { %v9247_v53 = vld [vmem:[%s12919_s2 + $0xc8] ss:$12 sps:$4 sm:$0xff]   ;;  %v9251_v57 = vld [vmem:[%s12919_s2 + $0xd8] ss:$12 sps:$4 sm:$0xff]  }
 0x1a9   : > { %3202 = vmatpush1.bf16.msra.mxu1 %v9205_v60  ;;  %3161 = vmatpush1.bf16.msra.mxu0 %v9206_v61  ;;  %v9249_v55 = vld [vmem:[%s12919_s2 + $0xdc] ss:$12 sps:$4 sm:$0xff]   ;;  %v9252_v58 = vld [vmem:[%s12919_s2 + $0xf4] ss:$12 sps:$4 sm:$0xff]   ;;  %v9253_v59 = vld [vmem:[%s12919_s2 + $0xf8] ss:$12 sps:$4 sm:$0xff]  }
 0x1aa   : > { %3203 = vmatprep.subr.bf16.mxu1 %v9538_v1  ;;  %3162 = vmatprep.subr.bf16.mxu0 %v9207_v62  ;;  %v9254_v60 = vld [vmem:[%s12919_s2 + $0xf0] ss:$12 sps:$4 sm:$0xff]   ;;  %v9255_v61 = vld [vmem:[%s12919_s2 + $0x10c] ss:$12 sps:$4 sm:$0xff]   ;;  %v7588_v62 = vcombine.low %v10855_v13, %v10855_v13 }
 0x1ab   : > { %v9267_v13 = vld [vmem:[%s12919_s2 + $0x28c] ss:$12 sps:$4 sm:$0xff]  }
 0x1ad   : > { %3204 = vmatpush1.bf16.msra.mxu1 %v9208_v63  ;;  %3163 = vmatpush1.bf16.msra.mxu0 %v9209_v0  ;;  %v10993_v63 = vld [vmem:[%s10711_s19 + $0x10] sm:$0x77] }
 0x1ae   : > { %3205 = vmatprep.subr.bf16.mxu1 %v9538_v1  ;;  %3164 = vmatprep.subr.bf16.mxu0 %v9210_v2  ;;  %v9256_v0 = vld [vmem:[%s12919_s2 + $0x110] ss:$12 sps:$4 sm:$0xff]   ;;  %v9257_v2 = vld [vmem:[%s12919_s2 + $0x108] ss:$12 sps:$4 sm:$0xff]  }
 0x1b1   : > { %3206 = vmatpush1.bf16.msra.mxu1 %v9211_v3  ;;  %3165 = vmatpush1.bf16.msra.mxu0 %v9212_v4  ;;  %v9258_v3 = vld [vmem:[%s12919_s2 + $0x244] ss:$12 sps:$4 sm:$0xff]   ;;  %v7594_v4 = vcombine.high %v10993_v63, %v10993_v63 }
 0x1b2   : > { %3207 = vmatprep.subr.bf16.mxu1 %v9538_v1  ;;  %3166 = vmatprep.subr.bf16.mxu0 %v9213_v5  ;;  %v9259_v5 = vld [vmem:[%s12919_s2 + $0x248] ss:$12 sps:$4 sm:$0xff]  }
 0x1b5   : > { %3208 = vmatpush1.bf16.msra.mxu1 %v9214_v6  ;;  %3167 = vmatpush1.bf16.msra.mxu0 %v9215_v7  ;;  %v9260_v6 = vld [vmem:[%s12919_s2 + $0x240] ss:$12 sps:$4 sm:$0xff]   ;;  %v9261_v7 = vld [vmem:[%s12919_s2 + $0x25c] ss:$12 sps:$4 sm:$0xff]  }
 0x1b6   : > { %3209 = vmatprep.subr.bf16.mxu1 %v9538_v1  ;;  %3168 = vmatprep.subr.bf16.mxu0 %v9216_v8  ;;  %v9262_v8 = vld [vmem:[%s12919_s2 + $0x260] ss:$12 sps:$4 sm:$0xff]  }
 0x1b9   : > { %3210 = vmatpush1.bf16.msra.mxu1 %v9217_v9  ;;  %3169 = vmatpush1.bf16.msra.mxu0 %v9218_v10  ;;  %v9263_v9 = vld [vmem:[%s12919_s2 + $0x258] ss:$12 sps:$4 sm:$0xff]   ;;  %v9264_v10 = vld [vmem:[%s12919_s2 + $0x274] ss:$12 sps:$4 sm:$0xff]  }
 0x1ba   : > { %3211 = vmatprep.subr.bf16.mxu1 %v9538_v1  ;;  %3170 = vmatprep.subr.bf16.mxu0 %v9219_v11  ;;  %v9265_v11 = vld [vmem:[%s12919_s2 + $0x278] ss:$12 sps:$4 sm:$0xff]  }
 0x1bd   : > { %3212 = vmatpush1.bf16.msra.mxu1 %v9220_v14  ;;  %3171 = vmatpush1.bf16.msra.mxu0 %v9221_v15  ;;  %v9268_v14 = vld [vmem:[%s12919_s2 + $0x290] ss:$12 sps:$4 sm:$0xff]   ;;  %v9269_v15 = vld [vmem:[%s12919_s2 + $0x288] ss:$12 sps:$4 sm:$0xff]  }
 0x1be   : > { %3279 = vmatprep.subr.bf16.mxu1 %v9538_v1  ;;  %3238 = vmatprep.subr.bf16.mxu0 %v9222_v16  ;;  %v9270_v16 = vld [vmem:[%s12919_s2 + $0x2a4] ss:$12 sps:$4 sm:$0xff]  }
 0x1c0   : > { %3222 = vmatmul.mubr.bf16.vlgmr.msra.gmra.mrb[32].mxu1 %v7584_v12  ;;  %3181 = vmatmul.mubr.bf16.vlgmr.msra.gmra.mrb[32].mxu0 %v7584_v12  ;;  %v9266_v12 = vld [vmem:[%s12919_s2 + $0x270] ss:$12 sps:$4 sm:$0xff]  }
 0x1c1   : > { %3280 = vmatpush1.bf16.msra.mxu1 %v9223_v18  ;;  %3239 = vmatpush1.bf16.msra.mxu0 %v9224_v19  ;;  %v9272_v18 = vld [vmem:[%s12919_s2 + $0x2a0] ss:$12 sps:$4 sm:$0xff]  }
 0x1c2   : > { %3281 = vmatprep.subr.bf16.mxu1 %v9538_v1  ;;  %3240 = vmatprep.subr.bf16.mxu0 %v9225_v20  ;;  %v9273_v20 = vld [vmem:[%s12919_s2 + $0x2bc] ss:$12 sps:$4 sm:$0xff]  }
 0x1c3   : > { %7591 = vmatprep.mubr.msk.bf16.mxu1 %vm730_vm0, %v7589_v17  ;;  %7590 = vmatprep.mubr.msk.bf16.mxu0 %vm730_vm0, %v7589_v17  ;;  %v9271_v17 = vld [vmem:[%s12919_s2 + $0x2a8] ss:$12 sps:$4 sm:$0xff]  }
 0x1c5   : > { %3282 = vmatpush1.bf16.msra.mxu1 %v9226_v21  ;;  %3241 = vmatpush1.bf16.msra.mxu0 %v9227_v22 }
 0x1c6   : > { %3283 = vmatprep.subr.bf16.mxu1 %v9538_v1  ;;  %3242 = vmatprep.subr.bf16.mxu0 %v9228_v23 }
 0x1c9   : > { %3284 = vmatpush1.bf16.msra.mxu1 %v9229_v24  ;;  %3243 = vmatpush1.bf16.msra.mxu0 %v9230_v25 }
 0x1ca   : > { %3285 = vmatprep.subr.bf16.mxu1 %v9538_v1  ;;  %3244 = vmatprep.subr.bf16.mxu0 %v9231_v26 }
 0x1cd   : > { %3286 = vmatpush1.bf16.msra.mxu1 %v9232_v27  ;;  %3245 = vmatpush1.bf16.msra.mxu0 %v9233_v28  ;;  %v9274_v27 = vld [vmem:[%s12919_s2 + $0x2c0] ss:$12 sps:$4 sm:$0xff]  }
 0x1ce   : > { %3287 = vmatprep.subr.bf16.mxu1 %v9538_v1  ;;  %3246 = vmatprep.subr.bf16.mxu0 %v9234_v29 }
 0x1d1   : > { %3288 = vmatpush1.bf16.msra.mxu1 %v9235_v30  ;;  %3247 = vmatpush1.bf16.msra.mxu0 %v9236_v31  ;;  %v9275_v30 = vld [vmem:[%s12919_s2 + $0x2b8] ss:$12 sps:$4 sm:$0xff]  }
 0x1d2   : > { %3289 = vmatprep.subr.bf16.mxu1 %v9538_v1  ;;  %3248 = vmatprep.subr.bf16.mxu0 %v9237_v33 }
 0x1d3   : > { %v2096_v32 = vpop.f32.mrb[16].mxu1  ;;  %v2055_v35 = vpop.f32.mrb[16].mxu0 }
 0x1d4   : > { %v10922_v34 = vadd.f32 %v2096_v32, %v10784_v47  ;;  %v2098_v36 = vpop.f32.mrb[17].mxu1  ;;  %v10925_v37 = vadd.f32 %v2055_v35, %v10787_v50  ;;  %v2057_v38 = vpop.f32.mrb[17].mxu0  ;;  %v9241_v47 = vld [vmem:[%s12919_s2 + $0x98] ss:$12 sps:$4 sm:$0xff]   ;;  %v9244_v50 = vld [vmem:[%s12919_s2 + $0xb0] ss:$12 sps:$4 sm:$0xff]  }
 0x1d5   : > { %v2099_v39 = vpop.f32.mrb[18].mxu1  ;;  %3290 = vmatpush1.bf16.msra.mxu1 %v9238_v40  ;;  %v10931_v41 = vadd.f32 %v2057_v38, %v10793_v54  ;;  %3249 = vmatpush1.bf16.msra.mxu0 %v9239_v43  ;;  %v2059_v44 = vpop.f32.mrb[18].mxu0  ;;  %v9248_v54 = vld [vmem:[%s12919_s2 + $0xc0] ss:$12 sps:$4 sm:$0xff]   ;;  %v9278_v35 = vld [vmem:[%s12919_s2 + $0x2d0] ss:$12 sps:$4 sm:$0xff]  }
 0x1d6   : > { %v2100_v42 = vpop.f32.mrb[19].mxu1  ;;  %3291 = vmatprep.subr.bf16.mxu1 %v9538_v1  ;;  %3250 = vmatprep.subr.bf16.mxu0 %v9240_v45  ;;  %v2060_v46 = vpop.f32.mrb[19].mxu0  ;;  %v9276_v32 = vld [vmem:[%s12919_s2 + $0x2d4] ss:$12 sps:$4 sm:$0xff]   ;;  %v9279_v36 = vld [vmem:[%s12919_s2 + $0x2ec] ss:$12 sps:$4 sm:$0xff]  }
 0x1d7   : > { %v9281_v38 = vld [vmem:[%s12919_s2 + $0x2e8] ss:$12 sps:$4 sm:$0xff]   ;;  %v9282_v39 = vld [vmem:[%s12919_s2 + $0x304] ss:$12 sps:$4 sm:$0xff]   ;;  %v9286_v43 = vld [vmem:[%s12919_s2 + $0x320] ss:$12 sps:$4 sm:$0xff]  }
 0x1d8   : > { %v9283_v40 = vld [vmem:[%s12919_s2 + $0x308] ss:$12 sps:$4 sm:$0xff]   ;;  %v9287_v44 = vld [vmem:[%s12919_s2 + $0x318] ss:$12 sps:$4 sm:$0xff]  }
 0x1d9   : > { %3292 = vmatpush1.bf16.msra.mxu1 %v9241_v47  ;;  %3251 = vmatpush1.bf16.msra.mxu0 %v9242_v48  ;;  %v9285_v42 = vld [vmem:[%s12919_s2 + $0x31c] ss:$12 sps:$4 sm:$0xff]   ;;  %v9288_v45 = vld [vmem:[%s12919_s2 + $0x334] ss:$12 sps:$4 sm:$0xff]   ;;  %v9289_v46 = vld [vmem:[%s12919_s2 + $0x338] ss:$12 sps:$4 sm:$0xff]  }
 0x1da   : > { %3293 = vmatprep.subr.bf16.mxu1 %v9538_v1  ;;  %3252 = vmatprep.subr.bf16.mxu0 %v9243_v49  ;;  %v9290_v47 = vld [vmem:[%s12919_s2 + $0x330] ss:$12 sps:$4 sm:$0xff]   ;;  %v9291_v48 = vld [vmem:[%s12919_s2 + $0x34c] ss:$12 sps:$4 sm:$0xff]   ;;  %v7593_v49 = vcombine.low %v10993_v63, %v10993_v63 }
 0x1db   : > { %v9303_v63 = vld [vmem:[%s12919_s2 + $0x3ac] ss:$12 sps:$4 sm:$0xff]  }
 0x1dd   : > { %3294 = vmatpush1.bf16.msra.mxu1 %v9244_v50  ;;  %3253 = vmatpush1.bf16.msra.mxu0 %v9245_v51  ;;  %v11131_v50 = vld [vmem:[%s10711_s19 + $0x18] sm:$0x77] }
 0x1de   : > { %3295 = vmatprep.subr.bf16.mxu1 %v9538_v1  ;;  %3254 = vmatprep.subr.bf16.mxu0 %v9246_v52  ;;  %v9292_v51 = vld [vmem:[%s12919_s2 + $0x350] ss:$12 sps:$4 sm:$0xff]   ;;  %v9293_v52 = vld [vmem:[%s12919_s2 + $0x348] ss:$12 sps:$4 sm:$0xff]  }
 0x1e1   : > { %3296 = vmatpush1.bf16.msra.mxu1 %v9247_v53  ;;  %3255 = vmatpush1.bf16.msra.mxu0 %v9248_v54  ;;  %v9294_v53 = vld [vmem:[%s12919_s2 + $0x364] ss:$12 sps:$4 sm:$0xff]   ;;  %v7599_v54 = vcombine.high %v11131_v50, %v11131_v50 }
 0x1e2   : > { %3297 = vmatprep.subr.bf16.mxu1 %v9538_v1  ;;  %3256 = vmatprep.subr.bf16.mxu0 %v9249_v55  ;;  %v9295_v55 = vld [vmem:[%s12919_s2 + $0x368] ss:$12 sps:$4 sm:$0xff]  }
 0x1e5   : > { %3298 = vmatpush1.bf16.msra.mxu1 %v9250_v56  ;;  %3257 = vmatpush1.bf16.msra.mxu0 %v9251_v57  ;;  %v9296_v56 = vld [vmem:[%s12919_s2 + $0x360] ss:$12 sps:$4 sm:$0xff]   ;;  %v9297_v57 = vld [vmem:[%s12919_s2 + $0x37c] ss:$12 sps:$4 sm:$0xff]  }
 0x1e6   : > { %3299 = vmatprep.subr.bf16.mxu1 %v9538_v1  ;;  %3258 = vmatprep.subr.bf16.mxu0 %v9252_v58  ;;  %v9298_v58 = vld [vmem:[%s12919_s2 + $0x380] ss:$12 sps:$4 sm:$0xff]  }
 0x1e9   : > { %3300 = vmatpush1.bf16.msra.mxu1 %v9253_v59  ;;  %3259 = vmatpush1.bf16.msra.mxu0 %v9254_v60  ;;  %v9299_v59 = vld [vmem:[%s12919_s2 + $0x378] ss:$12 sps:$4 sm:$0xff]   ;;  %v9300_v60 = vld [vmem:[%s12919_s2 + $0x394] ss:$12 sps:$4 sm:$0xff]  }
 0x1ea   : > { %3301 = vmatprep.subr.bf16.mxu1 %v9538_v1  ;;  %3260 = vmatprep.subr.bf16.mxu0 %v9255_v61  ;;  %v9301_v61 = vld [vmem:[%s12919_s2 + $0x398] ss:$12 sps:$4 sm:$0xff]  }
 0x1ed   : > { %3302 = vmatpush1.bf16.msra.mxu1 %v9256_v0  ;;  %3261 = vmatpush1.bf16.msra.mxu0 %v9257_v2  ;;  %v9304_v0 = vld [vmem:[%s12919_s2 + $0x3b0] ss:$12 sps:$4 sm:$0xff]   ;;  %v9305_v2 = vld [vmem:[%s12919_s2 + $0x3a8] ss:$12 sps:$4 sm:$0xff]  }
 0x1ee   : > { %3371 = vmatprep.subr.bf16.mxu1 %v9538_v1  ;;  %3330 = vmatprep.subr.bf16.mxu0 %v9258_v3  ;;  %v9306_v3 = vld [vmem:[%s12919_s2 + $0x3c4] ss:$12 sps:$4 sm:$0xff]  }
 0x1f0   : > { %3312 = vmatmul.mubr.bf16.vlgmr.msra.gmra.mrb[36].mxu1 %v7588_v62  ;;  %3271 = vmatmul.mubr.bf16.vlgmr.msra.gmra.mrb[36].mxu0 %v7588_v62  ;;  %v9302_v62 = vld [vmem:[%s12919_s2 + $0x390] ss:$12 sps:$4 sm:$0xff]  }
 0x1f1   : > { %3372 = vmatpush1.bf16.msra.mxu1 %v9259_v5  ;;  %3331 = vmatpush1.bf16.msra.mxu0 %v9260_v6  ;;  %v9308_v5 = vld [vmem:[%s12919_s2 + $0x3c0] ss:$12 sps:$4 sm:$0xff]  }
 0x1f2   : > { %3373 = vmatprep.subr.bf16.mxu1 %v9538_v1  ;;  %3332 = vmatprep.subr.bf16.mxu0 %v9261_v7  ;;  %v9309_v7 = vld [vmem:[%s12919_s2 + $0x3dc] ss:$12 sps:$4 sm:$0xff]  }
 0x1f3   : > { %7596 = vmatprep.mubr.msk.bf16.mxu1 %vm730_vm0, %v7594_v4  ;;  %7595 = vmatprep.mubr.msk.bf16.mxu0 %vm730_vm0, %v7594_v4  ;;  %v9307_v4 = vld [vmem:[%s12919_s2 + $0x3c8] ss:$12 sps:$4 sm:$0xff]  }
 0x1f5   : > { %3374 = vmatpush1.bf16.msra.mxu1 %v9262_v8  ;;  %3333 = vmatpush1.bf16.msra.mxu0 %v9263_v9 }
 0x1f6   : > { %3375 = vmatprep.subr.bf16.mxu1 %v9538_v1  ;;  %3334 = vmatprep.subr.bf16.mxu0 %v9264_v10 }
 0x1f9   : > { %3376 = vmatpush1.bf16.msra.mxu1 %v9265_v11  ;;  %3335 = vmatpush1.bf16.msra.mxu0 %v9266_v12 }
 0x1fa   : > { %3377 = vmatprep.subr.bf16.mxu1 %v9538_v1  ;;  %3336 = vmatprep.subr.bf16.mxu0 %v9267_v13 }
 0x1fd   : > { %3378 = vmatpush1.bf16.msra.mxu1 %v9268_v14  ;;  %3337 = vmatpush1.bf16.msra.mxu0 %v9269_v15  ;;  %v9310_v14 = vld [vmem:[%s12919_s2 + $0x3e0] ss:$12 sps:$4 sm:$0xff]  }
 0x1fe   : > { %3379 = vmatprep.subr.bf16.mxu1 %v9538_v1  ;;  %3338 = vmatprep.subr.bf16.mxu0 %v9270_v16 }
 0x201   : > { %3380 = vmatpush1.bf16.msra.mxu1 %v9271_v17  ;;  %3339 = vmatpush1.bf16.msra.mxu0 %v9272_v18  ;;  %v9311_v17 = vld [vmem:[%s12919_s2 + $0x3d8] ss:$12 sps:$4 sm:$0xff]  }
 0x202   : > { %3381 = vmatprep.subr.bf16.mxu1 %v9538_v1  ;;  %3340 = vmatprep.subr.bf16.mxu0 %v9273_v20 }
 0x203   : > { %v2432_v19 = vpop.f32.mrb[20].mxu1  ;;  %v2391_v22 = vpop.f32.mrb[20].mxu0 }
 0x204   : > { %v11060_v21 = vadd.f32 %v2432_v19, %v10922_v34  ;;  %v2434_v23 = vpop.f32.mrb[21].mxu1  ;;  %v11063_v24 = vadd.f32 %v2391_v22, %v10925_v37  ;;  %v2393_v25 = vpop.f32.mrb[21].mxu0  ;;  %v9277_v34 = vld [vmem:[%s12919_s2 + $0x2d8] ss:$12 sps:$4 sm:$0xff]   ;;  %v9280_v37 = vld [vmem:[%s12919_s2 + $0x2f0] ss:$12 sps:$4 sm:$0xff]  }
 0x205   : > { %v2435_v26 = vpop.f32.mrb[22].mxu1  ;;  %3382 = vmatpush1.bf16.msra.mxu1 %v9274_v27  ;;  %v11069_v28 = vadd.f32 %v2393_v25, %v10931_v41  ;;  %3341 = vmatpush1.bf16.msra.mxu0 %v9275_v30  ;;  %v2395_v31 = vpop.f32.mrb[22].mxu0  ;;  %v9284_v41 = vld [vmem:[%s12919_s2 + $0x300] ss:$12 sps:$4 sm:$0xff]   ;;  %v9314_v22 = vld [vmem:[%s12919_s2 + $0x3f0] ss:$12 sps:$4 sm:$0xff]  }
 0x206   : > { %v2436_v29 = vpop.f32.mrb[23].mxu1  ;;  %3383 = vmatprep.subr.bf16.mxu1 %v9538_v1  ;;  %3342 = vmatprep.subr.bf16.mxu0 %v9276_v32  ;;  %v2396_v33 = vpop.f32.mrb[23].mxu0  ;;  %v9312_v19 = vld [vmem:[%s12919_s2 + $0x3f4] ss:$12 sps:$4 sm:$0xff]   ;;  %v9315_v23 = vld [vmem:[%s12919_s2 + $0x40c] ss:$12 sps:$4 sm:$0xff]  }
 0x207   : > { %v9317_v25 = vld [vmem:[%s12919_s2 + $0x408] ss:$12 sps:$4 sm:$0xff]   ;;  %v9318_v26 = vld [vmem:[%s12919_s2 + $0x424] ss:$12 sps:$4 sm:$0xff]   ;;  %v9322_v30 = vld [vmem:[%s12919_s2 + $0x440] ss:$12 sps:$4 sm:$0xff]  }
 0x208   : > { %v9319_v27 = vld [vmem:[%s12919_s2 + $0x428] ss:$12 sps:$4 sm:$0xff]   ;;  %v9323_v31 = vld [vmem:[%s12919_s2 + $0x438] ss:$12 sps:$4 sm:$0xff]  }
 0x209   : > { %3384 = vmatpush1.bf16.msra.mxu1 %v9277_v34  ;;  %3343 = vmatpush1.bf16.msra.mxu0 %v9278_v35  ;;  %v9321_v29 = vld [vmem:[%s12919_s2 + $0x43c] ss:$12 sps:$4 sm:$0xff]   ;;  %v9324_v32 = vld [vmem:[%s12919_s2 + $0x454] ss:$12 sps:$4 sm:$0xff]   ;;  %v9325_v33 = vld [vmem:[%s12919_s2 + $0x458] ss:$12 sps:$4 sm:$0xff]  }
 0x20a   : > { %3385 = vmatprep.subr.bf16.mxu1 %v9538_v1  ;;  %3344 = vmatprep.subr.bf16.mxu0 %v9279_v36  ;;  %v9326_v34 = vld [vmem:[%s12919_s2 + $0x450] ss:$12 sps:$4 sm:$0xff]   ;;  %v9327_v35 = vld [vmem:[%s12919_s2 + $0x46c] ss:$12 sps:$4 sm:$0xff]   ;;  %v7598_v36 = vcombine.low %v11131_v50, %v11131_v50 }
 0x20b   : > { %v9339_v50 = vld [vmem:[%s12919_s2 + $0x4cc] ss:$12 sps:$4 sm:$0xff]  }
 0x20d   : > { %3386 = vmatpush1.bf16.msra.mxu1 %v9280_v37  ;;  %3345 = vmatpush1.bf16.msra.mxu0 %v9281_v38  ;;  %v11269_v37 = vld [vmem:[%s10711_s19 + $0x20] sm:$0x77]  ;;  %v9328_v38 = vld [vmem:[%s12919_s2 + $0x470] ss:$12 sps:$4 sm:$0xff]  }
 0x20e   : > { %3387 = vmatprep.subr.bf16.mxu1 %v9538_v1  ;;  %3346 = vmatprep.subr.bf16.mxu0 %v9282_v39  ;;  %v9329_v39 = vld [vmem:[%s12919_s2 + $0x468] ss:$12 sps:$4 sm:$0xff]  }
 0x211   : > { %3388 = vmatpush1.bf16.msra.mxu1 %v9283_v40  ;;  %3347 = vmatpush1.bf16.msra.mxu0 %v9284_v41  ;;  %v9330_v40 = vld [vmem:[%s12919_s2 + $0x484] ss:$12 sps:$4 sm:$0xff]   ;;  %v7604_v41 = vcombine.high %v11269_v37, %v11269_v37 }
 0x212   : > { %3389 = vmatprep.subr.bf16.mxu1 %v9538_v1  ;;  %3348 = vmatprep.subr.bf16.mxu0 %v9285_v42  ;;  %v9331_v42 = vld [vmem:[%s12919_s2 + $0x488] ss:$12 sps:$4 sm:$0xff]  }
 0x215   : > { %3390 = vmatpush1.bf16.msra.mxu1 %v9286_v43  ;;  %3349 = vmatpush1.bf16.msra.mxu0 %v9287_v44  ;;  %v9332_v43 = vld [vmem:[%s12919_s2 + $0x480] ss:$12 sps:$4 sm:$0xff]   ;;  %v9333_v44 = vld [vmem:[%s12919_s2 + $0x49c] ss:$12 sps:$4 sm:$0xff]  }
 0x216   : > { %3391 = vmatprep.subr.bf16.mxu1 %v9538_v1  ;;  %3350 = vmatprep.subr.bf16.mxu0 %v9288_v45  ;;  %v9334_v45 = vld [vmem:[%s12919_s2 + $0x4a0] ss:$12 sps:$4 sm:$0xff]  }
 0x219   : > { %3392 = vmatpush1.bf16.msra.mxu1 %v9289_v46  ;;  %3351 = vmatpush1.bf16.msra.mxu0 %v9290_v47  ;;  %v9335_v46 = vld [vmem:[%s12919_s2 + $0x498] ss:$12 sps:$4 sm:$0xff]   ;;  %v9336_v47 = vld [vmem:[%s12919_s2 + $0x4b4] ss:$12 sps:$4 sm:$0xff]  }
 0x21a   : > { %3393 = vmatprep.subr.bf16.mxu1 %v9538_v1  ;;  %3352 = vmatprep.subr.bf16.mxu0 %v9291_v48  ;;  %v9337_v48 = vld [vmem:[%s12919_s2 + $0x4b8] ss:$12 sps:$4 sm:$0xff]  }
 0x21d   : > { %3394 = vmatpush1.bf16.msra.mxu1 %v9292_v51  ;;  %3353 = vmatpush1.bf16.msra.mxu0 %v9293_v52  ;;  %v9340_v51 = vld [vmem:[%s12919_s2 + $0x4d0] ss:$12 sps:$4 sm:$0xff]   ;;  %v9341_v52 = vld [vmem:[%s12919_s2 + $0x4c8] ss:$12 sps:$4 sm:$0xff]  }
 0x21e   : > { %3466 = vmatprep.subr.bf16.mxu1 %v9538_v1  ;;  %3425 = vmatprep.subr.bf16.mxu0 %v9294_v53  ;;  %v9342_v53 = vld [vmem:[%s12919_s2 + $0x4e4] ss:$12 sps:$4 sm:$0xff]  }
 0x220   : > { %3404 = vmatmul.mubr.bf16.vlgmr.msra.gmra.mrb[40].mxu1 %v7593_v49  ;;  %3363 = vmatmul.mubr.bf16.vlgmr.msra.gmra.mrb[40].mxu0 %v7593_v49  ;;  %v9338_v49 = vld [vmem:[%s12919_s2 + $0x4b0] ss:$12 sps:$4 sm:$0xff]  }
 0x221   : > { %3467 = vmatpush1.bf16.msra.mxu1 %v9295_v55  ;;  %3426 = vmatpush1.bf16.msra.mxu0 %v9296_v56  ;;  %v9344_v55 = vld [vmem:[%s12919_s2 + $0x4e0] ss:$12 sps:$4 sm:$0xff]  }
 0x222   : > { %3468 = vmatprep.subr.bf16.mxu1 %v9538_v1  ;;  %3427 = vmatprep.subr.bf16.mxu0 %v9297_v57  ;;  %v9345_v57 = vld [vmem:[%s12919_s2 + $0x4fc] ss:$12 sps:$4 sm:$0xff]  }
 0x223   : > { %7601 = vmatprep.mubr.msk.bf16.mxu1 %vm730_vm0, %v7599_v54  ;;  %7600 = vmatprep.mubr.msk.bf16.mxu0 %vm730_vm0, %v7599_v54  ;;  %v9343_v54 = vld [vmem:[%s12919_s2 + $0x4e8] ss:$12 sps:$4 sm:$0xff]  }
 0x225   : > { %3469 = vmatpush1.bf16.msra.mxu1 %v9298_v58  ;;  %3428 = vmatpush1.bf16.msra.mxu0 %v9299_v59 }
 0x226   : > { %3470 = vmatprep.subr.bf16.mxu1 %v9538_v1  ;;  %3429 = vmatprep.subr.bf16.mxu0 %v9300_v60 }
 0x229   : > { %3471 = vmatpush1.bf16.msra.mxu1 %v9301_v61  ;;  %3430 = vmatpush1.bf16.msra.mxu0 %v9302_v62 }
 0x22a   : > { %3472 = vmatprep.subr.bf16.mxu1 %v9538_v1  ;;  %3431 = vmatprep.subr.bf16.mxu0 %v9303_v63 }
 0x22d   : > { %3473 = vmatpush1.bf16.msra.mxu1 %v9304_v0  ;;  %3432 = vmatpush1.bf16.msra.mxu0 %v9305_v2  ;;  %v9346_v0 = vld [vmem:[%s12919_s2 + $0x500] ss:$12 sps:$4 sm:$0xff]  }
 0x22e   : > { %3474 = vmatprep.subr.bf16.mxu1 %v9538_v1  ;;  %3433 = vmatprep.subr.bf16.mxu0 %v9306_v3 }
 0x231   : > { %3475 = vmatpush1.bf16.msra.mxu1 %v9307_v4  ;;  %3434 = vmatpush1.bf16.msra.mxu0 %v9308_v5  ;;  %v9347_v4 = vld [vmem:[%s12919_s2 + $0x4f8] ss:$12 sps:$4 sm:$0xff]  }
 0x232   : > { %3476 = vmatprep.subr.bf16.mxu1 %v9538_v1  ;;  %3435 = vmatprep.subr.bf16.mxu0 %v9309_v7 }
 0x233   : > { %v2768_v6 = vpop.f32.mrb[24].mxu1  ;;  %v2727_v9 = vpop.f32.mrb[24].mxu0 }
 0x234   : > { %v11198_v8 = vadd.f32 %v2768_v6, %v11060_v21  ;;  %v2770_v10 = vpop.f32.mrb[25].mxu1  ;;  %v11201_v11 = vadd.f32 %v2727_v9, %v11063_v24  ;;  %v2729_v12 = vpop.f32.mrb[25].mxu0  ;;  %v9313_v21 = vld [vmem:[%s12919_s2 + $0x3f8] ss:$12 sps:$4 sm:$0xff]   ;;  %v9316_v24 = vld [vmem:[%s12919_s2 + $0x410] ss:$12 sps:$4 sm:$0xff]  }
 0x235   : > { %v2771_v13 = vpop.f32.mrb[26].mxu1  ;;  %3477 = vmatpush1.bf16.msra.mxu1 %v9310_v14  ;;  %v11207_v15 = vadd.f32 %v2729_v12, %v11069_v28  ;;  %3436 = vmatpush1.bf16.msra.mxu0 %v9311_v17  ;;  %v2731_v18 = vpop.f32.mrb[26].mxu0  ;;  %v9320_v28 = vld [vmem:[%s12919_s2 + $0x420] ss:$12 sps:$4 sm:$0xff]   ;;  %v9350_v9 = vld [vmem:[%s12919_s2 + $0x510] ss:$12 sps:$4 sm:$0xff]  }
 0x236   : > { %v2772_v16 = vpop.f32.mrb[27].mxu1  ;;  %3478 = vmatprep.subr.bf16.mxu1 %v9538_v1  ;;  %3437 = vmatprep.subr.bf16.mxu0 %v9312_v19  ;;  %v2732_v20 = vpop.f32.mrb[27].mxu0  ;;  %v9348_v6 = vld [vmem:[%s12919_s2 + $0x514] ss:$12 sps:$4 sm:$0xff]   ;;  %v9351_v10 = vld [vmem:[%s12919_s2 + $0x52c] ss:$12 sps:$4 sm:$0xff]  }
 0x237   : > { %v9353_v12 = vld [vmem:[%s12919_s2 + $0x528] ss:$12 sps:$4 sm:$0xff]   ;;  %v9354_v13 = vld [vmem:[%s12919_s2 + $0x544] ss:$12 sps:$4 sm:$0xff]   ;;  %v9358_v17 = vld [vmem:[%s12919_s2 + $0x560] ss:$12 sps:$4 sm:$0xff]  }
 0x238   : > { %v9355_v14 = vld [vmem:[%s12919_s2 + $0x548] ss:$12 sps:$4 sm:$0xff]   ;;  %v9359_v18 = vld [vmem:[%s12919_s2 + $0x558] ss:$12 sps:$4 sm:$0xff]  }
 0x239   : > { %3479 = vmatpush1.bf16.msra.mxu1 %v9313_v21  ;;  %3438 = vmatpush1.bf16.msra.mxu0 %v9314_v22  ;;  %v9357_v16 = vld [vmem:[%s12919_s2 + $0x55c] ss:$12 sps:$4 sm:$0xff]   ;;  %v9360_v19 = vld [vmem:[%s12919_s2 + $0x574] ss:$12 sps:$4 sm:$0xff]   ;;  %v9361_v20 = vld [vmem:[%s12919_s2 + $0x578] ss:$12 sps:$4 sm:$0xff]  }
 0x23a   : > { %3480 = vmatprep.subr.bf16.mxu1 %v9538_v1  ;;  %3439 = vmatprep.subr.bf16.mxu0 %v9315_v23  ;;  %v9362_v21 = vld [vmem:[%s12919_s2 + $0x570] ss:$12 sps:$4 sm:$0xff]   ;;  %v9363_v22 = vld [vmem:[%s12919_s2 + $0x58c] ss:$12 sps:$4 sm:$0xff]   ;;  %v7603_v23 = vcombine.low %v11269_v37, %v11269_v37 }
 0x23b   : > { %v9375_v37 = vld [vmem:[%s12919_s2 + $0x5ec] ss:$12 sps:$4 sm:$0xff]  }
 0x23d   : > { %3481 = vmatpush1.bf16.msra.mxu1 %v9316_v24  ;;  %3440 = vmatpush1.bf16.msra.mxu0 %v9317_v25  ;;  %v11407_v24 = vld [vmem:[%s10711_s19 + $0x28] sm:$0x77]  ;;  %v9364_v25 = vld [vmem:[%s12919_s2 + $0x590] ss:$12 sps:$4 sm:$0xff]  }
 0x23e   : > { %3482 = vmatprep.subr.bf16.mxu1 %v9538_v1  ;;  %3441 = vmatprep.subr.bf16.mxu0 %v9318_v26  ;;  %v9365_v26 = vld [vmem:[%s12919_s2 + $0x588] ss:$12 sps:$4 sm:$0xff]  }
 0x241   : > { %3483 = vmatpush1.bf16.msra.mxu1 %v9319_v27  ;;  %3442 = vmatpush1.bf16.msra.mxu0 %v9320_v28  ;;  %v9366_v27 = vld [vmem:[%s12919_s2 + $0x5a4] ss:$12 sps:$4 sm:$0xff]   ;;  %v7609_v28 = vcombine.high %v11407_v24, %v11407_v24 }
 0x242   : > { %3484 = vmatprep.subr.bf16.mxu1 %v9538_v1  ;;  %3443 = vmatprep.subr.bf16.mxu0 %v9321_v29  ;;  %v9367_v29 = vld [vmem:[%s12919_s2 + $0x5a8] ss:$12 sps:$4 sm:$0xff]  }
 0x245   : > { %3485 = vmatpush1.bf16.msra.mxu1 %v9322_v30  ;;  %3444 = vmatpush1.bf16.msra.mxu0 %v9323_v31  ;;  %v9368_v30 = vld [vmem:[%s12919_s2 + $0x5a0] ss:$12 sps:$4 sm:$0xff]   ;;  %v9369_v31 = vld [vmem:[%s12919_s2 + $0x5bc] ss:$12 sps:$4 sm:$0xff]  }
 0x246   : > { %3486 = vmatprep.subr.bf16.mxu1 %v9538_v1  ;;  %3445 = vmatprep.subr.bf16.mxu0 %v9324_v32  ;;  %v9370_v32 = vld [vmem:[%s12919_s2 + $0x5c0] ss:$12 sps:$4 sm:$0xff]  }
 0x249   : > { %3487 = vmatpush1.bf16.msra.mxu1 %v9325_v33  ;;  %3446 = vmatpush1.bf16.msra.mxu0 %v9326_v34  ;;  %v9371_v33 = vld [vmem:[%s12919_s2 + $0x5b8] ss:$12 sps:$4 sm:$0xff]   ;;  %v9372_v34 = vld [vmem:[%s12919_s2 + $0x5d4] ss:$12 sps:$4 sm:$0xff]  }
 0x24a   : > { %3488 = vmatprep.subr.bf16.mxu1 %v9538_v1  ;;  %3447 = vmatprep.subr.bf16.mxu0 %v9327_v35  ;;  %v9373_v35 = vld [vmem:[%s12919_s2 + $0x5d8] ss:$12 sps:$4 sm:$0xff]  }
 0x24d   : > { %3489 = vmatpush1.bf16.msra.mxu1 %v9328_v38  ;;  %3448 = vmatpush1.bf16.msra.mxu0 %v9329_v39  ;;  %v9376_v38 = vld [vmem:[%s12919_s2 + $0x5f0] ss:$12 sps:$4 sm:$0xff]   ;;  %v9377_v39 = vld [vmem:[%s12919_s2 + $0x5e8] ss:$12 sps:$4 sm:$0xff]  }
 0x24e   : > { %3561 = vmatprep.subr.bf16.mxu1 %v9538_v1  ;;  %3520 = vmatprep.subr.bf16.mxu0 %v9330_v40  ;;  %v9378_v40 = vld [vmem:[%s12919_s2 + $0x604] ss:$12 sps:$4 sm:$0xff]  }
 0x250   : > { %3499 = vmatmul.mubr.bf16.vlgmr.msra.gmra.mrb[44].mxu1 %v7598_v36  ;;  %3458 = vmatmul.mubr.bf16.vlgmr.msra.gmra.mrb[44].mxu0 %v7598_v36  ;;  %v9374_v36 = vld [vmem:[%s12919_s2 + $0x5d0] ss:$12 sps:$4 sm:$0xff]  }
 0x251   : > { %3562 = vmatpush1.bf16.msra.mxu1 %v9331_v42  ;;  %3521 = vmatpush1.bf16.msra.mxu0 %v9332_v43  ;;  %v9380_v42 = vld [vmem:[%s12919_s2 + $0x600] ss:$12 sps:$4 sm:$0xff]  }
 0x252   : > { %3563 = vmatprep.subr.bf16.mxu1 %v9538_v1  ;;  %3522 = vmatprep.subr.bf16.mxu0 %v9333_v44  ;;  %v9381_v44 = vld [vmem:[%s12919_s2 + $0x61c] ss:$12 sps:$4 sm:$0xff]  }
 0x253   : > { %7606 = vmatprep.mubr.msk.bf16.mxu1 %vm730_vm0, %v7604_v41  ;;  %7605 = vmatprep.mubr.msk.bf16.mxu0 %vm730_vm0, %v7604_v41  ;;  %v9379_v41 = vld [vmem:[%s12919_s2 + $0x608] ss:$12 sps:$4 sm:$0xff]  }
 0x255   : > { %3564 = vmatpush1.bf16.msra.mxu1 %v9334_v45  ;;  %3523 = vmatpush1.bf16.msra.mxu0 %v9335_v46 }
 0x256   : > { %3565 = vmatprep.subr.bf16.mxu1 %v9538_v1  ;;  %3524 = vmatprep.subr.bf16.mxu0 %v9336_v47 }
 0x259   : > { %3566 = vmatpush1.bf16.msra.mxu1 %v9337_v48  ;;  %3525 = vmatpush1.bf16.msra.mxu0 %v9338_v49  ;;  %v9382_v48 = vld [vmem:[%s12919_s2 + $0x620] ss:$12 sps:$4 sm:$0xff]  }
 0x25a   : > { %3567 = vmatprep.subr.bf16.mxu1 %v9538_v1  ;;  %3526 = vmatprep.subr.bf16.mxu0 %v9339_v50 }
 0x25d   : > { %3568 = vmatpush1.bf16.msra.mxu1 %v9340_v51  ;;  %3527 = vmatpush1.bf16.msra.mxu0 %v9341_v52  ;;  %v9383_v51 = vld [vmem:[%s12919_s2 + $0x618] ss:$12 sps:$4 sm:$0xff]  }
 0x25e   : > { %3569 = vmatprep.subr.bf16.mxu1 %v9538_v1  ;;  %3528 = vmatprep.subr.bf16.mxu0 %v9342_v53  ;;  %v9384_v53 = vld [vmem:[%s12919_s2 + $0x634] ss:$12 sps:$4 sm:$0xff]  }
 0x261   : > { %3570 = vmatpush1.bf16.msra.mxu1 %v9343_v54  ;;  %3529 = vmatpush1.bf16.msra.mxu0 %v9344_v55  ;;  %v9385_v55 = vld [vmem:[%s12919_s2 + $0x638] ss:$12 sps:$4 sm:$0xff]  }
 0x262   : > { %3571 = vmatprep.subr.bf16.mxu1 %v9538_v1  ;;  %3530 = vmatprep.subr.bf16.mxu0 %v9345_v57  ;;  %v9387_v57 = vld [vmem:[%s12919_s2 + $0x64c] ss:$12 sps:$4 sm:$0xff]  }
 0x263   : > { %v3104_v56 = vpop.f32.mrb[28].mxu1  ;;  %v3063_v59 = vpop.f32.mrb[28].mxu0 }
 0x264   : > { %v11336_v58 = vadd.f32 %v3104_v56, %v11198_v8  ;;  %v3106_v60 = vpop.f32.mrb[29].mxu1  ;;  %v11339_v61 = vadd.f32 %v3063_v59, %v11201_v11  ;;  %v3065_v62 = vpop.f32.mrb[29].mxu0  ;;  %v9349_v8 = vld [vmem:[%s12919_s2 + $0x518] ss:$12 sps:$4 sm:$0xff]   ;;  %v9352_v11 = vld [vmem:[%s12919_s2 + $0x530] ss:$12 sps:$4 sm:$0xff]  }
 0x265   : > { %v3107_v63 = vpop.f32.mrb[30].mxu1  ;;  %3572 = vmatpush1.bf16.msra.mxu1 %v9346_v0  ;;  %v11345_v2 = vadd.f32 %v3065_v62, %v11207_v15  ;;  %3531 = vmatpush1.bf16.msra.mxu0 %v9347_v4  ;;  %v3067_v5 = vpop.f32.mrb[30].mxu0  ;;  %v9356_v15 = vld [vmem:[%s12919_s2 + $0x540] ss:$12 sps:$4 sm:$0xff]   ;;  %v9386_v56 = vld [vmem:[%s12919_s2 + $0x630] ss:$12 sps:$4 sm:$0xff]  }
 0x266   : > { %v3108_v3 = vpop.f32.mrb[31].mxu1  ;;  %3573 = vmatprep.subr.bf16.mxu1 %v9538_v1  ;;  %3532 = vmatprep.subr.bf16.mxu0 %v9348_v6  ;;  %v3068_v7 = vpop.f32.mrb[31].mxu0  ;;  %v9388_v59 = vld [vmem:[%s12919_s2 + $0x650] ss:$12 sps:$4 sm:$0xff]   ;;  %v9389_v60 = vld [vmem:[%s12919_s2 + $0x648] ss:$12 sps:$4 sm:$0xff]  }
 0x267   : > { %v9390_v62 = vld [vmem:[%s12919_s2 + $0x664] ss:$12 sps:$4 sm:$0xff]   ;;  %v9391_v63 = vld [vmem:[%s12919_s2 + $0x668] ss:$12 sps:$4 sm:$0xff]   ;;  %v9392_v0 = vld [vmem:[%s12919_s2 + $0x660] ss:$12 sps:$4 sm:$0xff]  }
 0x268   : > { %v9393_v3 = vld [vmem:[%s12919_s2 + $0x67c] ss:$12 sps:$4 sm:$0xff]   ;;  %v9394_v4 = vld [vmem:[%s12919_s2 + $0x680] ss:$12 sps:$4 sm:$0xff]   ;;  %v9395_v5 = vld [vmem:[%s12919_s2 + $0x678] ss:$12 sps:$4 sm:$0xff]  }
 0x269   : > { %3574 = vmatpush1.bf16.msra.mxu1 %v9349_v8  ;;  %3533 = vmatpush1.bf16.msra.mxu0 %v9350_v9  ;;  %v9396_v6 = vld [vmem:[%s12919_s2 + $0x694] ss:$12 sps:$4 sm:$0xff]   ;;  %v9397_v7 = vld [vmem:[%s12919_s2 + $0x698] ss:$12 sps:$4 sm:$0xff]   ;;  %v9398_v8 = vld [vmem:[%s12919_s2 + $0x690] ss:$12 sps:$4 sm:$0xff]  }
 0x26a   : > { %3575 = vmatprep.subr.bf16.mxu1 %v9538_v1  ;;  %3534 = vmatprep.subr.bf16.mxu0 %v9351_v10  ;;  %v9399_v9 = vld [vmem:[%s12919_s2 + $0x6ac] ss:$12 sps:$4 sm:$0xff]   ;;  %v7608_v10 = vcombine.low %v11407_v24, %v11407_v24 }
 0x26b   : > { %v9411_v24 = vld [vmem:[%s12919_s2 + $0x70c] ss:$12 sps:$4 sm:$0xff]  }
 0x26d   : > { %3576 = vmatpush1.bf16.msra.mxu1 %v9352_v11  ;;  %3535 = vmatpush1.bf16.msra.mxu0 %v9353_v12  ;;  %v11542_v11 = vld [vmem:[%s10711_s19 + $0x30] sm:$0x77] }
 0x26e   : > { %3577 = vmatprep.subr.bf16.mxu1 %v9538_v1  ;;  %3536 = vmatprep.subr.bf16.mxu0 %v9354_v13  ;;  %v9400_v12 = vld [vmem:[%s12919_s2 + $0x6b0] ss:$12 sps:$4 sm:$0xff]   ;;  %v9401_v13 = vld [vmem:[%s12919_s2 + $0x6a8] ss:$12 sps:$4 sm:$0xff]  }
 0x271   : > { %3578 = vmatpush1.bf16.msra.mxu1 %v9355_v14  ;;  %3537 = vmatpush1.bf16.msra.mxu0 %v9356_v15  ;;  %v9402_v14 = vld [vmem:[%s12919_s2 + $0x6c4] ss:$12 sps:$4 sm:$0xff]   ;;  %v7614_v15 = vcombine.high %v11542_v11, %v11542_v11 }
 0x272   : > { %3579 = vmatprep.subr.bf16.mxu1 %v9538_v1  ;;  %3538 = vmatprep.subr.bf16.mxu0 %v9357_v16  ;;  %v9403_v16 = vld [vmem:[%s12919_s2 + $0x6c8] ss:$12 sps:$4 sm:$0xff]  }
 0x275   : > { %3580 = vmatpush1.bf16.msra.mxu1 %v9358_v17  ;;  %3539 = vmatpush1.bf16.msra.mxu0 %v9359_v18  ;;  %v9404_v17 = vld [vmem:[%s12919_s2 + $0x6c0] ss:$12 sps:$4 sm:$0xff]   ;;  %v9405_v18 = vld [vmem:[%s12919_s2 + $0x6dc] ss:$12 sps:$4 sm:$0xff]  }
 0x276   : > { %3581 = vmatprep.subr.bf16.mxu1 %v9538_v1  ;;  %3540 = vmatprep.subr.bf16.mxu0 %v9360_v19  ;;  %v9406_v19 = vld [vmem:[%s12919_s2 + $0x6e0] ss:$12 sps:$4 sm:$0xff]  }
 0x279   : > { %3582 = vmatpush1.bf16.msra.mxu1 %v9361_v20  ;;  %3541 = vmatpush1.bf16.msra.mxu0 %v9362_v21  ;;  %v9407_v20 = vld [vmem:[%s12919_s2 + $0x6d8] ss:$12 sps:$4 sm:$0xff]   ;;  %v9408_v21 = vld [vmem:[%s12919_s2 + $0x6f4] ss:$12 sps:$4 sm:$0xff]  }
 0x27a   : > { %3583 = vmatprep.subr.bf16.mxu1 %v9538_v1  ;;  %3542 = vmatprep.subr.bf16.mxu0 %v9363_v22  ;;  %v9409_v22 = vld [vmem:[%s12919_s2 + $0x6f8] ss:$12 sps:$4 sm:$0xff]  }
 0x27d   : > { %3584 = vmatpush1.bf16.msra.mxu1 %v9364_v25  ;;  %3543 = vmatpush1.bf16.msra.mxu0 %v9365_v26  ;;  %v9412_v25 = vld [vmem:[%s12919_s2 + $0x710] ss:$12 sps:$4 sm:$0xff]   ;;  %v9413_v26 = vld [vmem:[%s12919_s2 + $0x708] ss:$12 sps:$4 sm:$0xff]  }
 0x27e   : > { %3656 = vmatprep.subr.bf16.mxu1 %v9538_v1  ;;  %3615 = vmatprep.subr.bf16.mxu0 %v9366_v27  ;;  %v9414_v27 = vld [vmem:[%s12919_s2 + $0x724] ss:$12 sps:$4 sm:$0xff]  }
 0x280   : > { %3594 = vmatmul.mubr.bf16.vlgmr.msra.gmra.mrb[48].mxu1 %v7603_v23  ;;  %3553 = vmatmul.mubr.bf16.vlgmr.msra.gmra.mrb[48].mxu0 %v7603_v23  ;;  %v9410_v23 = vld [vmem:[%s12919_s2 + $0x6f0] ss:$12 sps:$4 sm:$0xff]  }
 0x281   : > { %3657 = vmatpush1.bf16.msra.mxu1 %v9367_v29  ;;  %3616 = vmatpush1.bf16.msra.mxu0 %v9368_v30  ;;  %v9416_v29 = vld [vmem:[%s12919_s2 + $0x720] ss:$12 sps:$4 sm:$0xff]  }
 0x282   : > { %3658 = vmatprep.subr.bf16.mxu1 %v9538_v1  ;;  %3617 = vmatprep.subr.bf16.mxu0 %v9369_v31  ;;  %v9417_v31 = vld [vmem:[%s12919_s2 + $0x73c] ss:$12 sps:$4 sm:$0xff]  }
 0x283   : > { %7611 = vmatprep.mubr.msk.bf16.mxu1 %vm730_vm0, %v7609_v28  ;;  %7610 = vmatprep.mubr.msk.bf16.mxu0 %vm730_vm0, %v7609_v28  ;;  %v9415_v28 = vld [vmem:[%s12919_s2 + $0x728] ss:$12 sps:$4 sm:$0xff]  }
 0x285   : > { %3659 = vmatpush1.bf16.msra.mxu1 %v9370_v32  ;;  %3618 = vmatpush1.bf16.msra.mxu0 %v9371_v33 }
 0x286   : > { %3660 = vmatprep.subr.bf16.mxu1 %v9538_v1  ;;  %3619 = vmatprep.subr.bf16.mxu0 %v9372_v34 }
 0x289   : > { %3661 = vmatpush1.bf16.msra.mxu1 %v9373_v35  ;;  %3620 = vmatpush1.bf16.msra.mxu0 %v9374_v36  ;;  %v9418_v36 = vld [vmem:[%s12919_s2 + $0x740] ss:$12 sps:$4 sm:$0xff]  }
 0x28a   : > { %3662 = vmatprep.subr.bf16.mxu1 %v9538_v1  ;;  %3621 = vmatprep.subr.bf16.mxu0 %v9375_v37 }
 0x28d   : > { %3663 = vmatpush1.bf16.msra.mxu1 %v9376_v38  ;;  %3622 = vmatpush1.bf16.msra.mxu0 %v9377_v39 }
 0x28e   : > { %3664 = vmatprep.subr.bf16.mxu1 %v9538_v1  ;;  %3623 = vmatprep.subr.bf16.mxu0 %v9378_v40  ;;  %v9419_v40 = vld [vmem:[%s12919_s2 + $0x738] ss:$12 sps:$4 sm:$0xff]  }
 0x291   : > { %3665 = vmatpush1.bf16.msra.mxu1 %v9379_v41  ;;  %3624 = vmatpush1.bf16.msra.mxu0 %v9380_v42 }
 0x292   : > { %3666 = vmatprep.subr.bf16.mxu1 %v9538_v1  ;;  %3625 = vmatprep.subr.bf16.mxu0 %v9381_v44 }
 0x293   : > { %v11470_v43 = vpop.f32.mrb[32].mxu1  ;;  %v11475_v46 = vpop.f32.mrb[32].mxu0 }
 0x294   : > { %v3225_v45 = vpop.f32.mrb[33].mxu1  ;;  %v11480_v49 = vpop.f32.mrb[33].mxu0 }
 0x295   : > { %v3226_v47 = vpop.f32.mrb[34].mxu1  ;;  %3667 = vmatpush1.bf16.msra.mxu1 %v9382_v48  ;;  %3626 = vmatpush1.bf16.msra.mxu0 %v9383_v51  ;;  %v3186_v52 = vpop.f32.mrb[34].mxu0  ;;  %v9421_v45 = vld [vmem:[%s12919_s2 + $0x758] ss:$12 sps:$4 sm:$0xff]   ;;  %v9424_v48 = vld [vmem:[%s12919_s2 + $0x770] ss:$12 sps:$4 sm:$0xff]  }
 0x296   : > { %v3227_v50 = vpop.f32.mrb[35].mxu1  ;;  %3668 = vmatprep.subr.bf16.mxu1 %v9538_v1  ;;  %3627 = vmatprep.subr.bf16.mxu0 %v9384_v53  ;;  %v3187_v54 = vpop.f32.mrb[35].mxu0  ;;  %v9423_v47 = vld [vmem:[%s12919_s2 + $0x76c] ss:$12 sps:$4 sm:$0xff]   ;;  %v9427_v51 = vld [vmem:[%s12919_s2 + $0x788] ss:$12 sps:$4 sm:$0xff]  }
 0x297   : > { %v9426_v50 = vld [vmem:[%s12919_s2 + $0x784] ss:$12 sps:$4 sm:$0xff]   ;;  %v9428_v52 = vld [vmem:[%s12919_s2 + $0x780] ss:$12 sps:$4 sm:$0xff]   ;;  %v9429_v53 = vld [vmem:[%s12919_s2 + $0x79c] ss:$12 sps:$4 sm:$0xff]  }
 0x298   : > { %v9430_v54 = vld [vmem:[%s12919_s2 + $0x7a0] ss:$12 sps:$4 sm:$0xff]  }
 0x299   : > { %3669 = vmatpush1.bf16.msra.mxu1 %v9385_v55  ;;  %3628 = vmatpush1.bf16.msra.mxu0 %v9386_v56  ;;  %v9431_v55 = vld [vmem:[%s12919_s2 + $0x798] ss:$12 sps:$4 sm:$0xff]   ;;  %v9432_v56 = vld [vmem:[%s12919_s2 + $0x7b4] ss:$12 sps:$4 sm:$0xff]  }
 0x29a   : > { %3670 = vmatprep.subr.bf16.mxu1 %v9538_v1  ;;  %3629 = vmatprep.subr.bf16.mxu0 %v9387_v57  ;;  %v9433_v57 = vld [vmem:[%s12919_s2 + $0x7b8] ss:$12 sps:$4 sm:$0xff]  }
 0x29d   : > { %3671 = vmatpush1.bf16.msra.mxu1 %v9388_v59  ;;  %3630 = vmatpush1.bf16.msra.mxu0 %v9389_v60  ;;  %v9434_v59 = vld [vmem:[%s12919_s2 + $0x7b0] ss:$12 sps:$4 sm:$0xff]   ;;  %v9435_v60 = vld [vmem:[%s12919_s2 + $0x7cc] ss:$12 sps:$4 sm:$0xff]  }
 0x29e   : > { %3672 = vmatprep.subr.bf16.mxu1 %v9538_v1  ;;  %3631 = vmatprep.subr.bf16.mxu0 %v9390_v62  ;;  %v7613_v62 = vcombine.low %v11542_v11, %v11542_v11  ;;  %v9444_v11 = vld [vmem:[%s12919_s2 + $0x814] ss:$12 sps:$4 sm:$0xff]  }
 0x2a1   : > { %3673 = vmatpush1.bf16.msra.mxu1 %v9391_v63  ;;  %3632 = vmatpush1.bf16.msra.mxu0 %v9392_v0  ;;  %v11680_v63 = vld [vmem:[%s10711_s19 + $0x38] sm:$0x77] }
 0x2a2   : > { %3674 = vmatprep.subr.bf16.mxu1 %v9538_v1  ;;  %3633 = vmatprep.subr.bf16.mxu0 %v9393_v3  ;;  %v9436_v0 = vld [vmem:[%s12919_s2 + $0x7d0] ss:$12 sps:$4 sm:$0xff]   ;;  %v9437_v3 = vld [vmem:[%s12919_s2 + $0x7c8] ss:$12 sps:$4 sm:$0xff]  }
 0x2a5   : > { %3675 = vmatpush1.bf16.msra.mxu1 %v9394_v4  ;;  %3634 = vmatpush1.bf16.msra.mxu0 %v9395_v5  ;;  %v9438_v4 = vld [vmem:[%s12919_s2 + $0x7e4] ss:$12 sps:$4 sm:$0xff]   ;;  %v7619_v5 = vcombine.high %v11680_v63, %v11680_v63 }
 0x2a6   : > { %3676 = vmatprep.subr.bf16.mxu1 %v9538_v1  ;;  %3635 = vmatprep.subr.bf16.mxu0 %v9396_v6  ;;  %v9439_v6 = vld [vmem:[%s12919_s2 + $0x7e8] ss:$12 sps:$4 sm:$0xff]  }
 0x2a9   : > { %3677 = vmatpush1.bf16.msra.mxu1 %v9397_v7  ;;  %3636 = vmatpush1.bf16.msra.mxu0 %v9398_v8  ;;  %v9440_v7 = vld [vmem:[%s12919_s2 + $0x7e0] ss:$12 sps:$4 sm:$0xff]   ;;  %v9441_v8 = vld [vmem:[%s12919_s2 + $0x7fc] ss:$12 sps:$4 sm:$0xff]  }
 0x2aa   : > { %3678 = vmatprep.subr.bf16.mxu1 %v9538_v1  ;;  %3637 = vmatprep.subr.bf16.mxu0 %v9399_v9  ;;  %v9442_v9 = vld [vmem:[%s12919_s2 + $0x800] ss:$12 sps:$4 sm:$0xff]  }
 0x2ad   : > { %3679 = vmatpush1.bf16.msra.mxu1 %v9400_v12  ;;  %3638 = vmatpush1.bf16.msra.mxu0 %v9401_v13  ;;  %v9445_v12 = vld [vmem:[%s12919_s2 + $0x818] ss:$12 sps:$4 sm:$0xff]   ;;  %v9446_v13 = vld [vmem:[%s12919_s2 + $0x810] ss:$12 sps:$4 sm:$0xff]  }
 0x2ae   : > { %3751 = vmatprep.subr.bf16.mxu1 %v9538_v1  ;;  %3710 = vmatprep.subr.bf16.mxu0 %v9402_v14  ;;  %v9447_v14 = vld [vmem:[%s12919_s2 + $0x82c] ss:$12 sps:$4 sm:$0xff]  }
 0x2b0   : > { %3689 = vmatmul.mubr.bf16.vlgmr.msra.gmra.mrb[52].mxu1 %v7608_v10  ;;  %3648 = vmatmul.mubr.bf16.vlgmr.msra.gmra.mrb[52].mxu0 %v7608_v10  ;;  %v9443_v10 = vld [vmem:[%s12919_s2 + $0x7f8] ss:$12 sps:$4 sm:$0xff]  }
 0x2b1   : > { %3752 = vmatpush1.bf16.msra.mxu1 %v9403_v16  ;;  %3711 = vmatpush1.bf16.msra.mxu0 %v9404_v17  ;;  %v9449_v16 = vld [vmem:[%s12919_s2 + $0x828] ss:$12 sps:$4 sm:$0xff]   ;;  %v9450_v17 = vld [vmem:[%s12919_s2 + $0x844] ss:$12 sps:$4 sm:$0xff]  }
 0x2b2   : > { %3753 = vmatprep.subr.bf16.mxu1 %v9538_v1  ;;  %3712 = vmatprep.subr.bf16.mxu0 %v9405_v18  ;;  %v9451_v18 = vld [vmem:[%s12919_s2 + $0x848] ss:$12 sps:$4 sm:$0xff]  }
 0x2b3   : > { %7616 = vmatprep.mubr.msk.bf16.mxu1 %vm730_vm0, %v7614_v15  ;;  %7615 = vmatprep.mubr.msk.bf16.mxu0 %vm730_vm0, %v7614_v15  ;;  %v9448_v15 = vld [vmem:[%s12919_s2 + $0x830] ss:$12 sps:$4 sm:$0xff]  }
 0x2b5   : > { %3754 = vmatpush1.bf16.msra.mxu1 %v9406_v19  ;;  %3713 = vmatpush1.bf16.msra.mxu0 %v9407_v20  ;;  %v9452_v19 = vld [vmem:[%s12919_s2 + $0x840] ss:$12 sps:$4 sm:$0xff]  }
 0x2b6   : > { %3755 = vmatprep.subr.bf16.mxu1 %v9538_v1  ;;  %3714 = vmatprep.subr.bf16.mxu0 %v9408_v21  ;;  %v9453_v21 = vld [vmem:[%s12919_s2 + $0x85c] ss:$12 sps:$4 sm:$0xff]  }
 0x2b9   : > { %3756 = vmatpush1.bf16.msra.mxu1 %v9409_v22  ;;  %3715 = vmatpush1.bf16.msra.mxu0 %v9410_v23 }
 0x2ba   : > { %3757 = vmatprep.subr.bf16.mxu1 %v9538_v1  ;;  %3716 = vmatprep.subr.bf16.mxu0 %v9411_v24 }
 0x2bd   : > { %3758 = vmatpush1.bf16.msra.mxu1 %v9412_v25  ;;  %3717 = vmatpush1.bf16.msra.mxu0 %v9413_v26 }
 0x2be   : > { %3759 = vmatprep.subr.bf16.mxu1 %v9538_v1  ;;  %3718 = vmatprep.subr.bf16.mxu0 %v9414_v27 }
 0x2c1   : > { %3760 = vmatpush1.bf16.msra.mxu1 %v9415_v28  ;;  %3719 = vmatpush1.bf16.msra.mxu0 %v9416_v29  ;;  %v9454_v28 = vld [vmem:[%s12919_s2 + $0x860] ss:$12 sps:$4 sm:$0xff]  }
 0x2c2   : > { %3761 = vmatprep.subr.bf16.mxu1 %v9538_v1  ;;  %3720 = vmatprep.subr.bf16.mxu0 %v9417_v31  ;;  %v9455_v31 = vld [vmem:[%s12919_s2 + $0x858] ss:$12 sps:$4 sm:$0xff]  }
 0x2c3   : > { %v3313_v30 = vpop.f32.mrb[36].mxu1  ;;  %v3272_v34 = vpop.f32.mrb[36].mxu0 }
 0x2c4   : > { %v11609_v32 = vadd.f32 %v3313_v30, %v11470_v43  ;;  %v3315_v33 = vpop.f32.mrb[37].mxu1  ;;  %v11615_v37 = vadd.f32 %v3272_v34, %v11475_v46  ;;  %v3274_v38 = vpop.f32.mrb[37].mxu0  ;;  %v9420_v43 = vld [vmem:[%s12919_s2 + $0x754] ss:$12 sps:$4 sm:$0xff]   ;;  %v9422_v46 = vld [vmem:[%s12919_s2 + $0x750] ss:$12 sps:$4 sm:$0xff]  }
 0x2c5   : > { %v3316_v35 = vpop.f32.mrb[38].mxu1  ;;  %3762 = vmatpush1.bf16.msra.mxu1 %v9418_v36  ;;  %3721 = vmatpush1.bf16.msra.mxu0 %v9419_v40  ;;  %v11622_v41 = vadd.f32 %v3274_v38, %v11480_v49  ;;  %v3276_v42 = vpop.f32.mrb[38].mxu0  ;;  %v9425_v49 = vld [vmem:[%s12919_s2 + $0x768] ss:$12 sps:$4 sm:$0xff]   ;;  %v9458_v36 = vld [vmem:[%s12919_s2 + $0x870] ss:$12 sps:$4 sm:$0xff]  }
 0x2c6   : > { %v3317_v39 = vpop.f32.mrb[39].mxu1  ;;  %3763 = vmatprep.subr.bf16.mxu1 %v9538_v1  ;;  %3722 = vmatprep.subr.bf16.mxu0 %v9420_v43  ;;  %v3277_v44 = vpop.f32.mrb[39].mxu0  ;;  %v9456_v33 = vld [vmem:[%s12919_s2 + $0x874] ss:$12 sps:$4 sm:$0xff]   ;;  %v9457_v35 = vld [vmem:[%s12919_s2 + $0x878] ss:$12 sps:$4 sm:$0xff]  }
 0x2c7   : > { %v9460_v38 = vld [vmem:[%s12919_s2 + $0x890] ss:$12 sps:$4 sm:$0xff]   ;;  %v9461_v39 = vld [vmem:[%s12919_s2 + $0x888] ss:$12 sps:$4 sm:$0xff]   ;;  %v9464_v42 = vld [vmem:[%s12919_s2 + $0x8a0] ss:$12 sps:$4 sm:$0xff]  }
 0x2c8   : > { %v9462_v40 = vld [vmem:[%s12919_s2 + $0x8a4] ss:$12 sps:$4 sm:$0xff]   ;;  %v9465_v43 = vld [vmem:[%s12919_s2 + $0x8bc] ss:$12 sps:$4 sm:$0xff]   ;;  %v9466_v44 = vld [vmem:[%s12919_s2 + $0x8c0] ss:$12 sps:$4 sm:$0xff]  }
 0x2c9   : > { %3764 = vmatpush1.bf16.msra.mxu1 %v9421_v45  ;;  %3723 = vmatpush1.bf16.msra.mxu0 %v9422_v46  ;;  %v9467_v45 = vld [vmem:[%s12919_s2 + $0x8b8] ss:$12 sps:$4 sm:$0xff]   ;;  %v9468_v46 = vld [vmem:[%s12919_s2 + $0x8d4] ss:$12 sps:$4 sm:$0xff]  }
 0x2ca   : > { %3765 = vmatprep.subr.bf16.mxu1 %v9538_v1  ;;  %3724 = vmatprep.subr.bf16.mxu0 %v9423_v47  ;;  %v9469_v47 = vld [vmem:[%s12919_s2 + $0x8d8] ss:$12 sps:$4 sm:$0xff]  }
 0x2cd   : > { %3766 = vmatpush1.bf16.msra.mxu1 %v9424_v48  ;;  %3725 = vmatpush1.bf16.msra.mxu0 %v9425_v49  ;;  %v9470_v48 = vld [vmem:[%s12919_s2 + $0x8d0] ss:$12 sps:$4 sm:$0xff]   ;;  %v9471_v49 = vld [vmem:[%s12919_s2 + $0x8ec] ss:$12 sps:$4 sm:$0xff]  }
 0x2ce   : > { %3767 = vmatprep.subr.bf16.mxu1 %v9538_v1  ;;  %3726 = vmatprep.subr.bf16.mxu0 %v9426_v50  ;;  %v8748_v50 = vld [vmem:[%s12921_s4 + $0x164] ss:$8 sps:$4 sm:$0xff]  }
 0x2d1   : > { %3768 = vmatpush1.bf16.msra.mxu1 %v9427_v51  ;;  %3727 = vmatpush1.bf16.msra.mxu0 %v9428_v52  ;;  %v7618_v51 = vcombine.low %v11680_v63, %v11680_v63  ;;  %v9472_v52 = vld [vmem:[%s12919_s2 + $0x8f0] ss:$12 sps:$4 sm:$0xff]  }
 0x2d2   : > { %3769 = vmatprep.subr.bf16.mxu1 %v9538_v1  ;;  %3728 = vmatprep.subr.bf16.mxu0 %v9429_v53  ;;  %v9473_v53 = vld [vmem:[%s12919_s2 + $0x8e8] ss:$12 sps:$4 sm:$0xff]  }
 0x2d5   : > { %3770 = vmatpush1.bf16.msra.mxu1 %v9430_v54  ;;  %3729 = vmatpush1.bf16.msra.mxu0 %v9431_v55  ;;  %v8746_v54 = vld [vmem:[%s12921_s4 + $0x160] ss:$8 sps:$4 sm:$0xff]   ;;  %v8751_v55 = vld [vmem:[%s12921_s4 + $0x174] ss:$8 sps:$4 sm:$0xff]  }
 0x2d6   : > { %3771 = vmatprep.subr.bf16.mxu1 %v9538_v1  ;;  %3730 = vmatprep.subr.bf16.mxu0 %v9432_v56  ;;  %v8749_v56 = vld [vmem:[%s12921_s4 + $0x170] ss:$8 sps:$4 sm:$0xff]  }
 0x2d9   : > { %3772 = vmatpush1.bf16.msra.mxu1 %v9433_v57  ;;  %3731 = vmatpush1.bf16.msra.mxu0 %v9434_v59 }
 0x2da   : > { %3773 = vmatprep.subr.bf16.mxu1 %v9538_v1  ;;  %3732 = vmatprep.subr.bf16.mxu0 %v9435_v60 }
 0x2dd   : > { %3774 = vmatpush1.bf16.msra.mxu1 %v9436_v0  ;;  %3733 = vmatpush1.bf16.msra.mxu0 %v9437_v3 }
 0x2de   : > { %3846 = vmatprep.subr.bf16.mxu1 %v9538_v1  ;;  %3805 = vmatprep.subr.bf16.mxu0 %v9438_v4 }
 0x2e0   : > { %3784 = vmatmul.mubr.bf16.vlgmr.msra.gmra.mrb[56].mxu1 %v7613_v62  ;;  %3743 = vmatmul.mubr.bf16.vlgmr.msra.gmra.mrb[56].mxu0 %v7613_v62 }
 0x2e1   : > { %3847 = vmatpush1.bf16.msra.mxu1 %v9439_v6  ;;  %3806 = vmatpush1.bf16.msra.mxu0 %v9440_v7 }
 0x2e2   : > { %3848 = vmatprep.subr.bf16.mxu1 %v9538_v1  ;;  %3807 = vmatprep.subr.bf16.mxu0 %v9441_v8  ;;  %v8754_v8 = vld [vmem:[%s12921_s4 + $0x184] ss:$8 sps:$4 sm:$0xff]  }
 0x2e3   : > { %7621 = vmatprep.mubr.msk.bf16.mxu1 %vm730_vm0, %v7619_v5  ;;  %7620 = vmatprep.mubr.msk.bf16.mxu0 %vm730_vm0, %v7619_v5 }
 0x2e5   : > { %3849 = vmatpush1.bf16.msra.mxu1 %v9442_v9  ;;  %3808 = vmatpush1.bf16.msra.mxu0 %v9443_v10  ;;  %v8752_v9 = vld [vmem:[%s12921_s4 + $0x180] ss:$8 sps:$4 sm:$0xff]   ;;  %v8757_v10 = vld [vmem:[%s12921_s4 + $0x194] ss:$8 sps:$4 sm:$0xff]  }
 0x2e6   : > { %3850 = vmatprep.subr.bf16.mxu1 %v9538_v1  ;;  %3809 = vmatprep.subr.bf16.mxu0 %v9444_v11  ;;  %v8755_v11 = vld [vmem:[%s12921_s4 + $0x190] ss:$8 sps:$4 sm:$0xff]  }
 0x2e9   : > { %3851 = vmatpush1.bf16.msra.mxu1 %v9445_v12  ;;  %3810 = vmatpush1.bf16.msra.mxu0 %v9446_v13  ;;  %v8760_v12 = vld [vmem:[%s12921_s4 + $0x1a4] ss:$8 sps:$4 sm:$0xff]   ;;  %v8776_v13 = vld [vmem:[%s12921_s4 + $0x260] ss:$8 sps:$4 sm:$0xff]  }
 0x2ea   : > { %3852 = vmatprep.subr.bf16.mxu1 %v9538_v1  ;;  %3811 = vmatprep.subr.bf16.mxu0 %v9447_v14  ;;  %v8758_v14 = vld [vmem:[%s12921_s4 + $0x1a0] ss:$8 sps:$4 sm:$0xff]  }
 0x2ed   : > { %3853 = vmatpush1.bf16.msra.mxu1 %v9448_v15  ;;  %3812 = vmatpush1.bf16.msra.mxu0 %v9449_v16  ;;  %v8778_v15 = vld [vmem:[%s12921_s4 + $0x264] ss:$8 sps:$4 sm:$0xff]   ;;  %v8763_v16 = vld [vmem:[%s12921_s4 + $0x1b4] ss:$8 sps:$4 sm:$0xff]  }
 0x2ee   : > { %3854 = vmatprep.subr.bf16.mxu1 %v9538_v1  ;;  %3813 = vmatprep.subr.bf16.mxu0 %v9450_v17  ;;  %v8784_v17 = vld [vmem:[%s12921_s4 + $0x274] ss:$8 sps:$4 sm:$0xff]  }
 0x2f1   : > { %3855 = vmatpush1.bf16.msra.mxu1 %v9451_v18  ;;  %3814 = vmatpush1.bf16.msra.mxu0 %v9452_v19  ;;  %v8782_v18 = vld [vmem:[%s12921_s4 + $0x270] ss:$8 sps:$4 sm:$0xff]  }
 0x2f2   : > { %3856 = vmatprep.subr.bf16.mxu1 %v9538_v1  ;;  %3815 = vmatprep.subr.bf16.mxu0 %v9453_v21  ;;  %v8761_v19 = vld [vmem:[%s12921_s4 + $0x1b0] ss:$8 sps:$4 sm:$0xff]   ;;  %v8766_v21 = vld [vmem:[%s12921_s4 + $0x1c4] ss:$8 sps:$4 sm:$0xff]  }
 0x2f3   : > { %v3405_v20 = vpop.f32.mrb[40].mxu1  ;;  %v3364_v23 = vpop.f32.mrb[40].mxu0 }
 0x2f4   : > { %v11747_v22 = vadd.f32 %v3405_v20, %v11609_v32  ;;  %v3407_v24 = vpop.f32.mrb[41].mxu1  ;;  %v11750_v25 = vadd.f32 %v3364_v23, %v11615_v37  ;;  %v3366_v26 = vpop.f32.mrb[41].mxu0  ;;  %v9459_v37 = vld [vmem:[%s12919_s2 + $0x88c] ss:$12 sps:$4 sm:$0xff]   ;;  %v8764_v23 = vld [vmem:[%s12921_s4 + $0x1c0] ss:$8 sps:$4 sm:$0xff]  }
 0x2f5   : > { %v3408_v27 = vpop.f32.mrb[42].mxu1  ;;  %3857 = vmatpush1.bf16.msra.mxu1 %v9454_v28  ;;  %v11756_v29 = vadd.f32 %v3366_v26, %v11622_v41  ;;  %3816 = vmatpush1.bf16.msra.mxu0 %v9455_v31  ;;  %v3368_v32 = vpop.f32.mrb[42].mxu0  ;;  %v9463_v41 = vld [vmem:[%s12919_s2 + $0x8a8] ss:$12 sps:$4 sm:$0xff]   ;;  %v8790_v20 = vld [vmem:[%s12921_s4 + $0x284] ss:$8 sps:$4 sm:$0xff]  }
 0x2f6   : > { %v3409_v30 = vpop.f32.mrb[43].mxu1  ;;  %3858 = vmatprep.subr.bf16.mxu1 %v9538_v1  ;;  %3817 = vmatprep.subr.bf16.mxu0 %v9456_v33  ;;  %v3369_v34 = vpop.f32.mrb[43].mxu0  ;;  %v8796_v24 = vld [vmem:[%s12921_s4 + $0x294] ss:$8 sps:$4 sm:$0xff]   ;;  %v8794_v26 = vld [vmem:[%s12921_s4 + $0x290] ss:$8 sps:$4 sm:$0xff]  }
 0x2f7   : > { %v8767_v27 = vld [vmem:[%s12921_s4 + $0x1d0] ss:$8 sps:$4 sm:$0xff]   ;;  %v8772_v28 = vld [vmem:[%s12921_s4 + $0x1e4] ss:$8 sps:$4 sm:$0xff]   ;;  %v8775_v30 = vld [vmem:[%s12921_s4 + $0x1f4] ss:$8 sps:$4 sm:$0xff]  }
 0x2f8   : > { %v8773_v31 = vld [vmem:[%s12921_s4 + $0x1f0] ss:$8 sps:$4 sm:$0xff]   ;;  %v8781_v32 = vld [vmem:[%s12921_s4 + $0x204] ss:$8 sps:$4 sm:$0xff]   ;;  %v8779_v34 = vld [vmem:[%s12921_s4 + $0x200] ss:$8 sps:$4 sm:$0xff]  }
 0x2f9   : > { %3859 = vmatpush1.bf16.msra.mxu1 %v9457_v35  ;;  %3818 = vmatpush1.bf16.msra.mxu0 %v9458_v36 }
 0x2fa   : > { %3860 = vmatprep.subr.bf16.mxu1 %v9538_v1  ;;  %3819 = vmatprep.subr.bf16.mxu0 %v9459_v37 }
 0x2fd   : > { %3861 = vmatpush1.bf16.msra.mxu1 %v9460_v38  ;;  %3820 = vmatpush1.bf16.msra.mxu0 %v9461_v39  ;;  %v8787_v38 = vld [vmem:[%s12921_s4 + $0x214] ss:$8 sps:$4 sm:$0xff]  }
 0x2fe   : > { %3862 = vmatprep.subr.bf16.mxu1 %v9538_v1  ;;  %3821 = vmatprep.subr.bf16.mxu0 %v9462_v40 }
 0x301   : > { %3863 = vmatpush1.bf16.msra.mxu1 %v9463_v41  ;;  %3822 = vmatpush1.bf16.msra.mxu0 %v9464_v42 }
 0x302   : > { %3864 = vmatprep.subr.bf16.mxu1 %v9538_v1  ;;  %3823 = vmatprep.subr.bf16.mxu0 %v9465_v43 }
 0x305   : > { %3865 = vmatpush1.bf16.msra.mxu1 %v9466_v44  ;;  %3824 = vmatpush1.bf16.msra.mxu0 %v9467_v45 }
 0x306   : > { %3866 = vmatprep.subr.bf16.mxu1 %v9538_v1  ;;  %3825 = vmatprep.subr.bf16.mxu0 %v9468_v46  ;;  %v8785_v46 = vld [vmem:[%s12921_s4 + $0x210] ss:$8 sps:$4 sm:$0xff]  }
 0x309   : > { %3867 = vmatpush1.bf16.msra.mxu1 %v9469_v47  ;;  %3826 = vmatpush1.bf16.msra.mxu0 %v9470_v48  ;;  %v8793_v47 = vld [vmem:[%s12921_s4 + $0x224] ss:$8 sps:$4 sm:$0xff]   ;;  %v8791_v48 = vld [vmem:[%s12921_s4 + $0x220] ss:$8 sps:$4 sm:$0xff]  }
 0x30a   : > { %3868 = vmatprep.subr.bf16.mxu1 %v9538_v1  ;;  %3827 = vmatprep.subr.bf16.mxu0 %v9471_v49  ;;  %v8799_v49 = vld [vmem:[%s12921_s4 + $0x234] ss:$8 sps:$4 sm:$0xff]  }
 0x30d   : > { %3869 = vmatpush1.bf16.msra.mxu1 %v9472_v52  ;;  %3828 = vmatpush1.bf16.msra.mxu0 %v9473_v53  ;;  %v8800_v52 = vld [vmem:[%s12921_s4 + $0x2a0] ss:$8 sps:$4 sm:$0xff]   ;;  %v8805_v53 = vld [vmem:[%s12921_s4 + $0x244] ss:$8 sps:$4 sm:$0xff]  }
 0x30e   : > { %4214 = vmatprep.subr.bf16.mxu0 %v8748_v50  ;;  %4255 = vmatprep.subr.bf16.mxu1 %v8778_v15  ;;  %v8797_v50 = vld [vmem:[%s12921_s4 + $0x230] ss:$8 sps:$4 sm:$0xff]  }
 0x310   : > { %3879 = vmatmul.mubr.bf16.vlgmr.msra.gmra.mrb[60].mxu1 %v7618_v51  ;;  %3838 = vmatmul.mubr.bf16.vlgmr.msra.gmra.mrb[60].mxu0 %v7618_v51  ;;  %v8802_v51 = vld [vmem:[%s12921_s4 + $0x2a4] ss:$8 sps:$4 sm:$0xff]  }
 0x311   : > { %4287 = vmatprep.mubr.bf16.mxu1 %v9538_v1  ;;  %4215 = vmatpush1.bf16.msra.mxu0 %v8746_v54  ;;  %v8803_v54 = vld [vmem:[%s12921_s4 + $0x240] ss:$8 sps:$4 sm:$0xff]  }
 0x312   : > { %4216 = vmatprep.subr.bf16.mxu0 %v8751_v55  ;;  %4256 = vmatpush1.bf16.msra.mxu1 %v8776_v13  ;;  %v8808_v55 = vld [vmem:[%s12921_s4 + $0x2b4] ss:$8 sps:$4 sm:$0xff]  }
 0x313   : > { %4257 = vmatprep.subr.bf16.mxu1 %v8784_v17 }
 0x315   : > { %4217 = vmatpush1.bf16.msra.mxu0 %v8749_v56  ;;  %v8806_v56 = vld [vmem:[%s12921_s4 + $0x2b0] ss:$8 sps:$4 sm:$0xff]  }
 0x316   : > { %4218 = vmatprep.subr.bf16.mxu0 %v8754_v8  ;;  %4258 = vmatpush1.bf16.msra.mxu1 %v8782_v18 }
 0x317   : > { %4259 = vmatprep.subr.bf16.mxu1 %v8790_v20 }
 0x319   : > { %4219 = vmatpush1.bf16.msra.mxu0 %v8752_v9 }
 0x31a   : > { %4220 = vmatprep.subr.bf16.mxu0 %v8757_v10 }
 0x31d   : > { %4221 = vmatpush1.bf16.msra.mxu0 %v8755_v11 }
 0x31e   : > { %4222 = vmatprep.subr.bf16.mxu0 %v8760_v12 }
 0x321   : > { %4223 = vmatpush1.bf16.msra.mxu0 %v8758_v14 }
 0x322   : > { %4224 = vmatprep.subr.bf16.mxu0 %v8763_v16 }
 0x323   : > { %v3500_v57 = vpop.f32.mrb[44].mxu1  ;;  %v3459_v60 = vpop.f32.mrb[44].mxu0 }
 0x324   : > { %v3508_v59 = vadd.f32 %v3500_v57, %v11747_v22  ;;  %v3502_v62 = vpop.f32.mrb[45].mxu1  ;;  %v11838_v63 = vadd.f32 %v3459_v60, %v11750_v25  ;;  %v3461_v0 = vpop.f32.mrb[45].mxu0  ;;  %v8788_v22 = vld [vmem:[%s12921_s4 + $0x280] ss:$8 sps:$4 sm:$0xff]   ;;  %v8769_v25 = vld [vmem:[%s12921_s4 + $0x1d4] ss:$8 sps:$4 sm:$0xff]  }
 0x325   : > { %v3503_v3 = vpop.f32.mrb[46].mxu1  ;;  %v11841_v4 = vadd.f32 %v3461_v0, %v11756_v29  ;;  %v3463_v6 = vpop.f32.mrb[46].mxu0  ;;  %4225 = vmatpush1.bf16.msra.mxu0 %v8761_v19  ;;  %4260 = vmatpush1.bf16.msra.mxu1 %v8788_v22  ;;  %v8770_v29 = vld [vmem:[%s12921_s4 + $0x1e0] ss:$8 sps:$4 sm:$0xff]   ;;  %v8811_v57 = vld [vmem:[%s12921_s4 + $0x254] ss:$8 sps:$4 sm:$0xff]  }
 0x326   : > { %v3504_v5 = vpop.f32.mrb[47].mxu1  ;;  %v3464_v7 = vpop.f32.mrb[47].mxu0  ;;  %4226 = vmatprep.subr.bf16.mxu0 %v8766_v21  ;;  %4261 = vmatprep.subr.bf16.mxu1 %v8796_v24  ;;  %v8814_v60 = vld [vmem:[%s12921_s4 + $0x4] ss:$8 sps:$4 sm:$0xff]  }
 0x327   : > { %v8817_v62 = vld [vmem:[%s12921_s4 + $0x2c4] ss:$8 sps:$4 sm:$0xff]  }
 0x329   : > { %4227 = vmatpush1.bf16.msra.mxu0 %v8764_v23  ;;  %4262 = vmatpush1.bf16.msra.mxu1 %v8794_v26  ;;  %v3115_v23 = vlaneseq  ;;  %v3113_v26 = vld [vmem:[%s12920_s3] sm:$0x7] }
 0x32a   : > { %4228 = vmatprep.subr.bf16.mxu0 %v8769_v25  ;;  %4263 = vmatprep.subr.bf16.mxu1 %v8802_v51  ;;  %v8812_v51 = vld [vmem:[%s12921_s4] ss:$8 sps:$4 sm:$0xff]  }
 0x32b   : > { %v11971_v24 = vshrl.u32 %v3115_v23, 7  ;;  %v8856_v23 = vld [vmem:[%s12921_s4 + $0x74] ss:$8 sps:$4 sm:$0xff]  }
 0x32d   : > { %4229 = vmatpush1.bf16.msra.mxu0 %v8767_v27  ;;  %4264 = vmatpush1.bf16.msra.mxu1 %v8800_v52  ;;  %v11974_v25 = vsub.s32 1, %v11971_v24 }
 0x32e   : > { %4230 = vmatprep.subr.bf16.mxu0 %v8772_v28  ;;  %4265 = vmatprep.subr.bf16.mxu1 %v8808_v55 }
 0x32f   : > { %v3122_v27 = vrot.slane %v3113_v26, %v11974_v25 }
 0x331   : > { %4231 = vmatpush1.bf16.msra.mxu0 %v8770_v29  ;;  %4266 = vmatpush1.bf16.msra.mxu1 %v8806_v56  ;;  %v3131_v28 = vadd.f32 %v3122_v27, %v11345_v2 }
 0x332   : > { %4232 = vmatprep.subr.bf16.mxu0 %v8775_v30  ;;  %4519 = vmatprep.subr.bf16.mxu1 %v8814_v60  ;;  %v3125_v30 = vsub.s32 2, %v11971_v24 }
 0x333   : > { %v3134_v29 = vmax.f32 %v3131_v28, 0.0  ;;  %v8859_v28 = vld [vmem:[%s12921_s4 + $0x334] ss:$8 sps:$4 sm:$0xff]  }
 0x335   : > { %4233 = vmatpush1.bf16.msra.mxu0 %v8773_v31  ;;  %v11983_v31 = vsub.s32 0, %v11971_v24 }
 0x336   : > { %4234 = vmatprep.subr.bf16.mxu0 %v8781_v32  ;;  %v3896_v32 = vpack.c.bf16 %v3134_v29, %v3134_v29  ;;  %v8862_v29 = vld [vmem:[%s12921_s4 + $0x84] ss:$8 sps:$4 sm:$0xff]  }
 0x339   : > { %4235 = vmatpush1.bf16.msra.mxu0 %v8779_v34  ;;  %v11987_v34 = vrot.slane %v3113_v26, %v3125_v30 }
 0x33a   : > { %4236 = vmatprep.subr.bf16.mxu0 %v8787_v38  ;;  %v11990_v38 = vrot.slane %v3113_v26, %v11983_v31  ;;  %v8851_v26 = vld [vmem:[%s12921_s4 + $0x320] ss:$8 sps:$4 sm:$0xff]  }
 0x33d   : > { %4237 = vmatpush1.bf16.msra.mxu0 %v8785_v46 }
 0x33e   : > { %4238 = vmatprep.subr.bf16.mxu0 %v8793_v47 }
 0x341   : > { %4239 = vmatpush1.bf16.msra.mxu0 %v8791_v48 }
 0x342   : > { %4240 = vmatprep.subr.bf16.mxu0 %v8799_v49 }
 0x345   : > { %4241 = vmatpush1.bf16.msra.mxu0 %v8797_v50 }
 0x346   : > { %4242 = vmatprep.subr.bf16.mxu0 %v8805_v53 }
 0x349   : > { %4243 = vmatpush1.bf16.msra.mxu0 %v8803_v54  ;;  %v8820_v54 = vld [vmem:[%s12921_s4 + $0x14] ss:$8 sps:$4 sm:$0xff]  }
 0x34a   : > { %4244 = vmatprep.subr.bf16.mxu0 %v8811_v57  ;;  %v8815_v57 = vld [vmem:[%s12921_s4 + $0x2c0] ss:$8 sps:$4 sm:$0xff]  }
 0x353   : > { %v3595_v33 = vpop.f32.mrb[48].mxu1  ;;  %v3554_v36 = vpop.f32.mrb[48].mxu0 }
 0x354   : > { %v3603_v35 = vadd.f32 %v3595_v33, %v3508_v59  ;;  %v3597_v37 = vpop.f32.mrb[49].mxu1  ;;  %v3601_v39 = vadd.f32 %v3554_v36, %v11838_v63  ;;  %v3556_v40 = vpop.f32.mrb[49].mxu0  ;;  %v8809_v59 = vld [vmem:[%s12921_s4 + $0x250] ss:$8 sps:$4 sm:$0xff]  }
 0x355   : > { %v3598_v41 = vpop.f32.mrb[50].mxu1  ;;  %v3602_v42 = vadd.f32 %v3556_v40, %v11841_v4  ;;  %v3558_v44 = vpop.f32.mrb[50].mxu0  ;;  %4245 = vmatpush1.bf16.msra.mxu0 %v8809_v59  ;;  %v4654_v59 = vshrl.u32 %v3896_v32, 16 }
 0x356   : > { %v3599_v43 = vpop.f32.mrb[51].mxu1  ;;  %v3559_v45 = vpop.f32.mrb[51].mxu0  ;;  %4891 = vmatprep.subr.bf16.mxu0 %v8817_v62  ;;  %v4656_v44 = vshll.u32 %v3896_v32, 16  ;;  %v8818_v62 = vld [vmem:[%s12921_s4 + $0x10] ss:$8 sps:$4 sm:$0xff]  }
 0x358   : > { %v4658_v55 = vrot.slane %v4656_v44, 1  ;;  %v8880_v44 = vld [vmem:[%s12921_s4 + $0xb4] ss:$8 sps:$4 sm:$0xff]  }
 0x383   : > { %v3690_v63 = vpop.f32.mrb[52].mxu1  ;;  %v3649_v3 = vpop.f32.mrb[52].mxu0 }
 0x384   : > { %v3698_v0 = vadd.f32 %v3690_v63, %v3603_v35  ;;  %v3692_v4 = vpop.f32.mrb[53].mxu1  ;;  %v3696_v5 = vadd.f32 %v3649_v3, %v3601_v39  ;;  %v3651_v6 = vpop.f32.mrb[53].mxu0  ;;  %v8823_v63 = vld [vmem:[%s12921_s4 + $0x2d4] ss:$8 sps:$4 sm:$0xff]   ;;  %v8826_v3 = vld [vmem:[%s12921_s4 + $0x24] ss:$8 sps:$4 sm:$0xff]  }
 0x385   : > { %v3693_v7 = vpop.f32.mrb[54].mxu1  ;;  %v3697_v8 = vadd.f32 %v3651_v6, %v3602_v42  ;;  %v3653_v10 = vpop.f32.mrb[54].mxu0  ;;  %v8821_v4 = vld [vmem:[%s12921_s4 + $0x2d0] ss:$8 sps:$4 sm:$0xff]   ;;  %v8829_v6 = vld [vmem:[%s12921_s4 + $0x2e4] ss:$8 sps:$4 sm:$0xff]  }
 0x386   : > { %v3694_v9 = vpop.f32.mrb[55].mxu1  ;;  %v3654_v11 = vpop.f32.mrb[55].mxu0  ;;  %v8832_v7 = vld [vmem:[%s12921_s4 + $0x34] ss:$8 sps:$4 sm:$0xff]  }
 0x387   : > { %v8830_v9 = vld [vmem:[%s12921_s4 + $0x30] ss:$8 sps:$4 sm:$0xff]   ;;  %v8835_v10 = vld [vmem:[%s12921_s4 + $0x2f4] ss:$8 sps:$4 sm:$0xff]   ;;  %v8838_v11 = vld [vmem:[%s12921_s4 + $0x44] ss:$8 sps:$4 sm:$0xff]  }
 0x3b3   : > { %v3785_v12 = vpop.f32.mrb[56].mxu1  ;;  %v3744_v14 = vpop.f32.mrb[56].mxu0 }
 0x3b4   : > { %v3793_v13 = vadd.f32 %v3785_v12, %v3698_v0  ;;  %v3787_v15 = vpop.f32.mrb[57].mxu1  ;;  %v3791_v16 = vadd.f32 %v3744_v14, %v3696_v5  ;;  %v3746_v17 = vpop.f32.mrb[57].mxu0  ;;  %v4659_v0 = vor.u32 %v4658_v55, %v4654_v59  ;;  %v8824_v5 = vld [vmem:[%s12921_s4 + $0x20] ss:$8 sps:$4 sm:$0xff]   ;;  %v8833_v12 = vld [vmem:[%s12921_s4 + $0x2f0] ss:$8 sps:$4 sm:$0xff]  }
 0x3b5   : > { %v3788_v18 = vpop.f32.mrb[58].mxu1  ;;  %v3792_v19 = vadd.f32 %v3746_v17, %v3697_v8  ;;  %v3748_v21 = vpop.f32.mrb[58].mxu0  ;;  %v8827_v8 = vld [vmem:[%s12921_s4 + $0x2e0] ss:$8 sps:$4 sm:$0xff]   ;;  %v8841_v14 = vld [vmem:[%s12921_s4 + $0x304] ss:$8 sps:$4 sm:$0xff]  }
 0x3b6   : > { %v3789_v20 = vpop.f32.mrb[59].mxu1  ;;  %v3749_v22 = vpop.f32.mrb[59].mxu0  ;;  %v8844_v15 = vld [vmem:[%s12921_s4 + $0x54] ss:$8 sps:$4 sm:$0xff]   ;;  %v8842_v17 = vld [vmem:[%s12921_s4 + $0x50] ss:$8 sps:$4 sm:$0xff]  }
 0x3b7   : > { %v8847_v18 = vld [vmem:[%s12921_s4 + $0x314] ss:$8 sps:$4 sm:$0xff]   ;;  %v8845_v20 = vld [vmem:[%s12921_s4 + $0x310] ss:$8 sps:$4 sm:$0xff]   ;;  %v8848_v21 = vld [vmem:[%s12921_s4 + $0x60] ss:$8 sps:$4 sm:$0xff]  }
 0x3b8   : > { %v8853_v22 = vld [vmem:[%s12921_s4 + $0x324] ss:$8 sps:$4 sm:$0xff]   ;;  %v8890_v55 = vld [vmem:[%s12921_s4 + $0xd0] ss:$8 sps:$4 sm:$0xff]  }
 0x3b9   : > { %v8898_v59 = vld [vmem:[%s12921_s4 + $0xe4] ss:$8 sps:$4 sm:$0xff]  }
 0x3e3   : > { %v3880_v33 = vpop.f32.mrb[60].mxu1  ;;  %v3839_v36 = vpop.f32.mrb[60].mxu0 }
 0x3e4   : > { %v3888_v35 = vadd.f32 %v3880_v33, %v3793_v13  ;;  %v3882_v37 = vpop.f32.mrb[61].mxu1  ;;  %v3886_v39 = vadd.f32 %v3839_v36, %v3791_v16  ;;  %v3841_v2 = vpop.f32.mrb[61].mxu0  ;;  %v8836_v13 = vld [vmem:[%s12921_s4 + $0x40] ss:$8 sps:$4 sm:$0xff]   ;;  %v8868_v36 = vld [vmem:[%s12921_s4 + $0x94] ss:$8 sps:$4 sm:$0xff]  }
 0x3e5   : > { %v3883_v40 = vpop.f32.mrb[62].mxu1  ;;  %v3887_v42 = vadd.f32 %v3841_v2, %v3792_v19  ;;  %v3843_v45 = vpop.f32.mrb[62].mxu0  ;;  %v8839_v16 = vld [vmem:[%s12921_s4 + $0x300] ss:$8 sps:$4 sm:$0xff]   ;;  %v8850_v19 = vld [vmem:[%s12921_s4 + $0x64] ss:$8 sps:$4 sm:$0xff]  }
 0x3e6   : > { %v3891_v41 = vadd.f32 %v3888_v35, %v11987_v34  ;;  %v3884_v43 = vpop.f32.mrb[63].mxu1  ;;  %v3889_v46 = vadd.f32 %v3886_v39, %v11990_v38  ;;  %v3844_v47 = vpop.f32.mrb[63].mxu0  ;;  %v8860_v33 = vld [vmem:[%s12921_s4 + $0x80] ss:$8 sps:$4 sm:$0xff]   ;;  %v8865_v35 = vld [vmem:[%s12921_s4 + $0x344] ss:$8 sps:$4 sm:$0xff]  }
 0x3e7   : > { %v3890_v49 = vadd.f32 %v3887_v42, %v3122_v27  ;;  %v8854_v27 = vld [vmem:[%s12921_s4 + $0x70] ss:$8 sps:$4 sm:$0xff]   ;;  %v8863_v37 = vld [vmem:[%s12921_s4 + $0x340] ss:$8 sps:$4 sm:$0xff]   ;;  %v8871_v2 = vld [vmem:[%s12921_s4 + $0x354] ss:$8 sps:$4 sm:$0xff]  }
 0x3e8   : > { %v3894_v48 = vmax.f32 %v3891_v41, 0.0  ;;  %v3892_v50 = vmax.f32 %v3889_v46, 0.0  ;;  %v8866_v39 = vld [vmem:[%s12921_s4 + $0x90] ss:$8 sps:$4 sm:$0xff]   ;;  %v8874_v40 = vld [vmem:[%s12921_s4 + $0xa4] ss:$8 sps:$4 sm:$0xff]  }
 0x3e9   : > { %v3893_v53 = vmax.f32 %v3890_v49, 0.0  ;;  %v8869_v41 = vld [vmem:[%s12921_s4 + $0x350] ss:$8 sps:$4 sm:$0xff]   ;;  %v8872_v42 = vld [vmem:[%s12921_s4 + $0xa0] ss:$8 sps:$4 sm:$0xff]  }
 0x3ea   : > { %v11997_v52 = vpack.c.bf16 %v3894_v48, %v3894_v48  ;;  %v12009_v60 = vpack.c.bf16 %v3892_v50, %v3892_v50  ;;  %v8877_v43 = vld [vmem:[%s12921_s4 + $0x364] ss:$8 sps:$4 sm:$0xff]   ;;  %v8875_v45 = vld [vmem:[%s12921_s4 + $0x360] ss:$8 sps:$4 sm:$0xff]   ;;  %v8878_v46 = vld [vmem:[%s12921_s4 + $0xb0] ss:$8 sps:$4 sm:$0xff]   ;;  %v3130_v50 = vadd.f32 %v11990_v38, %v11339_v61 }
 0x3eb   : > { %v12002_v56 = vpack.c.bf16 %v3893_v53, %v3893_v53  ;;  %v8883_v47 = vld [vmem:[%s12921_s4 + $0x374] ss:$8 sps:$4 sm:$0xff]   ;;  %v8886_v48 = vld [vmem:[%s12921_s4 + $0xc4] ss:$8 sps:$4 sm:$0xff]   ;;  %v8881_v49 = vld [vmem:[%s12921_s4 + $0x370] ss:$8 sps:$4 sm:$0xff]  }
 0x3ec   : > { %7710 = vmatmul.mubr.msk.bf16.vlgmr.msra.gmra.mrb[64].mxu1 %vm4210_vm1, %v11997_v52  ;;  %v8889_v53 = vld [vmem:[%s12921_s4 + $0x384] ss:$8 sps:$4 sm:$0xff]   ;;  %v8887_v61 = vld [vmem:[%s12921_s4 + $0x380] ss:$8 sps:$4 sm:$0xff]   ;;  %v3133_v38 = vmax.f32 %v3130_v50, 0.0 }
 0x3ed   : > { %4520 = vmatpush1.bf16.msra.mxu1 %v8812_v51  ;;  %4551 = vmatprep.mubr.bf16.mxu1 %v3896_v32  ;;  %v8857_v32 = vld [vmem:[%s12921_s4 + $0x330] ss:$8 sps:$4 sm:$0xff]   ;;  %v8884_v51 = vld [vmem:[%s12921_s4 + $0xc0] ss:$8 sps:$4 sm:$0xff]  }
 0x3ee   : > { %4246 = vmatprep.mubr.bf16.mxu0 %v12002_v56  ;;  %4521 = vmatprep.subr.bf16.mxu1 %v8820_v54  ;;  %v8892_v54 = vld [vmem:[%s12921_s4 + $0xd4] ss:$8 sps:$4 sm:$0xff]   ;;  %v8947_v50 = vld [vmem:[%s12921_s4 + $0x3d0] ss:$8 sps:$4 sm:$0xff]  }
 0x3ef   : > { %4247 = vmatmul.mubr.bf16.vlgmr.msra.gmra.mrb[64].mxu0 %v12009_v60 }
 0x3f0   : > { %4892 = vmatpush1.bf16.msra.mxu0 %v8815_v57  ;;  %4923 = vmatprep.mubr.bf16.mxu0 %v4659_v0  ;;  %v8895_v57 = vld [vmem:[%s12921_s4 + $0x394] ss:$8 sps:$4 sm:$0xff]   ;;  %v8896_v0 = vld [vmem:[%s12921_s4 + $0xe0] ss:$8 sps:$4 sm:$0xff]  }
 0x3f1   : > { %4522 = vmatpush1.bf16.msra.mxu1 %v8818_v62  ;;  %4893 = vmatprep.subr.bf16.mxu0 %v8823_v63  ;;  %v8893_v62 = vld [vmem:[%s12921_s4 + $0x390] ss:$8 sps:$4 sm:$0xff]   ;;  %v3895_v63 = vpack.c.bf16 %v3133_v38, %v3133_v38  ;;  %v8956_v38 = vld [vmem:[%s12921_s4 + $0x400] ss:$8 sps:$4 sm:$0xff]  }
 0x3f2   : > { %4523 = vmatprep.subr.bf16.mxu1 %v8826_v3  ;;  %v8901_v3 = vld [vmem:[%s12921_s4 + $0x3a4] ss:$8 sps:$4 sm:$0xff]  }
 0x3f4   : > { %4894 = vmatpush1.bf16.msra.mxu0 %v8821_v4  ;;  %v8904_v4 = vld [vmem:[%s12921_s4 + $0xf4] ss:$8 sps:$4 sm:$0xff]  }
 0x3f5   : > { %4524 = vmatpush1.bf16.msra.mxu1 %v8824_v5  ;;  %4895 = vmatprep.subr.bf16.mxu0 %v8829_v6  ;;  %v8899_v5 = vld [vmem:[%s12921_s4 + $0x3a0] ss:$8 sps:$4 sm:$0xff]   ;;  %v4649_v6 = vshll.u32 %v3895_v63, 16 }
 0x3f6   : > { %4525 = vmatprep.subr.bf16.mxu1 %v8832_v7  ;;  %v8902_v7 = vld [vmem:[%s12921_s4 + $0xf0] ss:$8 sps:$4 sm:$0xff]  }
 0x3f8   : > { %4896 = vmatpush1.bf16.msra.mxu0 %v8827_v8  ;;  %v8907_v8 = vld [vmem:[%s12921_s4 + $0x3b4] ss:$8 sps:$4 sm:$0xff]  }
 0x3f9   : > { %4526 = vmatpush1.bf16.msra.mxu1 %v8830_v9  ;;  %4897 = vmatprep.subr.bf16.mxu0 %v8835_v10  ;;  %v8910_v9 = vld [vmem:[%s12921_s4 + $0x104] ss:$8 sps:$4 sm:$0xff]   ;;  %v8905_v10 = vld [vmem:[%s12921_s4 + $0x3b0] ss:$8 sps:$4 sm:$0xff]  }
 0x3fa   : > { %4527 = vmatprep.subr.bf16.mxu1 %v8838_v11  ;;  %v4651_v11 = vrot.slane %v4649_v6, 1  ;;  %v5028_v6 = vshrl.u32 %v12002_v56, 16 }
 0x3fc   : > { %4898 = vmatpush1.bf16.msra.mxu0 %v8833_v12  ;;  %v8908_v12 = vld [vmem:[%s12921_s4 + $0x100] ss:$8 sps:$4 sm:$0xff]  }
 0x3fd   : > { %4528 = vmatpush1.bf16.msra.mxu1 %v8836_v13  ;;  %4899 = vmatprep.subr.bf16.mxu0 %v8841_v14  ;;  %v8913_v13 = vld [vmem:[%s12921_s4 + $0x524] ss:$8 sps:$4 sm:$0xff]   ;;  %v8916_v14 = vld [vmem:[%s12921_s4 + $0x114] ss:$8 sps:$4 sm:$0xff]  }
 0x3fe   : > { %4529 = vmatprep.subr.bf16.mxu1 %v8844_v15  ;;  %v4647_v15 = vshrl.u32 %v3895_v63, 16 }
 0x400   : > { %4900 = vmatpush1.bf16.msra.mxu0 %v8839_v16  ;;  %v8911_v16 = vld [vmem:[%s12921_s4 + $0x520] ss:$8 sps:$4 sm:$0xff]  }
 0x401   : > { %4530 = vmatpush1.bf16.msra.mxu1 %v8842_v17  ;;  %4901 = vmatprep.subr.bf16.mxu0 %v8847_v18  ;;  %v4652_v17 = vor.u32 %v4651_v11, %v4647_v15  ;;  %v8914_v18 = vld [vmem:[%s12921_s4 + $0x110] ss:$8 sps:$4 sm:$0xff]   ;;  %v8968_v11 = vld [vmem:[%s12921_s4 + $0x440] ss:$8 sps:$4 sm:$0xff]  }
 0x402   : > { %4531 = vmatprep.subr.bf16.mxu1 %v8850_v19  ;;  %v8919_v19 = vld [vmem:[%s12921_s4 + $0x534] ss:$8 sps:$4 sm:$0xff]   ;;  %v8974_v15 = vld [vmem:[%s12921_s4 + $0x460] ss:$8 sps:$4 sm:$0xff]  }
 0x404   : > { %4902 = vmatpush1.bf16.msra.mxu0 %v8845_v20  ;;  %v8922_v20 = vld [vmem:[%s12921_s4 + $0x124] ss:$8 sps:$4 sm:$0xff]  }
 0x405   : > { %4532 = vmatpush1.bf16.msra.mxu1 %v8848_v21  ;;  %4903 = vmatprep.subr.bf16.mxu0 %v8853_v22  ;;  %v8917_v21 = vld [vmem:[%s12921_s4 + $0x530] ss:$8 sps:$4 sm:$0xff]   ;;  %v8920_v22 = vld [vmem:[%s12921_s4 + $0x120] ss:$8 sps:$4 sm:$0xff]  }
 0x406   : > { %4533 = vmatprep.subr.bf16.mxu1 %v8856_v23  ;;  %v8925_v23 = vld [vmem:[%s12921_s4 + $0x544] ss:$8 sps:$4 sm:$0xff]  }
 0x408   : > { %4904 = vmatpush1.bf16.msra.mxu0 %v8851_v26  ;;  %v8928_v26 = vld [vmem:[%s12921_s4 + $0x134] ss:$8 sps:$4 sm:$0xff]  }
 0x409   : > { %4534 = vmatpush1.bf16.msra.mxu1 %v8854_v27  ;;  %4905 = vmatprep.subr.bf16.mxu0 %v8859_v28  ;;  %v8923_v27 = vld [vmem:[%s12921_s4 + $0x540] ss:$8 sps:$4 sm:$0xff]   ;;  %v8926_v28 = vld [vmem:[%s12921_s4 + $0x130] ss:$8 sps:$4 sm:$0xff]  }
 0x40a   : > { %4535 = vmatprep.subr.bf16.mxu1 %v8862_v29  ;;  %v8931_v29 = vld [vmem:[%s12921_s4 + $0x554] ss:$8 sps:$4 sm:$0xff]  }
 0x40c   : > { %4906 = vmatpush1.bf16.msra.mxu0 %v8857_v32  ;;  %v8934_v32 = vld [vmem:[%s12921_s4 + $0x144] ss:$8 sps:$4 sm:$0xff]  }
 0x40d   : > { %4536 = vmatpush1.bf16.msra.mxu1 %v8860_v33  ;;  %4907 = vmatprep.subr.bf16.mxu0 %v8865_v35  ;;  %v8929_v33 = vld [vmem:[%s12921_s4 + $0x550] ss:$8 sps:$4 sm:$0xff]   ;;  %v8932_v35 = vld [vmem:[%s12921_s4 + $0x140] ss:$8 sps:$4 sm:$0xff]  }
 0x40e   : > { %4537 = vmatprep.subr.bf16.mxu1 %v8868_v36  ;;  %v8937_v36 = vld [vmem:[%s12921_s4 + $0x564] ss:$8 sps:$4 sm:$0xff]  }
 0x410   : > { %4908 = vmatpush1.bf16.msra.mxu0 %v8863_v37  ;;  %v3132_v37 = vadd.f32 %v11987_v34, %v11336_v58  ;;  %v8943_v58 = vld [vmem:[%s12921_s4 + $0x574] ss:$8 sps:$4 sm:$0xff]  }
 0x411   : > { %4538 = vmatpush1.bf16.msra.mxu1 %v8866_v39  ;;  %4909 = vmatprep.subr.bf16.mxu0 %v8871_v2  ;;  %v8940_v39 = vld [vmem:[%s12921_s4 + $0x154] ss:$8 sps:$4 sm:$0xff]   ;;  %v8935_v2 = vld [vmem:[%s12921_s4 + $0x560] ss:$8 sps:$4 sm:$0xff]  }
 0x412   : > { %4539 = vmatprep.subr.bf16.mxu1 %v8874_v40  ;;  %v5036_v40 = vshll.u32 %v11997_v52, 16  ;;  %v3135_v34 = vmax.f32 %v3132_v37, 0.0  ;;  %v9003_v37 = vld [vmem:[%s12921_s4 + $0x4f4] ss:$8 sps:$4 sm:$0xff]  }
 0x414   : > { %4910 = vmatpush1.bf16.msra.mxu0 %v8869_v41  ;;  %v8938_v41 = vld [vmem:[%s12921_s4 + $0x150] ss:$8 sps:$4 sm:$0xff]  }
 0x415   : > { %4540 = vmatpush1.bf16.msra.mxu1 %v8872_v42  ;;  %4911 = vmatprep.subr.bf16.mxu0 %v8877_v43  ;;  %v8946_v42 = vld [vmem:[%s12921_s4 + $0x3c4] ss:$8 sps:$4 sm:$0xff]   ;;  %v8941_v43 = vld [vmem:[%s12921_s4 + $0x570] ss:$8 sps:$4 sm:$0xff]  }
 0x416   : > { %4541 = vmatprep.subr.bf16.mxu1 %v8880_v44  ;;  %v5038_v44 = vrot.slane %v5036_v40, 1  ;;  %v9004_v40 = vld [vmem:[%s12921_s4 + $0x500] ss:$8 sps:$4 sm:$0xff]  }
 0x418   : > { %4912 = vmatpush1.bf16.msra.mxu0 %v8875_v45  ;;  %v8944_v45 = vld [vmem:[%s12921_s4 + $0x3c0] ss:$8 sps:$4 sm:$0xff]  }
 0x419   : > { %4542 = vmatpush1.bf16.msra.mxu1 %v8878_v46  ;;  %4913 = vmatprep.subr.bf16.mxu0 %v8883_v47  ;;  %v3897_v46 = vpack.c.bf16 %v3135_v34, %v3135_v34  ;;  %v8949_v47 = vld [vmem:[%s12921_s4 + $0x3d4] ss:$8 sps:$4 sm:$0xff]   ;;  %v9007_v34 = vld [vmem:[%s12921_s4 + $0x510] ss:$8 sps:$4 sm:$0xff]  }
 0x41a   : > { %4543 = vmatprep.subr.bf16.mxu1 %v8886_v48  ;;  %v5034_v48 = vshrl.u32 %v11997_v52, 16  ;;  %v8950_v52 = vld [vmem:[%s12921_s4 + $0x3e0] ss:$8 sps:$4 sm:$0xff]  }
 0x41c   : > { %4914 = vmatpush1.bf16.msra.mxu0 %v8881_v49  ;;  %v5039_v49 = vor.u32 %v5038_v44, %v5034_v48  ;;  %v9013_v48 = vld [vmem:[%s12923_s6 + $0xc0] sm:$0xff]  }
 0x41d   : > { %4544 = vmatpush1.bf16.msra.mxu1 %v8884_v51  ;;  %4915 = vmatprep.subr.bf16.mxu0 %v8889_v53  ;;  %v8952_v51 = vld [vmem:[%s12921_s4 + $0x3e4] ss:$8 sps:$4 sm:$0xff]   ;;  %v8955_v53 = vld [vmem:[%s12921_s4 + $0x3f4] ss:$8 sps:$4 sm:$0xff]  }
 0x41e   : > { %4545 = vmatprep.subr.bf16.mxu1 %v8892_v54  ;;  %v8953_v54 = vld [vmem:[%s12921_s4 + $0x3f0] ss:$8 sps:$4 sm:$0xff]  }
 0x420   : > { %4916 = vmatpush1.bf16.msra.mxu0 %v8887_v61  ;;  %v8958_v61 = vld [vmem:[%s12921_s4 + $0x404] ss:$8 sps:$4 sm:$0xff]  }
 0x421   : > { %4546 = vmatpush1.bf16.msra.mxu1 %v8890_v55  ;;  %4917 = vmatprep.subr.bf16.mxu0 %v8895_v57  ;;  %v4662_v55 = vshll.u32 %v3897_v46, 16  ;;  %v8961_v57 = vld [vmem:[%s12921_s4 + $0x414] ss:$8 sps:$4 sm:$0xff]  }
 0x422   : > { %4547 = vmatprep.subr.bf16.mxu1 %v8898_v59  ;;  %v5030_v59 = vshll.u32 %v12002_v56, 16  ;;  %v8970_v56 = vld [vmem:[%s12921_s4 + $0x444] ss:$8 sps:$4 sm:$0xff]  }
 0x424   : > { %4918 = vmatpush1.bf16.msra.mxu0 %v8893_v62  ;;  %v8959_v62 = vld [vmem:[%s12921_s4 + $0x410] ss:$8 sps:$4 sm:$0xff]  }
 0x425   : > { %4548 = vmatpush1.bf16.msra.mxu1 %v8896_v0  ;;  %4919 = vmatprep.subr.bf16.mxu0 %v8901_v3  ;;  %v8964_v0 = vld [vmem:[%s12921_s4 + $0x424] ss:$8 sps:$4 sm:$0xff]   ;;  %v5032_v3 = vrot.slane %v5030_v59, 1 }
 0x426   : > { %4549 = vmatprep.subr.bf16.mxu1 %v8904_v4  ;;  %v4660_v4 = vshrl.u32 %v3897_v46, 16 }
 0x428   : > { %4920 = vmatpush1.bf16.msra.mxu0 %v8899_v5  ;;  %v8962_v5 = vld [vmem:[%s12921_s4 + $0x420] ss:$8 sps:$4 sm:$0xff]  }
 0x429   : > { %4550 = vmatpush1.bf16.msra.mxu1 %v8902_v7  ;;  %4921 = vmatprep.subr.bf16.mxu0 %v8907_v8  ;;  %v8967_v8 = vld [vmem:[%s12921_s4 + $0x434] ss:$8 sps:$4 sm:$0xff]  }
 0x42a   : > { %4560 = vmatprep.subr.bf16.mxu1 %v8910_v9  ;;  %v5033_v9 = vor.u32 %v5032_v3, %v5028_v6  ;;  %v9026_v6 = vld [vmem:[%s12923_s6 + $0x20] sm:$0xff]  }
 0x42c   : > { %4552 = vmatmul.mubr.bf16.vlgmr.msra.gmra.mrb[68].mxu1 %v3895_v63  ;;  %4922 = vmatpush1.bf16.msra.mxu0 %v8905_v10  ;;  %v4664_v63 = vrot.slane %v4662_v55, 1  ;;  %v8965_v10 = vld [vmem:[%s12921_s4 + $0x430] ss:$8 sps:$4 sm:$0xff]  }
 0x42d   : > { %4561 = vmatpush1.bf16.msra.mxu1 %v8908_v12  ;;  %5306 = vmatprep.subr.bf16.mxu0 %v8913_v13  ;;  %v8973_v12 = vld [vmem:[%s12921_s4 + $0x454] ss:$8 sps:$4 sm:$0xff]   ;;  %v8971_v13 = vld [vmem:[%s12921_s4 + $0x450] ss:$8 sps:$4 sm:$0xff]  }
 0x42e   : > { %4562 = vmatprep.subr.bf16.mxu1 %v8916_v14  ;;  %4592 = vmatprep.mubr.bf16.mxu1 %v9538_v1  ;;  %v4665_v7 = vor.u32 %v4664_v63, %v4660_v4  ;;  %v8976_v14 = vld [vmem:[%s12921_s4 + $0x464] ss:$8 sps:$4 sm:$0xff]   ;;  %v9025_v55 = vld [vmem:[%s12923_s6 + $0xd8] sm:$0xff]  }
 0x42f   : > { %4924 = vmatmul.mubr.bf16.vlgmr.msra.gmra.mrb[68].mxu0 %v4652_v17  ;;  %v8977_v17 = vld [vmem:[%s12921_s4 + $0x470] ss:$8 sps:$4 sm:$0xff]  }
 0x430   : > { %5307 = vmatpush1.bf16.msra.mxu0 %v8911_v16  ;;  %5338 = vmatprep.mubr.bf16.mxu0 %v9538_v1  ;;  %v8979_v16 = vld [vmem:[%s12921_s4 + $0x474] ss:$8 sps:$4 sm:$0xff]  }
 0x431   : > { %4563 = vmatpush1.bf16.msra.mxu1 %v8914_v18  ;;  %5308 = vmatprep.subr.bf16.mxu0 %v8919_v19  ;;  %v8982_v18 = vld [vmem:[%s12921_s4 + $0x484] ss:$8 sps:$4 sm:$0xff]   ;;  %v8980_v19 = vld [vmem:[%s12921_s4 + $0x480] ss:$8 sps:$4 sm:$0xff]   ;;  %v9027_v63 = vld [vmem:[%s12923_s6 + $0x98] sm:$0xff]  }
 0x432   : > { %4564 = vmatprep.subr.bf16.mxu1 %v8922_v20  ;;  %v8985_v20 = vld [vmem:[%s12921_s4 + $0x494] ss:$8 sps:$4 sm:$0xff]  }
 0x434   : > { %5309 = vmatpush1.bf16.msra.mxu0 %v8917_v21  ;;  %v8983_v21 = vld [vmem:[%s12921_s4 + $0x490] ss:$8 sps:$4 sm:$0xff]  }
 0x435   : > { %4565 = vmatpush1.bf16.msra.mxu1 %v8920_v22  ;;  %5310 = vmatprep.subr.bf16.mxu0 %v8925_v23  ;;  %v8988_v22 = vld [vmem:[%s12921_s4 + $0x4a4] ss:$8 sps:$4 sm:$0xff]   ;;  %v8986_v23 = vld [vmem:[%s12921_s4 + $0x4a0] ss:$8 sps:$4 sm:$0xff]  }
 0x436   : > { %4566 = vmatprep.subr.bf16.mxu1 %v8928_v26  ;;  %v8991_v26 = vld [vmem:[%s12921_s4 + $0x4b4] ss:$8 sps:$4 sm:$0xff]  }
 0x438   : > { %5311 = vmatpush1.bf16.msra.mxu0 %v8923_v27  ;;  %v8989_v27 = vld [vmem:[%s12921_s4 + $0x4b0] ss:$8 sps:$4 sm:$0xff]  }
 0x439   : > { %4567 = vmatpush1.bf16.msra.mxu1 %v8926_v28  ;;  %5312 = vmatprep.subr.bf16.mxu0 %v8931_v29  ;;  %v8994_v28 = vld [vmem:[%s12921_s4 + $0x4c4] ss:$8 sps:$4 sm:$0xff]   ;;  %v8992_v29 = vld [vmem:[%s12921_s4 + $0x4c0] ss:$8 sps:$4 sm:$0xff]  }
 0x43a   : > { %4568 = vmatprep.subr.bf16.mxu1 %v8934_v32  ;;  %v8997_v32 = vld [vmem:[%s12921_s4 + $0x4d4] ss:$8 sps:$4 sm:$0xff]  }
 0x43c   : > { %5313 = vmatpush1.bf16.msra.mxu0 %v8929_v33  ;;  %v8995_v33 = vld [vmem:[%s12921_s4 + $0x4d0] ss:$8 sps:$4 sm:$0xff]  }
 0x43d   : > { %4569 = vmatpush1.bf16.msra.mxu1 %v8932_v35  ;;  %5314 = vmatprep.subr.bf16.mxu0 %v8937_v36  ;;  %v9000_v35 = vld [vmem:[%s12921_s4 + $0x4e4] ss:$8 sps:$4 sm:$0xff]   ;;  %v8998_v36 = vld [vmem:[%s12921_s4 + $0x4e0] ss:$8 sps:$4 sm:$0xff]  }
 0x43e   : > { %4570 = vmatprep.subr.bf16.mxu1 %v8940_v39  ;;  %v9001_v39 = vld [vmem:[%s12921_s4 + $0x4f0] ss:$8 sps:$4 sm:$0xff]  }
 0x440   : > { %5315 = vmatpush1.bf16.msra.mxu0 %v8935_v2  ;;  %v9006_v2 = vld [vmem:[%s12921_s4 + $0x504] ss:$8 sps:$4 sm:$0xff]  }
 0x441   : > { %4571 = vmatpush1.bf16.msra.mxu1 %v8938_v41  ;;  %5316 = vmatprep.subr.bf16.mxu0 %v8943_v58  ;;  %v5023_v41 = vshll.u32 %v12009_v60, 16  ;;  %v9009_v58 = vld [vmem:[%s12921_s4 + $0x514] ss:$8 sps:$4 sm:$0xff]  }
 0x442   : > { %4932 = vmatprep.subr.bf16.mxu1 %v8946_v42 }
 0x443   : > { %v5025_v42 = vrot.slane %v5023_v41, 1 }
 0x444   : > { %7755 = vmatmul.mubr.msk.bf16.vlgmr.msra.gmra.mrb[72].mxu1 %vm4210_vm1, %v3897_v46  ;;  %5317 = vmatpush1.bf16.msra.mxu0 %v8941_v43  ;;  %v5021_v43 = vshrl.u32 %v12009_v60, 16  ;;  %v9011_v46 = vld [vmem:[%s12923_s6] sm:$0xff]  }
 0x445   : > { %4933 = vmatpush1.bf16.msra.mxu1 %v8944_v45  ;;  %4964 = vmatprep.mubr.bf16.mxu1 %v9538_v1  ;;  %v9010_v45 = vld [vmem:[%s12923_s6 + $0x40] sm:$0xff]  }
 0x446   : > { %4934 = vmatprep.subr.bf16.mxu1 %v8949_v47  ;;  %v5026_v44 = vor.u32 %v5025_v42, %v5021_v43  ;;  %v9012_v47 = vld [vmem:[%s12923_s6 + $0x48] sm:$0xff]   ;;  %v9015_v60 = vld [vmem:[%s12923_s6 + $0x80] sm:$0xff]   ;;  %8180 = vmatprep.subr.bf16.mxu0 %v9013_v48 }
 0x447   : > { %7933 = vmatmul.mubr.msk.bf16.vlgmr.msra.gmra.mrb[72].mxu0 %vm4210_vm1, %v5039_v49  ;;  %v9017_v49 = vld [vmem:[%s12923_s6 + $0xc8] sm:$0xff]  }
 0x448   : > { %8181 = vmatpush3.bf16.msra.mxu0 %v9015_v60 }
 0x449   : > { %4935 = vmatpush1.bf16.msra.mxu1 %v8947_v50  ;;  %v9014_v50 = vld [vmem:[%s12923_s6 + $0x8] sm:$0xff]   ;;  %8182 = vmatprep.subr.bf16.mxu0 %v9017_v49 }
 0x44a   : > { %4936 = vmatprep.subr.bf16.mxu1 %v8952_v51  ;;  %v9016_v51 = vld [vmem:[%s12923_s6 + $0x50] sm:$0xff]  }
 0x44d   : > { %4937 = vmatpush1.bf16.msra.mxu1 %v8950_v52  ;;  %v9019_v52 = vld [vmem:[%s12923_s6 + $0x88] sm:$0xff]  }
 0x44e   : > { %4938 = vmatprep.subr.bf16.mxu1 %v8955_v53  ;;  %v9021_v53 = vld [vmem:[%s12923_s6 + $0xd0] sm:$0xff]   ;;  %8183 = vmatpush3.bf16.msra.mxu0 %v9019_v52 }
 0x44f   : > { %8184 = vmatprep.subr.bf16.mxu0 %v9021_v53 }
 0x451   : > { %4939 = vmatpush1.bf16.msra.mxu1 %v8953_v54  ;;  %v9018_v54 = vld [vmem:[%s12923_s6 + $0x10] sm:$0xff]  }
 0x452   : > { %4940 = vmatprep.subr.bf16.mxu1 %v8958_v61  ;;  %v9020_v61 = vld [vmem:[%s12923_s6 + $0x58] sm:$0xff]  }
 0x455   : > { %4941 = vmatpush1.bf16.msra.mxu1 %v8956_v38  ;;  %v9023_v38 = vld [vmem:[%s12923_s6 + $0x90] sm:$0xff]  }
 0x456   : > { %4942 = vmatprep.subr.bf16.mxu1 %v8961_v57  ;;  %v9022_v57 = vld [vmem:[%s12923_s6 + $0x18] sm:$0xff]   ;;  %8185 = vmatpush3.bf16.msra.mxu0 %v9023_v38  ;;  %v5349_v38 = vld [vmem:[%s12922_s5] sm:$0x3] }
 0x457   : > { %8186 = vmatprep.subr.bf16.mxu0 %v9025_v55 }
 0x459   : > { %4943 = vmatpush1.bf16.msra.mxu1 %v8959_v62  ;;  %v9024_v62 = vld [vmem:[%s12923_s6 + $0x60] sm:$0xff]  }
 0x45a   : > { %5265 = vmatprep.subr.bf16.mxu1 %v8964_v0  ;;  %8187 = vmatpush3.bf16.msra.mxu0 %v9027_v63 }
 0x45c   : > { %7844 = vmatmul.mubr.msk.bf16.vlgmr.msra.gmra.mrb[76].mxu1 %vm4210_vm1, %v4665_v7 }
 0x45d   : > { %5266 = vmatpush1.bf16.msra.mxu1 %v8962_v5  ;;  %5297 = vmatprep.mubr.bf16.mxu1 %v5033_v9 }
 0x45e   : > { %5267 = vmatprep.subr.bf16.mxu1 %v8967_v8 }
 0x461   : > { %5268 = vmatpush1.bf16.msra.mxu1 %v8965_v10 }
 0x462   : > { %5269 = vmatprep.subr.bf16.mxu1 %v8970_v56 }
 0x465   : > { %5270 = vmatpush1.bf16.msra.mxu1 %v8968_v11  ;;  %v9028_v11 = vld [vmem:[%s12923_s6 + $0x68] sm:$0xff]  }
 0x466   : > { %5271 = vmatprep.subr.bf16.mxu1 %v8973_v12  ;;  %v9029_v12 = vld [vmem:[%s12923_s6 + $0xe0] sm:$0xff]  }
 0x467   : > { %8188 = vmatprep.subr.bf16.mxu0 %v9029_v12 }
 0x469   : > { %5272 = vmatpush1.bf16.msra.mxu1 %v8971_v13  ;;  %v9030_v13 = vld [vmem:[%s12923_s6 + $0x28] sm:$0xff]  }
 0x46a   : > { %5273 = vmatprep.subr.bf16.mxu1 %v8976_v14  ;;  %v9031_v14 = vld [vmem:[%s12923_s6 + $0xa0] sm:$0xff]  }
 0x46b   : > { %8189 = vmatpush3.bf16.msra.mxu0 %v9031_v14 }
 0x46d   : > { %5274 = vmatpush1.bf16.msra.mxu1 %v8974_v15  ;;  %v9032_v15 = vld [vmem:[%s12923_s6 + $0x70] sm:$0xff]  }
 0x46e   : > { %5275 = vmatprep.subr.bf16.mxu1 %v8979_v16  ;;  %v9033_v16 = vld [vmem:[%s12923_s6 + $0xe8] sm:$0xff]  }
 0x46f   : > { %8190 = vmatprep.subr.bf16.mxu0 %v9033_v16 }
 0x471   : > { %5276 = vmatpush1.bf16.msra.mxu1 %v8977_v17  ;;  %v9034_v17 = vld [vmem:[%s12923_s6 + $0x30] sm:$0xff]  }
 0x472   : > { %5277 = vmatprep.subr.bf16.mxu1 %v8982_v18  ;;  %v9035_v18 = vld [vmem:[%s12923_s6 + $0xa8] sm:$0xff]  }
 0x473   : > { %8191 = vmatpush3.bf16.msra.mxu0 %v9035_v18 }
 0x475   : > { %5278 = vmatpush1.bf16.msra.mxu1 %v8980_v19  ;;  %v9036_v19 = vld [vmem:[%s12923_s6 + $0x78] sm:$0xff]  }
 0x476   : > { %5279 = vmatprep.subr.bf16.mxu1 %v8985_v20  ;;  %v9037_v20 = vld [vmem:[%s12923_s6 + $0xf0] sm:$0xff]  }
 0x477   : > { %8192 = vmatprep.subr.bf16.mxu0 %v9037_v20 }
 0x479   : > { %5280 = vmatpush1.bf16.msra.mxu1 %v8983_v21  ;;  %v9038_v21 = vld [vmem:[%s12923_s6 + $0x38] sm:$0xff]  }
 0x47a   : > { %5281 = vmatprep.subr.bf16.mxu1 %v8988_v22  ;;  %v9039_v22 = vld [vmem:[%s12923_s6 + $0xb0] sm:$0xff]  }
 0x47b   : > { %8193 = vmatpush3.bf16.msra.mxu0 %v9039_v22 }
 0x47d   : > { %5282 = vmatpush1.bf16.msra.mxu1 %v8986_v23  ;;  %v9040_v23 = vld [vmem:[%s12923_s6 + $0xf8] sm:$0xff]  }
 0x47e   : > { %5283 = vmatprep.subr.bf16.mxu1 %v8991_v26  ;;  %v9041_v26 = vld [vmem:[%s12923_s6 + $0xb8] sm:$0xff]   ;;  %8194 = vmatprep.subr.bf16.mxu0 %v9040_v23  ;;  %v9045_v23 = vld [vmem:[%s12923_s6 + $0x108] sm:$0xff]  }
 0x47f   : > { %8195 = vmatpush3.bf16.msra.mxu0 %v9041_v26  ;;  %v9046_v26 = vld [vmem:[%s12923_s6 + $0x150] sm:$0xff]  }
 0x481   : > { %5284 = vmatpush1.bf16.msra.mxu1 %v8989_v27 }
 0x482   : > { %5285 = vmatprep.subr.bf16.mxu1 %v8994_v28  ;;  %v9042_v28 = vld [vmem:[%s12923_s6 + $0x140] sm:$0xff]  }
 0x483   : > { %8224 = vmatprep.subr.bf16.mxu0 %v9042_v28  ;;  %v9048_v28 = vld [vmem:[%s12923_s6 + $0x158] sm:$0xff]  }
 0x485   : > { %5286 = vmatpush1.bf16.msra.mxu1 %v8992_v29 }
 0x486   : > { %5287 = vmatprep.subr.bf16.mxu1 %v8997_v32 }
 0x489   : > { %5288 = vmatpush1.bf16.msra.mxu1 %v8995_v33 }
 0x48a   : > { %5289 = vmatprep.subr.bf16.mxu1 %v9000_v35 }
 0x48d   : > { %5290 = vmatpush1.bf16.msra.mxu1 %v8998_v36 }
 0x48e   : > { %5291 = vmatprep.subr.bf16.mxu1 %v9003_v37 }
 0x491   : > { %5292 = vmatpush1.bf16.msra.mxu1 %v9001_v39 }
 0x492   : > { %5293 = vmatprep.subr.bf16.mxu1 %v9006_v2 }
 0x495   : > { %5294 = vmatpush1.bf16.msra.mxu1 %v9004_v40 }
 0x496   : > { %5295 = vmatprep.subr.bf16.mxu1 %v9009_v58 }
 0x499   : > { %5296 = vmatpush1.bf16.msra.mxu1 %v9007_v34 }
 0x49a   : > { %8202 = vmatprep.subr.bf16.mxu1 %v9010_v45 }
 0x49c   : > { %5298 = vmatmul.mubr.bf16.vlgmr.msra.gmra.mrb[80].mxu1 %v5026_v44 }
 0x49d   : > { %8203 = vmatpush3.bf16.msra.mxu1 %v9011_v46 }
 0x49e   : > { %8204 = vmatprep.subr.bf16.mxu1 %v9012_v47 }
 0x4a1   : > { %8205 = vmatpush3.bf16.msra.mxu1 %v9014_v50 }
 0x4a2   : > { %8206 = vmatprep.subr.bf16.mxu1 %v9016_v51 }
 0x4a5   : > { %8207 = vmatpush3.bf16.msra.mxu1 %v9018_v54 }
 0x4a6   : > { %8208 = vmatprep.subr.bf16.mxu1 %v9020_v61 }
 0x4a9   : > { %8209 = vmatpush3.bf16.msra.mxu1 %v9022_v57 }
 0x4aa   : > { %8210 = vmatprep.subr.bf16.mxu1 %v9024_v62 }
 0x4ad   : > { %8211 = vmatpush3.bf16.msra.mxu1 %v9026_v6 }
 0x4ae   : > { %8212 = vmatprep.subr.bf16.mxu1 %v9028_v11 }
 0x4b1   : > { %8213 = vmatpush3.bf16.msra.mxu1 %v9030_v13 }
 0x4b2   : > { %8214 = vmatprep.subr.bf16.mxu1 %v9032_v15 }
 0x4b5   : > { %8215 = vmatpush3.bf16.msra.mxu1 %v9034_v17 }
 0x4b6   : > { %8216 = vmatprep.subr.bf16.mxu1 %v9036_v19  ;;  %v9043_v19 = vld [vmem:[%s12923_s6 + $0x100] sm:$0xff]  }
 0x4b9   : > { %8217 = vmatpush3.bf16.msra.mxu1 %v9038_v21  ;;  %v9044_v21 = vld [vmem:[%s12923_s6 + $0x148] sm:$0xff]  }
 0x4bf   : > { %v4289_v59 = vpop.f32.mrb[64].mxu1 }
 0x4c0   : > { %v4291_v0 = vpop.f32.mrb[65].mxu1 }
 0x4c1   : > { %v4293_v3 = vpop.f32.mrb[66].mxu1 }
 0x4c2   : > { %v4248_v4 = vpop.f32.mrb[64].mxu0  ;;  %v4294_v5 = vpop.f32.mrb[67].mxu1 }
 0x4c3   : > { %v4290_v7 = vadd.f32 %v4289_v59, %v4248_v4  ;;  %v4250_v8 = vpop.f32.mrb[65].mxu0  ;;  %v5354_v59 = vrot.slane %v5349_v38, %v11983_v31 }
 0x4c4   : > { %v4292_v9 = vadd.f32 %v4291_v0, %v4250_v8  ;;  %v4252_v10 = vpop.f32.mrb[66].mxu0  ;;  %v5358_v0 = vrot.slane %v5349_v38, %v11974_v25  ;;  %v9087_v38 = vld [vmem:[%s12925_s8 + $0x18c] ss:$16 sps:$4 sm:$0xff]  }
 0x4c5   : > { %v4253_v56 = vpop.f32.mrb[67].mxu0 }
 0x4ff   : > { %v4553_v27 = vpop.f32.mrb[68].mxu1 }
 0x500   : > { %v4554_v29 = vadd.f32 %v4553_v27, %v4290_v7  ;;  %v4555_v32 = vpop.f32.mrb[69].mxu1  ;;  %v9047_v27 = vld [vmem:[%s12923_s6 + $0x110] sm:$0xff]  }
 0x501   : > { %v4556_v33 = vadd.f32 %v4555_v32, %v4292_v9  ;;  %v4557_v35 = vpop.f32.mrb[70].mxu1  ;;  %v9050_v32 = vld [vmem:[%s12923_s6 + $0x160] sm:$0xff]  }
 0x502   : > { %v4558_v36 = vpop.f32.mrb[71].mxu1  ;;  %v4925_v37 = vpop.f32.mrb[68].mxu0  ;;  %v9052_v35 = vld [vmem:[%s12923_s6 + $0x168] sm:$0xff]  }
 0x503   : > { %v4927_v39 = vpop.f32.mrb[69].mxu0  ;;  %v9053_v36 = vld [vmem:[%s12923_s6 + $0x128] sm:$0xff]  }
 0x504   : > { %v4929_v2 = vpop.f32.mrb[70].mxu0 }
 0x505   : > { %v4930_v40 = vpop.f32.mrb[71].mxu0  ;;  %v9056_v2 = vld [vmem:[%s12923_s6 + $0x178] sm:$0xff]  }
 0x506   : > { %v9057_v40 = vld [vmem:[%s12923_s6 + $0x138] sm:$0xff]  }
 0x517   : > { %v4594_v41 = vpop.f32.mrb[72].mxu1 }
 0x518   : > { %v4595_v58 = vadd.f32 %v4594_v41, %v4554_v29  ;;  %v4596_v34 = vpop.f32.mrb[73].mxu1  ;;  %v9049_v29 = vld [vmem:[%s12923_s6 + $0x118] sm:$0xff]  }
 0x519   : > { %v4597_v42 = vadd.f32 %v4596_v34, %v4556_v33  ;;  %v4598_v43 = vpop.f32.mrb[74].mxu1  ;;  %v9051_v33 = vld [vmem:[%s12923_s6 + $0x120] sm:$0xff]  }
 0x51a   : > { %v4599_v44 = vpop.f32.mrb[75].mxu1  ;;  %v5340_v45 = vpop.f32.mrb[72].mxu0  ;;  %v9060_v34 = vld [vmem:[%s12925_s8 + $0x104] ss:$16 sps:$4 sm:$0xff]   ;;  %v9063_v43 = vld [vmem:[%s12925_s8 + $0x10c] ss:$16 sps:$4 sm:$0xff]  }
 0x51b   : > { %v5342_v46 = vpop.f32.mrb[73].mxu0  ;;  %v9066_v44 = vld [vmem:[%s12925_s8 + $0x124] ss:$16 sps:$4 sm:$0xff]   ;;  %6135 = vmatprep.subr.bf16.mxu1 %v9060_v34  ;;  %v9112_v34 = vld [vmem:[%s12925_s8 + $0x20] ss:$16 sps:$4 sm:$0xff]  }
 0x51c   : > { %v5344_v47 = vpop.f32.mrb[74].mxu0 }
 0x51d   : > { %v5345_v48 = vpop.f32.mrb[75].mxu0  ;;  %v9067_v47 = vld [vmem:[%s12925_s8 + $0x128] ss:$16 sps:$4 sm:$0xff]  }
 0x51e   : > { %v9072_v48 = vld [vmem:[%s12925_s8 + $0x144] ss:$16 sps:$4 sm:$0xff]  }
 0x52f   : > { %v4966_v60 = vpop.f32.mrb[76].mxu1 }
 0x530   : > { %v4967_v49 = vadd.f32 %v4966_v60, %v4925_v37  ;;  %v4968_v50 = vpop.f32.mrb[77].mxu1  ;;  %v9054_v37 = vld [vmem:[%s12923_s6 + $0x170] sm:$0xff]   ;;  %v9075_v60 = vld [vmem:[%s12925_s8 + $0x14c] ss:$16 sps:$4 sm:$0xff]  }
 0x531   : > { %v4969_v51 = vadd.f32 %v4968_v50, %v4927_v39  ;;  %v4970_v52 = vpop.f32.mrb[78].mxu1  ;;  %v9055_v39 = vld [vmem:[%s12923_s6 + $0x130] sm:$0xff]   ;;  %v9073_v50 = vld [vmem:[%s12925_s8 + $0x148] ss:$16 sps:$4 sm:$0xff]  }
 0x532   : > { %v4973_v53 = vadd.f32 %v4967_v49, %v4595_v58  ;;  %v4971_v54 = vpop.f32.mrb[79].mxu1  ;;  %v9058_v58 = vld [vmem:[%s12925_s8 + $0x100] ss:$16 sps:$4 sm:$0xff]   ;;  %v9081_v52 = vld [vmem:[%s12925_s8 + $0x16c] ss:$16 sps:$4 sm:$0xff]  }
 0x533   : > { %v4974_v61 = vadd.f32 %v4969_v51, %v4597_v42  ;;  %v9061_v42 = vld [vmem:[%s12925_s8 + $0x108] ss:$16 sps:$4 sm:$0xff]   ;;  %v9070_v49 = vld [vmem:[%s12925_s8 + $0x140] ss:$16 sps:$4 sm:$0xff]   ;;  %v9078_v51 = vld [vmem:[%s12925_s8 + $0x164] ss:$16 sps:$4 sm:$0xff]  }
 0x534   : > { %v9079_v54 = vld [vmem:[%s12925_s8 + $0x168] ss:$16 sps:$4 sm:$0xff]  }
 0x56f   : > { %v5299_v55 = vpop.f32.mrb[80].mxu1 }
 0x570   : > { %v5341_v57 = vadd.f32 %v5340_v45, %v5299_v55  ;;  %v5301_v62 = vpop.f32.mrb[81].mxu1  ;;  %v9069_v45 = vld [vmem:[%s12925_s8 + $0x12c] ss:$16 sps:$4 sm:$0xff]   ;;  %v9082_v55 = vld [vmem:[%s12925_s8 + $0x180] ss:$16 sps:$4 sm:$0xff]  }
 0x571   : > { %v5343_v63 = vadd.f32 %v5342_v46, %v5301_v62  ;;  %v5303_v3 = vpop.f32.mrb[82].mxu1  ;;  %v9064_v46 = vld [vmem:[%s12925_s8 + $0x120] ss:$16 sps:$4 sm:$0xff]   ;;  %v9093_v62 = vld [vmem:[%s12925_s8 + $0x1ac] ss:$16 sps:$4 sm:$0xff]  }
 0x572   : > { %v5347_v4 = vadd.f32 %v5341_v57, %v4973_v53  ;;  %v5304_v5 = vpop.f32.mrb[83].mxu1  ;;  %v9076_v53 = vld [vmem:[%s12925_s8 + $0x160] ss:$16 sps:$4 sm:$0xff]   ;;  %v9085_v57 = vld [vmem:[%s12925_s8 + $0x188] ss:$16 sps:$4 sm:$0xff]  }
 0x573   : > { %v5348_v6 = vadd.f32 %v5343_v63, %v4974_v61  ;;  %v9084_v61 = vld [vmem:[%s12925_s8 + $0x184] ss:$16 sps:$4 sm:$0xff]   ;;  %v9088_v63 = vld [vmem:[%s12925_s8 + $0x1a0] ss:$16 sps:$4 sm:$0xff]  }
 0x574   : > { %v5361_v7 = vadd.f32 %v5354_v59, %v5347_v4  ;;  %v9090_v59 = vld [vmem:[%s12925_s8 + $0x1a4] ss:$16 sps:$4 sm:$0xff]   ;;  %v9099_v4 = vld [vmem:[%s12925_s8 + $0x1cc] ss:$16 sps:$4 sm:$0xff]   ;;  %v9094_v5 = vld [vmem:[%s12925_s8 + $0x1c0] ss:$16 sps:$4 sm:$0xff]  }
 0x575   : > { %v5362_v8 = vadd.f32 %v5358_v0, %v5348_v6  ;;  %v9091_v0 = vld [vmem:[%s12925_s8 + $0x1a8] ss:$16 sps:$4 sm:$0xff]   ;;  %v9096_v3 = vld [vmem:[%s12925_s8 + $0x1c4] ss:$16 sps:$4 sm:$0xff]  }
 0x576   : > { %v5363_v9 = vmax.f32 %v5361_v7, 0.0  ;;  %v9097_v6 = vld [vmem:[%s12925_s8 + $0x1c8] ss:$16 sps:$4 sm:$0xff]   ;;  %v9102_v7 = vld [vmem:[%s12925_s8 + $0x1e4] ss:$16 sps:$4 sm:$0xff]  }
 0x577   : > { %v5364_v10 = vmax.f32 %v5362_v8, 0.0  ;;  %v9105_v8 = vld [vmem:[%s12925_s8 + $0x1ec] ss:$16 sps:$4 sm:$0xff]  }
 0x578   : > { %v5365_v56 = vpack.c.bf16 %v5363_v9, %v5363_v9  ;;  %v9100_v9 = vld [vmem:[%s12925_s8 + $0x1e0] ss:$16 sps:$4 sm:$0xff]  }
 0x579   : > { %v5366_v11 = vpack.c.bf16 %v5364_v10, %v5364_v10  ;;  %v9103_v10 = vld [vmem:[%s12925_s8 + $0x1e8] ss:$16 sps:$4 sm:$0xff]  }
 0x57a   : > { %v5435_v12 = vshll.u32 %v5365_v56, 16  ;;  %v5433_v17 = vshrl.u32 %v5365_v56, 16  ;;  %v5755_v41 = vrot.slane %v5365_v56, 1 }
 0x57b   : > { %5712 = vmatprep.mubr.bf16.mxu1 %v5366_v11  ;;  %v5442_v13 = vshll.u32 %v5366_v11, 16  ;;  %v5440_v15 = vshrl.u32 %v5366_v11, 16  ;;  %v5756_v22 = vrot.slane %v5366_v11, 1  ;;  %v9111_v11 = vld [vmem:[%s12925_s8 + $0xc] ss:$16 sps:$4 sm:$0xff]  }
 0x57c   : > { %5713 = vmatmul.mubr.bf16.vlgmr.msra.gmra.mrb[84].mxu1 %v5365_v56  ;;  %v5437_v14 = vrot.slane %v5435_v12, 1  ;;  %v9108_v56 = vld [vmem:[%s12925_s8 + $0x4] ss:$16 sps:$4 sm:$0xff]  }
 0x57d   : > { %v5444_v16 = vrot.slane %v5442_v13, 1  ;;  %6167 = vmatprep.mubr.bf16.mxu1 %v9538_v1  ;;  %6136 = vmatpush1.bf16.msra.mxu1 %v9058_v58  ;;  %v9117_v58 = vld [vmem:[%s12925_s8 + $0x2c] ss:$16 sps:$4 sm:$0xff]  }
 0x57e   : > { %v5438_v20 = vor.u32 %v5437_v14, %v5433_v17  ;;  %6137 = vmatprep.subr.bf16.mxu1 %v9066_v44  ;;  %v9123_v44 = vld [vmem:[%s12925_s8 + $0x4c] ss:$16 sps:$4 sm:$0xff]  }
 0x57f   : > { %v5445_v18 = vor.u32 %v5444_v16, %v5440_v15 }
 0x581   : > { %5576 = vmatprep.mubr.bf16.mxu0 %v5445_v18  ;;  %6138 = vmatpush1.bf16.msra.mxu1 %v9064_v46  ;;  %v9121_v46 = vld [vmem:[%s12925_s8 + $0x48] ss:$16 sps:$4 sm:$0xff]  }
 0x582   : > { %5577 = vmatmul.mubr.bf16.vlgmr.msra.gmra.mrb[76].mxu0 %v5438_v20  ;;  %6139 = vmatprep.subr.bf16.mxu1 %v9072_v48  ;;  %v9124_v48 = vld [vmem:[%s12925_s8 + $0x60] ss:$16 sps:$4 sm:$0xff]  }
 0x583   : > { %8225 = vmatpush3.bf16.msra.mxu0 %v9043_v19  ;;  %5887 = vmatprep.mubr.bf16.mxu0 %v5756_v22 }
 0x584   : > { %8226 = vmatprep.subr.bf16.mxu0 %v9044_v21 }
 0x585   : > { %6140 = vmatpush1.bf16.msra.mxu1 %v9070_v49  ;;  %v9132_v49 = vld [vmem:[%s12925_s8 + $0x84] ss:$16 sps:$4 sm:$0xff]  }
 0x586   : > { %6141 = vmatprep.subr.bf16.mxu1 %v9078_v51  ;;  %v9130_v51 = vld [vmem:[%s12925_s8 + $0x80] ss:$16 sps:$4 sm:$0xff]  }
 0x587   : > { %8227 = vmatpush3.bf16.msra.mxu0 %v9045_v23 }
 0x588   : > { %8228 = vmatprep.subr.bf16.mxu0 %v9046_v26 }
 0x589   : > { %6142 = vmatpush1.bf16.msra.mxu1 %v9076_v53  ;;  %v9138_v53 = vld [vmem:[%s12925_s8 + $0xa4] ss:$16 sps:$4 sm:$0xff]  }
 0x58a   : > { %6143 = vmatprep.subr.bf16.mxu1 %v9084_v61  ;;  %v9136_v61 = vld [vmem:[%s12925_s8 + $0xa0] ss:$16 sps:$4 sm:$0xff]  }
 0x58b   : > { %8229 = vmatpush3.bf16.msra.mxu0 %v9047_v27 }
 0x58c   : > { %8230 = vmatprep.subr.bf16.mxu0 %v9048_v28 }
 0x58d   : > { %6144 = vmatpush1.bf16.msra.mxu1 %v9082_v55  ;;  %v9144_v55 = vld [vmem:[%s12925_s8 + $0xc4] ss:$16 sps:$4 sm:$0xff]  }
 0x58e   : > { %6145 = vmatprep.subr.bf16.mxu1 %v9090_v59  ;;  %v9142_v59 = vld [vmem:[%s12925_s8 + $0xc0] ss:$16 sps:$4 sm:$0xff]  }
 0x58f   : > { %8231 = vmatpush3.bf16.msra.mxu0 %v9049_v29  ;;  %v8046_v29 = vld [vmem:[%s12924_s7] ss:$0 sm:$0xff] }
 0x590   : > { %8232 = vmatprep.subr.bf16.mxu0 %v9050_v32 }
 0x591   : > { %6146 = vmatpush1.bf16.msra.mxu1 %v9088_v63  ;;  %v9150_v63 = vld [vmem:[%s12925_s8 + $0xe4] ss:$16 sps:$4 sm:$0xff]  }
 0x592   : > { %6147 = vmatprep.subr.bf16.mxu1 %v9096_v3  ;;  %v9148_v3 = vld [vmem:[%s12925_s8 + $0xe0] ss:$16 sps:$4 sm:$0xff]  }
 0x593   : > { %8233 = vmatpush3.bf16.msra.mxu0 %v9051_v33 }
 0x594   : > { %8234 = vmatprep.subr.bf16.mxu0 %v9052_v35 }
 0x595   : > { %6148 = vmatpush1.bf16.msra.mxu1 %v9094_v5  ;;  %v9154_v5 = vld [vmem:[%s12927_s10 + $0x40] sm:$0xff]  }
 0x596   : > { %6149 = vmatprep.subr.bf16.mxu1 %v9102_v7  ;;  %v9156_v7 = vld [vmem:[%s12927_s10] sm:$0xff]  }
 0x597   : > { %8235 = vmatpush3.bf16.msra.mxu0 %v9053_v36 }
 0x598   : > { %8236 = vmatprep.subr.bf16.mxu0 %v9054_v37 }
 0x599   : > { %6150 = vmatpush1.bf16.msra.mxu1 %v9100_v9  ;;  %v9158_v9 = vld [vmem:[%s12927_s10 + $0x48] sm:$0xff]  }
 0x59a   : > { %6377 = vmatprep.subr.bf16.mxu1 %v9108_v56  ;;  %v9160_v56 = vld [vmem:[%s12927_s10 + $0x8] sm:$0xff]  }
 0x59b   : > { %8237 = vmatpush3.bf16.msra.mxu0 %v9055_v39  ;;  %v9106_v39 = vld [vmem:[%s12925_s8] ss:$16 sps:$4 sm:$0xff]  }
 0x59c   : > { %8238 = vmatprep.subr.bf16.mxu0 %v9056_v2  ;;  %v9109_v2 = vld [vmem:[%s12925_s8 + $0x8] ss:$16 sps:$4 sm:$0xff]  }
 0x59f   : > { %8239 = vmatpush3.bf16.msra.mxu0 %v9057_v40 }
 0x5a0   : > { %6176 = vmatprep.subr.bf16.mxu0 %v9063_v43  ;;  %v9120_v43 = vld [vmem:[%s12925_s8 + $0x44] ss:$16 sps:$4 sm:$0xff]  }
 0x5a2   : > { %5888 = vmatmul.mubr.bf16.vlgmr.msra.gmra.mrb[80].mxu0 %v5755_v41  ;;  %v9114_v41 = vld [vmem:[%s12925_s8 + $0x24] ss:$16 sps:$4 sm:$0xff]  }
 0x5a3   : > { %6208 = vmatprep.mubr.bf16.mxu0 %v9538_v1  ;;  %6177 = vmatpush1.bf16.msra.mxu0 %v9061_v42  ;;  %v9115_v42 = vld [vmem:[%s12925_s8 + $0x28] ss:$16 sps:$4 sm:$0xff]  }
 0x5a4   : > { %6178 = vmatprep.subr.bf16.mxu0 %v9069_v45  ;;  %v9118_v45 = vld [vmem:[%s12925_s8 + $0x40] ss:$16 sps:$4 sm:$0xff]  }
 0x5a7   : > { %6179 = vmatpush1.bf16.msra.mxu0 %v9067_v47  ;;  %v9126_v47 = vld [vmem:[%s12925_s8 + $0x64] ss:$16 sps:$4 sm:$0xff]  }
 0x5a8   : > { %6180 = vmatprep.subr.bf16.mxu0 %v9075_v60  ;;  %v9127_v60 = vld [vmem:[%s12925_s8 + $0x68] ss:$16 sps:$4 sm:$0xff]  }
 0x5ab   : > { %6181 = vmatpush1.bf16.msra.mxu0 %v9073_v50  ;;  %v9135_v50 = vld [vmem:[%s12925_s8 + $0x8c] ss:$16 sps:$4 sm:$0xff]  }
 0x5ac   : > { %6182 = vmatprep.subr.bf16.mxu0 %v9081_v52  ;;  %v9133_v52 = vld [vmem:[%s12925_s8 + $0x88] ss:$16 sps:$4 sm:$0xff]  }
 0x5af   : > { %6183 = vmatpush1.bf16.msra.mxu0 %v9079_v54  ;;  %v9141_v54 = vld [vmem:[%s12925_s8 + $0xac] ss:$16 sps:$4 sm:$0xff]  }
 0x5b0   : > { %6184 = vmatprep.subr.bf16.mxu0 %v9087_v38  ;;  %v9139_v38 = vld [vmem:[%s12925_s8 + $0xa8] ss:$16 sps:$4 sm:$0xff]  }
 0x5b3   : > { %6185 = vmatpush1.bf16.msra.mxu0 %v9085_v57  ;;  %v9147_v57 = vld [vmem:[%s12925_s8 + $0xcc] ss:$16 sps:$4 sm:$0xff]  }
 0x5b4   : > { %6186 = vmatprep.subr.bf16.mxu0 %v9093_v62  ;;  %v9145_v62 = vld [vmem:[%s12925_s8 + $0xc8] ss:$16 sps:$4 sm:$0xff]  }
 0x5b7   : > { %6187 = vmatpush1.bf16.msra.mxu0 %v9091_v0  ;;  %v9153_v0 = vld [vmem:[%s12925_s8 + $0xec] ss:$16 sps:$4 sm:$0xff]  }
 0x5b8   : > { %6188 = vmatprep.subr.bf16.mxu0 %v9099_v4  ;;  %v9151_v4 = vld [vmem:[%s12925_s8 + $0xe8] ss:$16 sps:$4 sm:$0xff]  }
 0x5bb   : > { %6189 = vmatpush1.bf16.msra.mxu0 %v9097_v6  ;;  %v9155_v6 = vld [vmem:[%s12927_s10 + $0xc0] sm:$0xff]  }
 0x5bc   : > { %6190 = vmatprep.subr.bf16.mxu0 %v9105_v8  ;;  %v9157_v8 = vld [vmem:[%s12927_s10 + $0x80] sm:$0xff]  }
 0x5bf   : > { %6191 = vmatpush1.bf16.msra.mxu0 %v9103_v10  ;;  %v9159_v10 = vld [vmem:[%s12927_s10 + $0xc8] sm:$0xff]  }
 0x5c0   : > { %6418 = vmatprep.subr.bf16.mxu0 %v9111_v11  ;;  %v9161_v11 = vld [vmem:[%s12927_s10 + $0x88] sm:$0xff]  }
 0x64f   : > { %v8218_v12 = vpop.f32.mrb[84].mxu1 }
 0x650   : > { %v8219_v13 = vpop.f32.mrb[85].mxu1 }
 0x651   : > { %v8220_v14 = vadd.f32 %v8219_v13, %v8218_v12  ;;  %v8221_v15 = vpop.f32.mrb[86].mxu1  ;;  %v9162_v12 = vld [vmem:[%s12927_s10 + $0x50] sm:$0xff]  }
 0x652   : > { %v8222_v16 = vpop.f32.mrb[87].mxu1  ;;  %v9163_v13 = vld [vmem:[%s12927_s10 + $0xd0] sm:$0xff]  }
 0x653   : > { %v9165_v15 = vld [vmem:[%s12927_s10 + $0x90] sm:$0xff]   ;;  %v9166_v16 = vld [vmem:[%s12927_s10 + $0x58] sm:$0xff]  }
 0x655   : > { %v8196_v17 = vpop.f32.mrb[76].mxu0 }
 0x656   : > { %v8197_v18 = vpop.f32.mrb[77].mxu0 }
 0x657   : > { %v8198_v19 = vadd.f32 %v8197_v18, %v8196_v17  ;;  %v8199_v20 = vpop.f32.mrb[78].mxu0  ;;  %v9167_v17 = vld [vmem:[%s12927_s10 + $0xd8] sm:$0xff]  }
 0x658   : > { %v8200_v21 = vpop.f32.mrb[79].mxu0  ;;  %v9168_v18 = vld [vmem:[%s12927_s10 + $0x18] sm:$0xff]   ;;  %v9170_v20 = vld [vmem:[%s12927_s10 + $0x60] sm:$0xff]  }
 0x659   : > { %v5715_v22 = vadd.f32 %v8220_v14, %v8198_v19  ;;  %v9164_v14 = vld [vmem:[%s12927_s10 + $0x10] sm:$0xff]   ;;  %v9169_v19 = vld [vmem:[%s12927_s10 + $0x98] sm:$0xff]   ;;  %v9171_v21 = vld [vmem:[%s12927_s10 + $0xe0] sm:$0xff]  }
 0x675   : > { %v8240_v23 = vpop.f32.mrb[80].mxu0 }
 0x676   : > { %v8241_v26 = vpop.f32.mrb[81].mxu0 }
 0x677   : > { %v8242_v27 = vadd.f32 %v8241_v26, %v8240_v23  ;;  %v8243_v28 = vpop.f32.mrb[82].mxu0  ;;  %v9173_v23 = vld [vmem:[%s12927_s10 + $0xa0] sm:$0xff]   ;;  %v9174_v26 = vld [vmem:[%s12927_s10 + $0x68] sm:$0xff]  }
 0x678   : > { %v8244_v32 = vpop.f32.mrb[83].mxu0  ;;  %v9176_v28 = vld [vmem:[%s12927_s10 + $0x28] sm:$0xff]  }
 0x679   : > { %v5895_v33 = vadd.f32 %v8242_v27, %v5715_v22  ;;  %v9172_v22 = vld [vmem:[%s12927_s10 + $0x20] sm:$0xff]   ;;  %v9175_v27 = vld [vmem:[%s12927_s10 + $0xe8] sm:$0xff]   ;;  %v9178_v32 = vld [vmem:[%s12927_s10 + $0x70] sm:$0xff]  }
 0x67b   : > { %v5903_v35 = vadd.f32 %v8046_v29, %v5895_v33  ;;  %v9177_v29 = vld [vmem:[%s12927_s10 + $0xa8] sm:$0xff]   ;;  %v9179_v33 = vld [vmem:[%s12927_s10 + $0xf0] sm:$0xff]  }
 0x67d   : > { %v5904_v36 = vmax.f32 %v5903_v35, 0.0  ;;  %v9180_v35 = vld [vmem:[%s12927_s10 + $0x30] sm:$0xff]  }
 0x67f   : > { %v12666_v37 = vpack.c.bf16 %v5904_v36, %v5904_v36  ;;  %v9181_v36 = vld [vmem:[%s12927_s10 + $0xb0] sm:$0xff]  }
 0x681   : > { %v5972_v40 = vshrl.u32 %v12666_v37, 16 }
 0x683   : > { %6168 = vmatmul.mubr.bf16.vlgmr.msra.gmra.mrb[88].mxu1 %v5972_v40  ;;  %6209 = vmatmul.mubr.bf16.vlgmr.msra.gmra.mrb[84].mxu0 %v5972_v40  ;;  %v9185_v40 = vld [vmem:[%s12927_s10 + $0xb8] sm:$0xff]  }
 0x684   : > { %6378 = vmatpush1.bf16.msra.mxu1 %v9106_v39  ;;  %6419 = vmatpush1.bf16.msra.mxu0 %v9109_v2  ;;  %v9183_v39 = vld [vmem:[%s12927_s10 + $0xf8] sm:$0xff]  }
 0x685   : > { %6379 = vmatprep.subr.bf16.mxu1 %v9114_v41  ;;  %6420 = vmatprep.subr.bf16.mxu0 %v9117_v58  ;;  %v9184_v2 = vld [vmem:[%s12927_s10 + $0x38] sm:$0xff]  }
 0x686   : > { %6409 = vmatprep.mubr.bf16.mxu1 %v9538_v1  ;;  %6450 = vmatprep.mubr.bf16.mxu0 %v9538_v1  ;;  %v9129_v1 = vld [vmem:[%s12925_s8 + $0x6c] ss:$16 sps:$4 sm:$0xff]  }
 0x688   : > { %6380 = vmatpush1.bf16.msra.mxu1 %v9112_v34  ;;  %6421 = vmatpush1.bf16.msra.mxu0 %v9115_v42 }
 0x689   : > { %6381 = vmatprep.subr.bf16.mxu1 %v9120_v43  ;;  %6422 = vmatprep.subr.bf16.mxu0 %v9123_v44 }
 0x68c   : > { %6382 = vmatpush1.bf16.msra.mxu1 %v9118_v45  ;;  %6423 = vmatpush1.bf16.msra.mxu0 %v9121_v46 }
 0x68d   : > { %6383 = vmatprep.subr.bf16.mxu1 %v9126_v47  ;;  %6424 = vmatprep.subr.bf16.mxu0 %v9129_v1  ;;  %v6459_v47 = vld [vmem:[%s12926_s9] sm:$0xf]  ;;  %v6475_v1 = vsub.s32 3, %v11971_v24 }
 0x690   : > { %6384 = vmatpush1.bf16.msra.mxu1 %v9124_v48  ;;  %6425 = vmatpush1.bf16.msra.mxu0 %v9127_v60  ;;  %v6464_v48 = vrot.slane %v6459_v47, %v11983_v31  ;;  %v6472_v60 = vrot.slane %v6459_v47, %v3125_v30 }
 0x691   : > { %6385 = vmatprep.subr.bf16.mxu1 %v9132_v49  ;;  %6426 = vmatprep.subr.bf16.mxu0 %v9135_v50 }
 0x694   : > { %6386 = vmatpush1.bf16.msra.mxu1 %v9130_v51  ;;  %6427 = vmatpush1.bf16.msra.mxu0 %v9133_v52  ;;  %v6468_v51 = vrot.slane %v6459_v47, %v11974_v25  ;;  %v6476_v52 = vrot.slane %v6459_v47, %v6475_v1 }
 0x695   : > { %6387 = vmatprep.subr.bf16.mxu1 %v9138_v53  ;;  %6428 = vmatprep.subr.bf16.mxu0 %v9141_v54 }
 0x698   : > { %6388 = vmatpush1.bf16.msra.mxu1 %v9136_v61  ;;  %6429 = vmatpush1.bf16.msra.mxu0 %v9139_v38 }
 0x699   : > { %6389 = vmatprep.subr.bf16.mxu1 %v9144_v55  ;;  %6430 = vmatprep.subr.bf16.mxu0 %v9147_v57 }
 0x69c   : > { %6390 = vmatpush1.bf16.msra.mxu1 %v9142_v59  ;;  %6431 = vmatpush1.bf16.msra.mxu0 %v9145_v62 }
 0x69d   : > { %6391 = vmatprep.subr.bf16.mxu1 %v9150_v63  ;;  %6432 = vmatprep.subr.bf16.mxu0 %v9153_v0 }
 0x6a0   : > { %6392 = vmatpush1.bf16.msra.mxu1 %v9148_v3  ;;  %6433 = vmatpush1.bf16.msra.mxu0 %v9151_v4 }
 0x6a1   : > { %8246 = vmatprep.subr.bf16.mxu1 %v9154_v5  ;;  %8268 = vmatprep.subr.bf16.mxu0 %v9155_v6 }
 0x6a3   : > { %6410 = vmatmul.mubr.bf16.vlgmr.msra.gmra.mrb[92].mxu1 %v12666_v37  ;;  %6451 = vmatmul.mubr.bf16.vlgmr.msra.gmra.mrb[88].mxu0 %v12666_v37  ;;  %v9182_v37 = vld [vmem:[%s12927_s10 + $0x78] sm:$0xff]  }
 0x6a4   : > { %8247 = vmatpush3.bf16.msra.mxu1 %v9156_v7  ;;  %8269 = vmatpush3.bf16.msra.mxu0 %v9157_v8 }
 0x6a5   : > { %8248 = vmatprep.subr.bf16.mxu1 %v9158_v9  ;;  %8270 = vmatprep.subr.bf16.mxu0 %v9159_v10 }
 0x6a8   : > { %8249 = vmatpush3.bf16.msra.mxu1 %v9160_v56  ;;  %8271 = vmatpush3.bf16.msra.mxu0 %v9161_v11 }
 0x6a9   : > { %8250 = vmatprep.subr.bf16.mxu1 %v9162_v12  ;;  %8272 = vmatprep.subr.bf16.mxu0 %v9163_v13  ;;  %v6557_v12 = vld [vmem:[%s12928_s11] sm:$0x1] }
 0x6ac   : > { %8251 = vmatpush3.bf16.msra.mxu1 %v9164_v14  ;;  %8273 = vmatpush3.bf16.msra.mxu0 %v9165_v15 }
 0x6ad   : > { %8252 = vmatprep.subr.bf16.mxu1 %v9166_v16  ;;  %8274 = vmatprep.subr.bf16.mxu0 %v9167_v17 }
 0x6b0   : > { %8253 = vmatpush3.bf16.msra.mxu1 %v9168_v18  ;;  %8275 = vmatpush3.bf16.msra.mxu0 %v9169_v19 }
 0x6b1   : > { %8254 = vmatprep.subr.bf16.mxu1 %v9170_v20  ;;  %8276 = vmatprep.subr.bf16.mxu0 %v9171_v21 }
 0x6b4   : > { %8255 = vmatpush3.bf16.msra.mxu1 %v9172_v22  ;;  %8277 = vmatpush3.bf16.msra.mxu0 %v9173_v23 }
 0x6b5   : > { %8256 = vmatprep.subr.bf16.mxu1 %v9174_v26  ;;  %8278 = vmatprep.subr.bf16.mxu0 %v9175_v27 }
 0x6b8   : > { %8257 = vmatpush3.bf16.msra.mxu1 %v9176_v28  ;;  %8279 = vmatpush3.bf16.msra.mxu0 %v9177_v29 }
 0x6b9   : > { %8258 = vmatprep.subr.bf16.mxu1 %v9178_v32  ;;  %8280 = vmatprep.subr.bf16.mxu0 %v9179_v33 }
 0x6bc   : > { %8259 = vmatpush3.bf16.msra.mxu1 %v9180_v35  ;;  %8281 = vmatpush3.bf16.msra.mxu0 %v9181_v36 }
 0x6bd   : > { %8260 = vmatprep.subr.bf16.mxu1 %v9182_v37  ;;  %8282 = vmatprep.subr.bf16.mxu0 %v9183_v39 }
 0x6c0   : > { %8261 = vmatpush3.bf16.msra.mxu1 %v9184_v2  ;;  %8283 = vmatpush3.bf16.msra.mxu0 %v9185_v40 }
 0x756   : > { %v6169_v41 = vpop.f32.mrb[88].mxu1  ;;  %v6210_v58 = vpop.f32.mrb[84].mxu0 }
 0x757   : > { %v6171_v34 = vpop.f32.mrb[89].mxu1  ;;  %v6212_v42 = vpop.f32.mrb[85].mxu0 }
 0x758   : > { %v6173_v43 = vpop.f32.mrb[90].mxu1  ;;  %v6214_v44 = vpop.f32.mrb[86].mxu0 }
 0x759   : > { %v6174_v45 = vpop.f32.mrb[91].mxu1  ;;  %v6215_v46 = vpop.f32.mrb[87].mxu0 }
 0x776   : > { %v6411_v49 = vpop.f32.mrb[92].mxu1  ;;  %v6452_v50 = vpop.f32.mrb[88].mxu0 }
 0x777   : > { %v6412_v53 = vadd.f32 %v6411_v49, %v6169_v41  ;;  %v6453_v54 = vadd.f32 %v6452_v50, %v6210_v58  ;;  %v6413_v61 = vpop.f32.mrb[93].mxu1  ;;  %v6454_v38 = vpop.f32.mrb[89].mxu0 }
 0x778   : > { %v6414_v55 = vadd.f32 %v6413_v61, %v6171_v34  ;;  %v6455_v57 = vadd.f32 %v6454_v38, %v6212_v42  ;;  %v6415_v59 = vpop.f32.mrb[94].mxu1  ;;  %v6456_v62 = vpop.f32.mrb[90].mxu0 }
 0x779   : > { %v6481_v63 = vadd.f32 %v6464_v48, %v6412_v53  ;;  %v6483_v0 = vadd.f32 %v6472_v60, %v6453_v54  ;;  %v6416_v3 = vpop.f32.mrb[95].mxu1  ;;  %v6457_v31 = vpop.f32.mrb[91].mxu0 }
 0x77a   : > { %v6482_v24 = vadd.f32 %v6468_v51, %v6414_v55  ;;  %v6484_v30 = vadd.f32 %v6476_v52, %v6455_v57 }
 0x77b   : > { %v6485_v4 = vmax.f32 %v6481_v63, 0.0  ;;  %v6487_v5 = vmax.f32 %v6483_v0, 0.0 }
 0x77c   : > { %v6486_v6 = vmax.f32 %v6482_v24, 0.0  ;;  %v6488_v25 = vmax.f32 %v6484_v30, 0.0 }
 0x77d   : > { %v6489_v9 = vpack.c.bf16 %v6485_v4, %v6485_v4  ;;  %v6491_v10 = vpack.c.bf16 %v6487_v5, %v6487_v5 }
 0x77e   : > { %v6490_v7 = vpack.c.bf16 %v6486_v6, %v6486_v6  ;;  %v6492_v8 = vpack.c.bf16 %v6488_v25, %v6488_v25 }
 0x780   : > { %6782 = vmatprep.mubr.bf16.mxu1 %v6490_v7  ;;  %6822 = vmatprep.mubr.bf16.mxu0 %v6492_v8 }
 0x781   : > { %6783 = vmatmul.mubr.bf16.vlgmr.msra.gmra.mrb[96].mxu1 %v6489_v9  ;;  %6823 = vmatmul.mubr.bf16.vlgmr.msra.gmra.mrb[92].mxu0 %v6491_v10 }
 0x854   : > { %v8262_v56 = vpop.f32.mrb[96].mxu1  ;;  %v8284_v11 = vpop.f32.mrb[92].mxu0 }
 0x855   : > { %v8263_v13 = vpop.f32.mrb[97].mxu1  ;;  %v8285_v14 = vpop.f32.mrb[93].mxu0 }
 0x856   : > { %v8264_v15 = vadd.f32 %v8263_v13, %v8262_v56  ;;  %v8286_v16 = vadd.f32 %v8285_v14, %v8284_v11  ;;  %v8265_v17 = vpop.f32.mrb[98].mxu1  ;;  %v8287_v18 = vpop.f32.mrb[94].mxu0 }
 0x857   : > { %v8266_v19 = vpop.f32.mrb[99].mxu1  ;;  %v8288_v20 = vpop.f32.mrb[95].mxu0 }
 0x858   : > { %v6785_v21 = vadd.f32 %v8264_v15, %v6557_v12 }
 0x85a   : > { %v6825_v22 = vadd.f32 %v8286_v16, %v6785_v21 }
 0x85c   : > { %6831 = vst.msk [vmem:[%s420_s15] sm:$0x1] %vm6830_vm2, %v6825_v22 }
 0x85d   : > { %9487 = shalt.err (!%p9484_p3)
}
 0x85e   : > { %s9488_s23 = scalar_lea.hbm %s12875_s30, 16  ;;  %s9492_s15 = scalar_lea.hbm %s12929_s12, 32 }
 0x85f   : > { %p9489_p4 = scmp.ne.s32.totalorder %s12875_s30, %s9488_s23  ;;  %p9493_p9 = scmp.lt.u32.totalorder %s12875_s30, %s12929_s12 }
 0x860   : > { %p9494_p10 = scmp.lt.u32.totalorder %s9492_s15, %s9488_s23  ;;  %p9496_p12 = scmp.lt.u32.totalorder %s9488_s23, %s12875_s30 }
 0x861   : > { %p9490_p7 = pnand %p9489_p4, %p9643_p5 }
 0x862   : > { %p9495_p11 = por %p9494_p10, %p9493_p9 }
 0x863   : > { %p9491_p8 = pneg %p9490_p7 }
 0x864   : > { %p9497_p13 = por %p9496_p12, %p9495_p11 }
 0x866   : > { %p9498_p0 = pnand %p9497_p13, %p9491_p8 }
 0x868   : > { %9501 = shalt.err (!%p9498_p0)
}
 0x869   : > { %8290 = dma.vmem_to_hbm [thread:$0]  (%p9643_p5), %s12877_s16, 16, %s12875_s30, %s6833_s18  }
 0x86a PF: > { %p8296_p1 = scmp.ge.s32.totalorder %s9536_s24, 2  ;;  %s6857_s26 = sand.u32 1, %s9524_s21  }
 0x86b   : > { %s6858_s25 = scalar_lea.sflag [#allocation3], %s6857_s26 }
 0x86c   : > { %p8293_p2 = pnand %p8296_p1, %p9647_p6 }
 0x86e   : > { %9519 = dma.done.wait (!%p8293_p2), %s6858_s25, 16  }
 0x86f   : > { %9521 = vsyncadd (!%p8293_p2), %s6858_s25, 4294967280  ;;  %s12940_s24 = sld [smem:[#allocation6_spill]]  ;;  %s12941_s28 = sld [smem:[#allocation5_spill]] }
 0x870   : > { %s12942_s23 = sld [smem:[#allocation7_spill]]  ;;  %s12943_s21 = smov %s9528_s22 }
 0x875   : > { %p22_p3 = scmp.ge.s32.totalorder %s12940_s24, 4   ;;  %s12944_s22 = smov %s12941_s28 }
 0x877   :  { %24 = sbr.rel (!%p22_p3) target bundleno = 3 (0x3), region = 133 }
 0x87e   :  { %6862 = vsyncpa [#allocation3], 1 }
 0x87f   :  { %6864 = vsyncpa [#allocation3 + $0x1], 1 }

</bundles_post_ra>
